<compile_context>
chip_gen: v7x
topology: tpu7x:2x2x1
jax: 0.10.0
libtpu: 0.0.40
codegen_flags: <defaults>
</compile_context>

<pallas_src>
import functools

import numpy as np
import jax
import jax.numpy as jnp
from jax.experimental import pallas as pl
from jax.experimental.pallas import tpu as pltpu

PAD = 128  # lane width; every channel dim is padded to this


# ----------------------------- fused Pallas kernel ----------------------------------


def _gnn_fused_kernel(g_ref, adj_ref, pool_ref,
                      lin_w_ref, lin_b_ref,
                      conv_hw_ref, gru_wih_ref, gru_bih_ref, gru_bhh_ref,
                      out_ref, *, n_conv_layers):
    f32 = jnp.float32
    x = g_ref[...]            # (Np, 128) padded node features
    adj = adj_ref[...]        # (Np, Np)  dense weighted adjacency (A[dst, src])

    def lin(v, idx, relu):
        y = jnp.dot(v, lin_w_ref[idx], preferred_element_type=f32) + lin_b_ref[idx]
        return jnp.maximum(y, 0.0) if relu else y

    # embedding MLP
    x = lin(x, 0, True)       # linear_embedding  + relu
    x = lin(x, 1, True)       # linear_embedding2 + relu

    # two GatedGraphConv blocks, each with n_conv_layers GRU steps, each followed by relu
    for c in range(2):
        wih = gru_wih_ref[c]      # (128, 384), gate-aligned
        bih = gru_bih_ref[c]      # (1, 384)
        bhh = gru_bhh_ref[c]      # (1, 384)
        for l in range(n_conv_layers):
            # merged MXU push: [x @ W_l | x @ W_hh] in one matmul -> (Np, 512)
            hw = jnp.dot(x, conv_hw_ref[c * n_conv_layers + l],
                         preferred_element_type=f32)
            m = jnp.dot(adj, hw[:, :PAD], preferred_element_type=f32)   # message aggr
            gi = jnp.dot(m, wih, preferred_element_type=f32) + bih
            gh = hw[:, PAD:] + bhh
            # PyTorch GRUCell gate order (r, z, n); gates are 128-lane aligned slabs
            r = jax.nn.sigmoid(gi[:, :PAD] + gh[:, :PAD])
            z = jax.nn.sigmoid(gi[:, PAD:2 * PAD] + gh[:, PAD:2 * PAD])
            n = jnp.tanh(gi[:, 2 * PAD:] + r * gh[:, 2 * PAD:])
            x = (1.0 - z) * n + z * x
        x = jnp.maximum(x, 0.0)   # F.relu after conv1 / conv2

    x = lin(x, 2, True)        # linear_graph1 + relu
    x = lin(x, 3, False)       # linear_graph2

    # per-problem mean pooling expressed as a dense pooling matmul; the concat with
    # the graph embedding is folded into a split linear weight (slots 4 and 5).
    ge = jnp.dot(pool_ref[...], x, preferred_element_type=f32)
    u = (jnp.dot(x, lin_w_ref[4], preferred_element_type=f32)
         + jnp.dot(ge, lin_w_ref[5], preferred_element_type=f32)
         + lin_b_ref[4])
    u = jnp.maximum(u, 0.0)    # linear + relu
    u = lin(u, 6, True)        # linear2 + relu
    u = lin(u, 7, False)       # linear3
    out_ref[...] = u           # lane-dense (Np, 128) store; col 0 holds the result


def _cost_estimate(n_pad, n_conv_layers):
    P = PAD
    flops = 8 * 2 * n_pad * P * P                                 # linear layers
    flops += 2 * n_conv_layers * (2 * n_pad * P * 4 * P           # merged h push
                                  + 2 * n_pad * n_pad * P         # adj @ m
                                  + 2 * n_pad * P * 3 * P)        # m @ W_ih
    flops += 2 * n_pad * n_pad * P                                # pooling matmul
    transcendentals = 2 * n_conv_layers * 3 * n_pad * P
    bytes_accessed = 4 * (2 * n_pad * P + 2 * n_pad * n_pad
                          + 8 * P * P + 8 * P
                          + 2 * n_conv_layers * P * 4 * P
                          + 2 * P * 3 * P + 4 * 3 * P)
    return pl.CostEstimate(flops=flops, transcendentals=transcendentals,
                           bytes_accessed=bytes_accessed)


def gnn_forward(packed, G, edge_index, edge_weight, problems, *,
                n_classes=1, n_conv_layers=2):
    num_nodes = G.shape[0]
    n_pad = ((num_nodes + 7) // 8) * 8

    # padded node features (lane-dense)
    g_pad = jnp.zeros((n_pad, PAD), jnp.float32)
    g_pad = g_pad.at[:num_nodes, :G.shape[1]].set(G)

    # dense weighted adjacency: A[dst, src] = edge_weight (sum aggr, source_to_target)
    adj = jnp.zeros((n_pad, n_pad), jnp.float32)
    adj = adj.at[edge_index[1], edge_index[0]].add(edge_weight)

    # per-problem mean-pooling matrix (block diagonal, 1/(m*n) inside each problem)
    # TODO(synk): for large graphs keep adjacency/pooling sparse and gather rows via
    # scalar-prefetched indices instead of materializing dense N x N matrices.
    pool_np = np.zeros((n_pad, n_pad), np.float32)
    c = 0
    for p in problems:
        mn = int(p[0]) * int(p[1])
        pool_np[c:c + mn, c:c + mn] = 1.0 / mn
        c += mn
    pool = jnp.asarray(pool_np)

    inputs = (g_pad, adj, pool,
              packed["lin_w"], packed["lin_b"], packed["conv_hw"],
              packed["gru_wih"], packed["gru_bih"], packed["gru_bhh"])
    in_specs = [pl.BlockSpec(a.shape, (lambda i, nd=a.ndim: (0,) * nd)) for a in inputs]

    u_pad = pl.pallas_call(
        functools.partial(_gnn_fused_kernel, n_conv_layers=n_conv_layers),
        out_shape=jax.ShapeDtypeStruct((n_pad, PAD), jnp.float32),
        grid=(1,),
        in_specs=in_specs,
        out_specs=pl.BlockSpec((n_pad, PAD), lambda i: (0, 0)),
        compiler_params=pltpu.CompilerParams(
            dimension_semantics=("arbitrary",),
            vmem_limit_bytes=64 * 1024 * 1024,
        ),
        cost_estimate=_cost_estimate(n_pad, n_conv_layers),
    )(*inputs)
    return u_pad[:num_nodes, :n_classes]


# ----------------------------- parameter init & packing -----------------------------


def _lin(key, d_in, d_out):
    k1, k2 = jax.random.split(key)
    s = 1.0 / np.sqrt(d_in)
    return (jax.random.uniform(k1, (d_in, d_out), jnp.float32, -s, s),
            jax.random.uniform(k2, (1, d_out), jnp.float32, -s, s))


def _ggc(key, H, num_layers=2):
    k1, k2, k3, k4, k5 = jax.random.split(key, 5)
    s = 1.0 / np.sqrt(H)
    return dict(
        weight=jax.random.uniform(k1, (num_layers, H, H), jnp.float32, -s, s),
        w_ih_t=jax.random.uniform(k2, (H, 3 * H), jnp.float32, -s, s),
        b_ih=jax.random.uniform(k3, (1, 3 * H), jnp.float32, -s, s),
        w_hh_t=jax.random.uniform(k4, (H, 3 * H), jnp.float32, -s, s),
        b_hh=jax.random.uniform(k5, (1, 3 * H), jnp.float32, -s, s),
    )


def init_params(key, n_features, n_hidden, n_classes):
    ks = jax.random.split(key, 9)
    return dict(
        emb1=_lin(ks[0], n_features, n_hidden[0]),
        emb2=_lin(ks[1], n_hidden[0], n_hidden[1]),
        conv1=_ggc(ks[2], n_hidden[2]),
        conv2=_ggc(ks[3], n_hidden[3]),
        graph1=_lin(ks[4], n_hidden[3], n_hidden[4]),
        graph2=_lin(ks[5], n_hidden[4], n_hidden[5]),
        lin=_lin(ks[6], 2 * n_hidden[5], n_hidden[6]),
        lin2=_lin(ks[7], n_hidden[6], n_hidden[7]),
        lin3=_lin(ks[8], n_hidden[7], n_classes),
    )


def _pad2(w, rows=PAD, cols=PAD):
    out = jnp.zeros((rows, cols), jnp.float32)
    return out.at[:w.shape[0], :w.shape[1]].set(w)


def pack_params(p):
    """Pad all weights to 128-lane-dense, gate-aligned, stacked arrays."""
    # the 'lin' layer consumes cat([x, graph_embedding]); split its weight so the
    # concat becomes two matmuls inside the kernel.
    w_lin = p["lin"][0]
    half = w_lin.shape[0] // 2
    lin_w = jnp.stack([
        _pad2(p["emb1"][0]), _pad2(p["emb2"][0]),
        _pad2(p["graph1"][0]), _pad2(p["graph2"][0]),
        _pad2(w_lin[:half]), _pad2(w_lin[half:]),
        _pad2(p["lin2"][0]), _pad2(p["lin3"][0]),
    ])
    lin_b = jnp.stack([
        _pad2(p["emb1"][1], 1, PAD), _pad2(p["emb2"][1], 1, PAD),
        _pad2(p["graph1"][1], 1, PAD), _pad2(p["graph2"][1], 1, PAD),
        _pad2(p["lin"][1], 1, PAD), jnp.zeros((1, PAD), jnp.float32),
        _pad2(p["lin2"][1], 1, PAD), _pad2(p["lin3"][1], 1, PAD),
    ])

    conv_hw, gru_wih, gru_bih, gru_bhh = [], [], [], []
    for conv in (p["conv1"], p["conv2"]):
        H = conv["weight"].shape[1]
        whh_p = jnp.zeros((PAD, 3 * PAD), jnp.float32)
        wih_p = jnp.zeros((PAD, 3 * PAD), jnp.float32)
        bih_p = jnp.zeros((1, 3 * PAD), jnp.float32)
        bhh_p = jnp.zeros((1, 3 * PAD), jnp.float32)
        for g in range(3):  # gate-aligned: each gate owns its own 128-lane slab
            whh_p = whh_p.at[:H, g * PAD:g * PAD + H].set(conv["w_hh_t"][:, g * H:(g + 1) * H])
            wih_p = wih_p.at[:H, g * PAD:g * PAD + H].set(conv["w_ih_t"][:, g * H:(g + 1) * H])
            bih_p = bih_p.at[:, g * PAD:g * PAD + H].set(conv["b_ih"][:, g * H:(g + 1) * H])
            bhh_p = bhh_p.at[:, g * PAD:g * PAD + H].set(conv["b_hh"][:, g * H:(g + 1) * H])
        for l in range(conv["weight"].shape[0]):
            # merged [W_l | W_hh] so h hits the MXU once per layer
            conv_hw.append(jnp.concatenate([_pad2(conv["weight"][l]), whh_p], axis=1))
        gru_wih.append(wih_p)
        gru_bih.append(bih_p)
        gru_bhh.append(bhh_p)

    return dict(
        lin_w=lin_w,                     # (8, 128, 128)
        lin_b=lin_b,                     # (8, 1, 128)
        conv_hw=jnp.stack(conv_hw),      # (4, 128, 512)
        gru_wih=jnp.stack(gru_wih),      # (2, 128, 384)
        gru_bih=jnp.stack(gru_bih),      # (2, 1, 384)
        gru_bhh=jnp.stack(gru_bhh),      # (2, 1, 384)
    )


# ----------------------------- knapsack DP + bounds (host) --------------------------
# TODO(synk): the sequential, data-dependent 0/1-knapsack DP (numba CUDA kernel
# dp_knapsack_gpu_batch) has no clean Pallas equivalent; replicated on host in numpy.


def solve_knapsack_host(problems, u_flat):
    N = [int(p[1]) for p in problems]
    M = [int(p[0]) for p in problems]
    max_n = max(N)
    total_nm = sum(n * m for n, m in zip(N, M))
    vvs = np.zeros(total_nm, dtype=np.int32)

    Lweights, Lval, capacities = [], [], []
    c_nm = 0
    for b in range(len(problems)):
        n, m, prob = N[b], M[b], problems[b]
        u_1 = [float(sum(u_flat[c_nm + j * n + i] for j in range(1, m))) for i in range(n)]
        for jc in range(m):
            cap = int(prob[2 + n + jc])
            if jc == 0:
                val = [u_1[i] + float(prob[2 + i]) for i in range(n)]
            else:
                val = [-float(u_flat[c_nm + jc * n + i]) for i in range(n)]
            val += [0.0] * (max_n - n)
            wts = [int(prob[2 + n + m + jc * n + i]) for i in range(n)] + [0] * (max_n - n)
            Lweights.append(wts)
            Lval.append(val)
            capacities.append(cap)
        c_nm += n * m

    for b in range(len(problems)):
        n, m = N[b], M[b]
        off_nm = sum(N[k] * M[k] for k in range(b))
        off_m = sum(M[k] for k in range(b))
        for jc in range(m):
            cap = capacities[off_m + jc]
            wts = Lweights[off_m + jc]
            val = Lval[off_m + jc]
            dp = np.zeros((cap + 1, n + 1), dtype=np.int32)   # int32 DP table, as in CUDA
            for i in range(1, n + 1):
                for w in range(cap + 1):
                    if wts[i - 1] <= w:
                        dp[w, i] = int(max(float(dp[w, i - 1]),
                                           float(dp[w - wts[i - 1], i - 1]) + val[i - 1]))
                    else:
                        dp[w, i] = dp[w, i - 1]
            w = cap
            for i in range(n, 0, -1):
                if dp[w, i] != dp[w, i - 1]:
                    vvs[off_nm + i - 1 + n * jc] = 1
                    w -= wts[i - 1]
    return vvs


def gnn_bounds(problems, u, vvs):
    u_np = np.asarray(jax.device_get(u), dtype=np.float32).reshape(-1)
    bounds = np.zeros(len(problems), dtype=np.float32)
    c = 0
    for b, prob in enumerate(problems):
        m, n = int(prob[0]), int(prob[1])
        dx = np.zeros(m * n, dtype=np.float32)
        for i in range(n):
            for j in range(m):
                dx[i + j * n] = -float(vvs[c + i + j * n]) + float(vvs[c + i])
        bound = float(np.dot(u_np[c:c + m * n], dx))
        tmp = 0.0
        for i in range(n):
            tmp += float(prob[2 + i]) * float(vvs[c + i])
        bounds[b] = bound + tmp
        c += m * n
    return jnp.asarray(bounds, dtype=jnp.float32)


# ----------------------------- main --------------------------------------------------

if __name__ == "__main__":
    key = jax.random.PRNGKey(0)
    n_features = 6
    n_hidden = [16, 32, 32, 32, 16, 16, 32, 16]
    n_classes = 1

    # problem layout: [m, n, values(n), capacities(m), weights(m*n)]
    problems = [
        [2, 4, 5, 3, 8, 2, 10, 12, 3, 4, 2, 5, 6, 1, 4, 3],
        [2, 4, 4, 7, 1, 6, 9, 11, 2, 3, 5, 1, 4, 2, 3, 6],
    ]
    num_nodes = sum(int(p[0]) * int(p[1]) for p in problems)   # 16 nodes

    kG, kw, kp = jax.random.split(key, 3)
    G = jax.random.normal(kG, (num_nodes, n_features), jnp.float32)

    src = np.arange(num_nodes, dtype=np.int32)
    dst = (src + 1) % num_nodes
    edge_index = jnp.asarray(
        np.stack([np.concatenate([src, dst]), np.concatenate([dst, src])]), dtype=jnp.int32)
    edge_weight = jax.random.uniform(kw, (edge_index.shape[1],), jnp.float32, 0.1, 1.0)
    edge_attribute = None  # unused by the reference forward

    params = init_params(kp, n_features, n_hidden, n_classes)
    packed = pack_params(params)

    u = gnn_forward(packed, G, edge_index, edge_weight, problems, n_classes=n_classes)
    u = jax.block_until_ready(u)

    vvs = solve_knapsack_host(problems, np.asarray(jax.device_get(u)).reshape(-1))
    bounds = gnn_bounds(problems, u, vvs)
    bounds = jax.block_until_ready(bounds)

    assert u.shape == (num_nodes, n_classes)
    assert bounds.shape == (len(problems),)
    print("KERNEL_OK")
</pallas_src>

<mosaic_0001>
module attributes {stable_mosaic.version = 11 : i64} {
  func.func @_gnn_fused_kernel(%arg0: i32, %arg1: memref<16x128xf32, #tpu.memory_space<vmem>>, %arg2: memref<16x16xf32, #tpu.memory_space<vmem>>, %arg3: memref<16x16xf32, #tpu.memory_space<vmem>>, %arg4: memref<8x128x128xf32, #tpu.memory_space<vmem>>, %arg5: memref<8x1x128xf32, #tpu.memory_space<vmem>>, %arg6: memref<4x128x512xf32, #tpu.memory_space<vmem>>, %arg7: memref<2x128x384xf32, #tpu.memory_space<vmem>>, %arg8: memref<2x1x384xf32, #tpu.memory_space<vmem>>, %arg9: memref<2x1x384xf32, #tpu.memory_space<vmem>>, %arg10: memref<16x128xf32, #tpu.memory_space<vmem>>) attributes {dimension_semantics = [#tpu.dimension_semantics<arbitrary>], iteration_bounds = array<i64: 1>, scalar_prefetch = 0 : i64, scratch_operands = 0 : i64, tpu.core_type = #tpu.core_type<tc>, window_params = [{pipeline_mode = #tpu.pipeline_mode<synchronous>, transform_indices = @transform_0, window_bounds = array<i64: 16, 128>}, {pipeline_mode = #tpu.pipeline_mode<synchronous>, transform_indices = @transform_1, window_bounds = array<i64: 16, 16>}, {pipeline_mode = #tpu.pipeline_mode<synchronous>, transform_indices = @transform_2, window_bounds = array<i64: 16, 16>}, {pipeline_mode = #tpu.pipeline_mode<synchronous>, transform_indices = @transform_3, window_bounds = array<i64: 8, 128, 128>}, {pipeline_mode = #tpu.pipeline_mode<synchronous>, transform_indices = @transform_4, window_bounds = array<i64: 8, 1, 128>}, {pipeline_mode = #tpu.pipeline_mode<synchronous>, transform_indices = @transform_5, window_bounds = array<i64: 4, 128, 512>}, {pipeline_mode = #tpu.pipeline_mode<synchronous>, transform_indices = @transform_6, window_bounds = array<i64: 2, 128, 384>}, {pipeline_mode = #tpu.pipeline_mode<synchronous>, transform_indices = @transform_7, window_bounds = array<i64: 2, 1, 384>}, {pipeline_mode = #tpu.pipeline_mode<synchronous>, transform_indices = @transform_8, window_bounds = array<i64: 2, 1, 384>}, {pipeline_mode = #tpu.pipeline_mode<synchronous>, transform_indices = @transform_9, window_bounds = array<i64: 16, 128>}]} {
    %c0 = arith.constant 0 : index
    %c0_0 = arith.constant 0 : index
    %0 = vector.load %arg1[%c0, %c0_0] : memref<16x128xf32, #tpu.memory_space<vmem>>, vector<16x128xf32>
    %c0_1 = arith.constant 0 : index
    %c0_2 = arith.constant 0 : index
    %1 = vector.load %arg2[%c0_1, %c0_2] : memref<16x16xf32, #tpu.memory_space<vmem>>, vector<16x16xf32>
    %c0_3 = arith.constant 0 : index
    %c0_4 = arith.constant 0 : index
    %c0_5 = arith.constant 0 : index
    %2 = vector.load %arg4[%c0_3, %c0_4, %c0_5] : memref<8x128x128xf32, #tpu.memory_space<vmem>>, vector<1x128x128xf32>
    %3 = vector.shape_cast %2 : vector<1x128x128xf32> to vector<128x128xf32>
    %cst = arith.constant dense<0.000000e+00> : vector<16x128xf32>
    %4 = tpu.matmul %0, %3, %cst {dimension_numbers = #tpu.dot_dimension_numbers<[1], [0], [0], [1], [0, 0, 1, 1], [], []>} : vector<16x128xf32>, vector<128x128xf32>, vector<16x128xf32> -> vector<16x128xf32>
    %c0_6 = arith.constant 0 : index
    %c0_7 = arith.constant 0 : index
    %c0_8 = arith.constant 0 : index
    %5 = vector.load %arg5[%c0_6, %c0_7, %c0_8] : memref<8x1x128xf32, #tpu.memory_space<vmem>>, vector<1x1x128xf32>
    %6 = vector.shape_cast %5 : vector<1x1x128xf32> to vector<1x128xf32>
    %7 = vector.broadcast %6 : vector<1x128xf32> to vector<16x128xf32>
    %8 = arith.addf %4, %7 : vector<16x128xf32>
    %cst_9 = arith.constant 0.000000e+00 : f32
    %9 = vector.broadcast %cst_9 : f32 to vector<16x128xf32>
    %10 = arith.maximumf %8, %9 : vector<16x128xf32>
    %c1 = arith.constant 1 : index
    %c0_10 = arith.constant 0 : index
    %c0_11 = arith.constant 0 : index
    %11 = vector.load %arg4[%c1, %c0_10, %c0_11] : memref<8x128x128xf32, #tpu.memory_space<vmem>>, vector<1x128x128xf32>
    %12 = vector.shape_cast %11 : vector<1x128x128xf32> to vector<128x128xf32>
    %cst_12 = arith.constant dense<0.000000e+00> : vector<16x128xf32>
    %13 = tpu.matmul %10, %12, %cst_12 {dimension_numbers = #tpu.dot_dimension_numbers<[1], [0], [0], [1], [0, 0, 1, 1], [], []>} : vector<16x128xf32>, vector<128x128xf32>, vector<16x128xf32> -> vector<16x128xf32>
    %c1_13 = arith.constant 1 : index
    %c0_14 = arith.constant 0 : index
    %c0_15 = arith.constant 0 : index
    %14 = vector.load %arg5[%c1_13, %c0_14, %c0_15] : memref<8x1x128xf32, #tpu.memory_space<vmem>>, vector<1x1x128xf32>
    %15 = vector.shape_cast %14 : vector<1x1x128xf32> to vector<1x128xf32>
    %16 = vector.broadcast %15 : vector<1x128xf32> to vector<16x128xf32>
    %17 = arith.addf %13, %16 : vector<16x128xf32>
    %cst_16 = arith.constant 0.000000e+00 : f32
    %18 = vector.broadcast %cst_16 : f32 to vector<16x128xf32>
    %19 = arith.maximumf %17, %18 : vector<16x128xf32>
    %c0_17 = arith.constant 0 : index
    %c0_18 = arith.constant 0 : index
    %c0_19 = arith.constant 0 : index
    %20 = vector.load %arg7[%c0_17, %c0_18, %c0_19] : memref<2x128x384xf32, #tpu.memory_space<vmem>>, vector<1x128x384xf32>
    %21 = vector.shape_cast %20 : vector<1x128x384xf32> to vector<128x384xf32>
    %c0_20 = arith.constant 0 : index
    %c0_21 = arith.constant 0 : index
    %c0_22 = arith.constant 0 : index
    %22 = vector.load %arg8[%c0_20, %c0_21, %c0_22] : memref<2x1x384xf32, #tpu.memory_space<vmem>>, vector<1x1x384xf32>
    %23 = vector.shape_cast %22 : vector<1x1x384xf32> to vector<1x384xf32>
    %c0_23 = arith.constant 0 : index
    %c0_24 = arith.constant 0 : index
    %c0_25 = arith.constant 0 : index
    %24 = vector.load %arg9[%c0_23, %c0_24, %c0_25] : memref<2x1x384xf32, #tpu.memory_space<vmem>>, vector<1x1x384xf32>
    %25 = vector.shape_cast %24 : vector<1x1x384xf32> to vector<1x384xf32>
    %c0_26 = arith.constant 0 : index
    %c0_27 = arith.constant 0 : index
    %c0_28 = arith.constant 0 : index
    %26 = vector.load %arg6[%c0_26, %c0_27, %c0_28] : memref<4x128x512xf32, #tpu.memory_space<vmem>>, vector<1x128x512xf32>
    %27 = vector.shape_cast %26 : vector<1x128x512xf32> to vector<128x512xf32>
    %cst_29 = arith.constant dense<0.000000e+00> : vector<16x512xf32>
    %28 = tpu.matmul %19, %27, %cst_29 {dimension_numbers = #tpu.dot_dimension_numbers<[1], [0], [0], [1], [0, 0, 1, 1], [], []>} : vector<16x128xf32>, vector<128x512xf32>, vector<16x512xf32> -> vector<16x512xf32>
    %29 = vector.extract_strided_slice %28 {offsets = [0, 0], sizes = [16, 128], strides = [1, 1]} : vector<16x512xf32> to vector<16x128xf32>
    %cst_30 = arith.constant dense<0.000000e+00> : vector<16x128xf32>
    %30 = tpu.matmul %1, %29, %cst_30 {dimension_numbers = #tpu.dot_dimension_numbers<[1], [0], [0], [1], [0, 0, 1, 1], [], []>} : vector<16x16xf32>, vector<16x128xf32>, vector<16x128xf32> -> vector<16x128xf32>
    %cst_31 = arith.constant dense<0.000000e+00> : vector<16x384xf32>
    %31 = tpu.matmul %30, %21, %cst_31 {dimension_numbers = #tpu.dot_dimension_numbers<[1], [0], [0], [1], [0, 0, 1, 1], [], []>} : vector<16x128xf32>, vector<128x384xf32>, vector<16x384xf32> -> vector<16x384xf32>
    %32 = vector.broadcast %23 : vector<1x384xf32> to vector<16x384xf32>
    %33 = arith.addf %31, %32 : vector<16x384xf32>
    %34 = vector.extract_strided_slice %28 {offsets = [0, 128], sizes = [16, 384], strides = [1, 1]} : vector<16x512xf32> to vector<16x384xf32>
    %35 = vector.broadcast %25 : vector<1x384xf32> to vector<16x384xf32>
    %36 = arith.addf %34, %35 : vector<16x384xf32>
    %37 = vector.extract_strided_slice %33 {offsets = [0, 0], sizes = [16, 128], strides = [1, 1]} : vector<16x384xf32> to vector<16x128xf32>
    %38 = vector.extract_strided_slice %36 {offsets = [0, 0], sizes = [16, 128], strides = [1, 1]} : vector<16x384xf32> to vector<16x128xf32>
    %39 = arith.addf %37, %38 : vector<16x128xf32>
    %40 = arith.negf %39 : vector<16x128xf32>
    %41 = math.exp %40 : vector<16x128xf32>
    %cst_32 = arith.constant 1.000000e+00 : f32
    %42 = vector.broadcast %cst_32 : f32 to vector<16x128xf32>
    %43 = arith.addf %42, %41 : vector<16x128xf32>
    %44 = arith.divf %42, %43 : vector<16x128xf32>
    %45 = vector.extract_strided_slice %33 {offsets = [0, 128], sizes = [16, 128], strides = [1, 1]} : vector<16x384xf32> to vector<16x128xf32>
    %46 = vector.extract_strided_slice %36 {offsets = [0, 128], sizes = [16, 128], strides = [1, 1]} : vector<16x384xf32> to vector<16x128xf32>
    %47 = arith.addf %45, %46 : vector<16x128xf32>
    %48 = arith.negf %47 : vector<16x128xf32>
    %49 = math.exp %48 : vector<16x128xf32>
    %cst_33 = arith.constant 1.000000e+00 : f32
    %50 = vector.broadcast %cst_33 : f32 to vector<16x128xf32>
    %51 = arith.addf %50, %49 : vector<16x128xf32>
    %52 = arith.divf %50, %51 : vector<16x128xf32>
    %53 = vector.extract_strided_slice %33 {offsets = [0, 256], sizes = [16, 128], strides = [1, 1]} : vector<16x384xf32> to vector<16x128xf32>
    %54 = vector.extract_strided_slice %36 {offsets = [0, 256], sizes = [16, 128], strides = [1, 1]} : vector<16x384xf32> to vector<16x128xf32>
    %55 = arith.mulf %44, %54 : vector<16x128xf32>
    %56 = arith.addf %53, %55 : vector<16x128xf32>
    %57 = math.tanh %56 : vector<16x128xf32>
    %cst_34 = arith.constant 1.000000e+00 : f32
    %58 = vector.broadcast %cst_34 : f32 to vector<16x128xf32>
    %59 = arith.subf %58, %52 : vector<16x128xf32>
    %60 = arith.mulf %59, %57 : vector<16x128xf32>
    %61 = arith.mulf %52, %19 : vector<16x128xf32>
    %62 = arith.addf %60, %61 : vector<16x128xf32>
    %c1_35 = arith.constant 1 : index
    %c0_36 = arith.constant 0 : index
    %c0_37 = arith.constant 0 : index
    %63 = vector.load %arg6[%c1_35, %c0_36, %c0_37] : memref<4x128x512xf32, #tpu.memory_space<vmem>>, vector<1x128x512xf32>
    %64 = vector.shape_cast %63 : vector<1x128x512xf32> to vector<128x512xf32>
    %cst_38 = arith.constant dense<0.000000e+00> : vector<16x512xf32>
    %65 = tpu.matmul %62, %64, %cst_38 {dimension_numbers = #tpu.dot_dimension_numbers<[1], [0], [0], [1], [0, 0, 1, 1], [], []>} : vector<16x128xf32>, vector<128x512xf32>, vector<16x512xf32> -> vector<16x512xf32>
    %66 = vector.extract_strided_slice %65 {offsets = [0, 0], sizes = [16, 128], strides = [1, 1]} : vector<16x512xf32> to vector<16x128xf32>
    %cst_39 = arith.constant dense<0.000000e+00> : vector<16x128xf32>
    %67 = tpu.matmul %1, %66, %cst_39 {dimension_numbers = #tpu.dot_dimension_numbers<[1], [0], [0], [1], [0, 0, 1, 1], [], []>} : vector<16x16xf32>, vector<16x128xf32>, vector<16x128xf32> -> vector<16x128xf32>
    %cst_40 = arith.constant dense<0.000000e+00> : vector<16x384xf32>
    %68 = tpu.matmul %67, %21, %cst_40 {dimension_numbers = #tpu.dot_dimension_numbers<[1], [0], [0], [1], [0, 0, 1, 1], [], []>} : vector<16x128xf32>, vector<128x384xf32>, vector<16x384xf32> -> vector<16x384xf32>
    %69 = vector.broadcast %23 : vector<1x384xf32> to vector<16x384xf32>
    %70 = arith.addf %68, %69 : vector<16x384xf32>
    %71 = vector.extract_strided_slice %65 {offsets = [0, 128], sizes = [16, 384], strides = [1, 1]} : vector<16x512xf32> to vector<16x384xf32>
    %72 = vector.broadcast %25 : vector<1x384xf32> to vector<16x384xf32>
    %73 = arith.addf %71, %72 : vector<16x384xf32>
    %74 = vector.extract_strided_slice %70 {offsets = [0, 0], sizes = [16, 128], strides = [1, 1]} : vector<16x384xf32> to vector<16x128xf32>
    %75 = vector.extract_strided_slice %73 {offsets = [0, 0], sizes = [16, 128], strides = [1, 1]} : vector<16x384xf32> to vector<16x128xf32>
    %76 = arith.addf %74, %75 : vector<16x128xf32>
    %77 = arith.negf %76 : vector<16x128xf32>
    %78 = math.exp %77 : vector<16x128xf32>
    %cst_41 = arith.constant 1.000000e+00 : f32
    %79 = vector.broadcast %cst_41 : f32 to vector<16x128xf32>
    %80 = arith.addf %79, %78 : vector<16x128xf32>
    %81 = arith.divf %79, %80 : vector<16x128xf32>
    %82 = vector.extract_strided_slice %70 {offsets = [0, 128], sizes = [16, 128], strides = [1, 1]} : vector<16x384xf32> to vector<16x128xf32>
    %83 = vector.extract_strided_slice %73 {offsets = [0, 128], sizes = [16, 128], strides = [1, 1]} : vector<16x384xf32> to vector<16x128xf32>
    %84 = arith.addf %82, %83 : vector<16x128xf32>
    %85 = arith.negf %84 : vector<16x128xf32>
    %86 = math.exp %85 : vector<16x128xf32>
    %cst_42 = arith.constant 1.000000e+00 : f32
    %87 = vector.broadcast %cst_42 : f32 to vector<16x128xf32>
    %88 = arith.addf %87, %86 : vector<16x128xf32>
    %89 = arith.divf %87, %88 : vector<16x128xf32>
    %90 = vector.extract_strided_slice %70 {offsets = [0, 256], sizes = [16, 128], strides = [1, 1]} : vector<16x384xf32> to vector<16x128xf32>
    %91 = vector.extract_strided_slice %73 {offsets = [0, 256], sizes = [16, 128], strides = [1, 1]} : vector<16x384xf32> to vector<16x128xf32>
    %92 = arith.mulf %81, %91 : vector<16x128xf32>
    %93 = arith.addf %90, %92 : vector<16x128xf32>
    %94 = math.tanh %93 : vector<16x128xf32>
    %cst_43 = arith.constant 1.000000e+00 : f32
    %95 = vector.broadcast %cst_43 : f32 to vector<16x128xf32>
    %96 = arith.subf %95, %89 : vector<16x128xf32>
    %97 = arith.mulf %96, %94 : vector<16x128xf32>
    %98 = arith.mulf %89, %62 : vector<16x128xf32>
    %99 = arith.addf %97, %98 : vector<16x128xf32>
    %cst_44 = arith.constant 0.000000e+00 : f32
    %100 = vector.broadcast %cst_44 : f32 to vector<16x128xf32>
    %101 = arith.maximumf %99, %100 : vector<16x128xf32>
    %c1_45 = arith.constant 1 : index
    %c0_46 = arith.constant 0 : index
    %c0_47 = arith.constant 0 : index
    %102 = vector.load %arg7[%c1_45, %c0_46, %c0_47] : memref<2x128x384xf32, #tpu.memory_space<vmem>>, vector<1x128x384xf32>
    %103 = vector.shape_cast %102 : vector<1x128x384xf32> to vector<128x384xf32>
    %c1_48 = arith.constant 1 : index
    %c0_49 = arith.constant 0 : index
    %c0_50 = arith.constant 0 : index
    %104 = vector.load %arg8[%c1_48, %c0_49, %c0_50] : memref<2x1x384xf32, #tpu.memory_space<vmem>>, vector<1x1x384xf32>
    %105 = vector.shape_cast %104 : vector<1x1x384xf32> to vector<1x384xf32>
    %c1_51 = arith.constant 1 : index
    %c0_52 = arith.constant 0 : index
    %c0_53 = arith.constant 0 : index
    %106 = vector.load %arg9[%c1_51, %c0_52, %c0_53] : memref<2x1x384xf32, #tpu.memory_space<vmem>>, vector<1x1x384xf32>
    %107 = vector.shape_cast %106 : vector<1x1x384xf32> to vector<1x384xf32>
    %c2 = arith.constant 2 : index
    %c0_54 = arith.constant 0 : index
    %c0_55 = arith.constant 0 : index
    %108 = vector.load %arg6[%c2, %c0_54, %c0_55] : memref<4x128x512xf32, #tpu.memory_space<vmem>>, vector<1x128x512xf32>
    %109 = vector.shape_cast %108 : vector<1x128x512xf32> to vector<128x512xf32>
    %cst_56 = arith.constant dense<0.000000e+00> : vector<16x512xf32>
    %110 = tpu.matmul %101, %109, %cst_56 {dimension_numbers = #tpu.dot_dimension_numbers<[1], [0], [0], [1], [0, 0, 1, 1], [], []>} : vector<16x128xf32>, vector<128x512xf32>, vector<16x512xf32> -> vector<16x512xf32>
    %111 = vector.extract_strided_slice %110 {offsets = [0, 0], sizes = [16, 128], strides = [1, 1]} : vector<16x512xf32> to vector<16x128xf32>
    %cst_57 = arith.constant dense<0.000000e+00> : vector<16x128xf32>
    %112 = tpu.matmul %1, %111, %cst_57 {dimension_numbers = #tpu.dot_dimension_numbers<[1], [0], [0], [1], [0, 0, 1, 1], [], []>} : vector<16x16xf32>, vector<16x128xf32>, vector<16x128xf32> -> vector<16x128xf32>
    %cst_58 = arith.constant dense<0.000000e+00> : vector<16x384xf32>
    %113 = tpu.matmul %112, %103, %cst_58 {dimension_numbers = #tpu.dot_dimension_numbers<[1], [0], [0], [1], [0, 0, 1, 1], [], []>} : vector<16x128xf32>, vector<128x384xf32>, vector<16x384xf32> -> vector<16x384xf32>
    %114 = vector.broadcast %105 : vector<1x384xf32> to vector<16x384xf32>
    %115 = arith.addf %113, %114 : vector<16x384xf32>
    %116 = vector.extract_strided_slice %110 {offsets = [0, 128], sizes = [16, 384], strides = [1, 1]} : vector<16x512xf32> to vector<16x384xf32>
    %117 = vector.broadcast %107 : vector<1x384xf32> to vector<16x384xf32>
    %118 = arith.addf %116, %117 : vector<16x384xf32>
    %119 = vector.extract_strided_slice %115 {offsets = [0, 0], sizes = [16, 128], strides = [1, 1]} : vector<16x384xf32> to vector<16x128xf32>
    %120 = vector.extract_strided_slice %118 {offsets = [0, 0], sizes = [16, 128], strides = [1, 1]} : vector<16x384xf32> to vector<16x128xf32>
    %121 = arith.addf %119, %120 : vector<16x128xf32>
    %122 = arith.negf %121 : vector<16x128xf32>
    %123 = math.exp %122 : vector<16x128xf32>
    %cst_59 = arith.constant 1.000000e+00 : f32
    %124 = vector.broadcast %cst_59 : f32 to vector<16x128xf32>
    %125 = arith.addf %124, %123 : vector<16x128xf32>
    %126 = arith.divf %124, %125 : vector<16x128xf32>
    %127 = vector.extract_strided_slice %115 {offsets = [0, 128], sizes = [16, 128], strides = [1, 1]} : vector<16x384xf32> to vector<16x128xf32>
    %128 = vector.extract_strided_slice %118 {offsets = [0, 128], sizes = [16, 128], strides = [1, 1]} : vector<16x384xf32> to vector<16x128xf32>
    %129 = arith.addf %127, %128 : vector<16x128xf32>
    %130 = arith.negf %129 : vector<16x128xf32>
    %131 = math.exp %130 : vector<16x128xf32>
    %cst_60 = arith.constant 1.000000e+00 : f32
    %132 = vector.broadcast %cst_60 : f32 to vector<16x128xf32>
    %133 = arith.addf %132, %131 : vector<16x128xf32>
    %134 = arith.divf %132, %133 : vector<16x128xf32>
    %135 = vector.extract_strided_slice %115 {offsets = [0, 256], sizes = [16, 128], strides = [1, 1]} : vector<16x384xf32> to vector<16x128xf32>
    %136 = vector.extract_strided_slice %118 {offsets = [0, 256], sizes = [16, 128], strides = [1, 1]} : vector<16x384xf32> to vector<16x128xf32>
    %137 = arith.mulf %126, %136 : vector<16x128xf32>
    %138 = arith.addf %135, %137 : vector<16x128xf32>
    %139 = math.tanh %138 : vector<16x128xf32>
    %cst_61 = arith.constant 1.000000e+00 : f32
    %140 = vector.broadcast %cst_61 : f32 to vector<16x128xf32>
    %141 = arith.subf %140, %134 : vector<16x128xf32>
    %142 = arith.mulf %141, %139 : vector<16x128xf32>
    %143 = arith.mulf %134, %101 : vector<16x128xf32>
    %144 = arith.addf %142, %143 : vector<16x128xf32>
    %c3 = arith.constant 3 : index
    %c0_62 = arith.constant 0 : index
    %c0_63 = arith.constant 0 : index
    %145 = vector.load %arg6[%c3, %c0_62, %c0_63] : memref<4x128x512xf32, #tpu.memory_space<vmem>>, vector<1x128x512xf32>
    %146 = vector.shape_cast %145 : vector<1x128x512xf32> to vector<128x512xf32>
    %cst_64 = arith.constant dense<0.000000e+00> : vector<16x512xf32>
    %147 = tpu.matmul %144, %146, %cst_64 {dimension_numbers = #tpu.dot_dimension_numbers<[1], [0], [0], [1], [0, 0, 1, 1], [], []>} : vector<16x128xf32>, vector<128x512xf32>, vector<16x512xf32> -> vector<16x512xf32>
    %148 = vector.extract_strided_slice %147 {offsets = [0, 0], sizes = [16, 128], strides = [1, 1]} : vector<16x512xf32> to vector<16x128xf32>
    %cst_65 = arith.constant dense<0.000000e+00> : vector<16x128xf32>
    %149 = tpu.matmul %1, %148, %cst_65 {dimension_numbers = #tpu.dot_dimension_numbers<[1], [0], [0], [1], [0, 0, 1, 1], [], []>} : vector<16x16xf32>, vector<16x128xf32>, vector<16x128xf32> -> vector<16x128xf32>
    %cst_66 = arith.constant dense<0.000000e+00> : vector<16x384xf32>
    %150 = tpu.matmul %149, %103, %cst_66 {dimension_numbers = #tpu.dot_dimension_numbers<[1], [0], [0], [1], [0, 0, 1, 1], [], []>} : vector<16x128xf32>, vector<128x384xf32>, vector<16x384xf32> -> vector<16x384xf32>
    %151 = vector.broadcast %105 : vector<1x384xf32> to vector<16x384xf32>
    %152 = arith.addf %150, %151 : vector<16x384xf32>
    %153 = vector.extract_strided_slice %147 {offsets = [0, 128], sizes = [16, 384], strides = [1, 1]} : vector<16x512xf32> to vector<16x384xf32>
    %154 = vector.broadcast %107 : vector<1x384xf32> to vector<16x384xf32>
    %155 = arith.addf %153, %154 : vector<16x384xf32>
    %156 = vector.extract_strided_slice %152 {offsets = [0, 0], sizes = [16, 128], strides = [1, 1]} : vector<16x384xf32> to vector<16x128xf32>
    %157 = vector.extract_strided_slice %155 {offsets = [0, 0], sizes = [16, 128], strides = [1, 1]} : vector<16x384xf32> to vector<16x128xf32>
    %158 = arith.addf %156, %157 : vector<16x128xf32>
    %159 = arith.negf %158 : vector<16x128xf32>
    %160 = math.exp %159 : vector<16x128xf32>
    %cst_67 = arith.constant 1.000000e+00 : f32
    %161 = vector.broadcast %cst_67 : f32 to vector<16x128xf32>
    %162 = arith.addf %161, %160 : vector<16x128xf32>
    %163 = arith.divf %161, %162 : vector<16x128xf32>
    %164 = vector.extract_strided_slice %152 {offsets = [0, 128], sizes = [16, 128], strides = [1, 1]} : vector<16x384xf32> to vector<16x128xf32>
    %165 = vector.extract_strided_slice %155 {offsets = [0, 128], sizes = [16, 128], strides = [1, 1]} : vector<16x384xf32> to vector<16x128xf32>
    %166 = arith.addf %164, %165 : vector<16x128xf32>
    %167 = arith.negf %166 : vector<16x128xf32>
    %168 = math.exp %167 : vector<16x128xf32>
    %cst_68 = arith.constant 1.000000e+00 : f32
    %169 = vector.broadcast %cst_68 : f32 to vector<16x128xf32>
    %170 = arith.addf %169, %168 : vector<16x128xf32>
    %171 = arith.divf %169, %170 : vector<16x128xf32>
    %172 = vector.extract_strided_slice %152 {offsets = [0, 256], sizes = [16, 128], strides = [1, 1]} : vector<16x384xf32> to vector<16x128xf32>
    %173 = vector.extract_strided_slice %155 {offsets = [0, 256], sizes = [16, 128], strides = [1, 1]} : vector<16x384xf32> to vector<16x128xf32>
    %174 = arith.mulf %163, %173 : vector<16x128xf32>
    %175 = arith.addf %172, %174 : vector<16x128xf32>
    %176 = math.tanh %175 : vector<16x128xf32>
    %cst_69 = arith.constant 1.000000e+00 : f32
    %177 = vector.broadcast %cst_69 : f32 to vector<16x128xf32>
    %178 = arith.subf %177, %171 : vector<16x128xf32>
    %179 = arith.mulf %178, %176 : vector<16x128xf32>
    %180 = arith.mulf %171, %144 : vector<16x128xf32>
    %181 = arith.addf %179, %180 : vector<16x128xf32>
    %cst_70 = arith.constant 0.000000e+00 : f32
    %182 = vector.broadcast %cst_70 : f32 to vector<16x128xf32>
    %183 = arith.maximumf %181, %182 : vector<16x128xf32>
    %c2_71 = arith.constant 2 : index
    %c0_72 = arith.constant 0 : index
    %c0_73 = arith.constant 0 : index
    %184 = vector.load %arg4[%c2_71, %c0_72, %c0_73] : memref<8x128x128xf32, #tpu.memory_space<vmem>>, vector<1x128x128xf32>
    %185 = vector.shape_cast %184 : vector<1x128x128xf32> to vector<128x128xf32>
    %cst_74 = arith.constant dense<0.000000e+00> : vector<16x128xf32>
    %186 = tpu.matmul %183, %185, %cst_74 {dimension_numbers = #tpu.dot_dimension_numbers<[1], [0], [0], [1], [0, 0, 1, 1], [], []>} : vector<16x128xf32>, vector<128x128xf32>, vector<16x128xf32> -> vector<16x128xf32>
    %c2_75 = arith.constant 2 : index
    %c0_76 = arith.constant 0 : index
    %c0_77 = arith.constant 0 : index
    %187 = vector.load %arg5[%c2_75, %c0_76, %c0_77] : memref<8x1x128xf32, #tpu.memory_space<vmem>>, vector<1x1x128xf32>
    %188 = vector.shape_cast %187 : vector<1x1x128xf32> to vector<1x128xf32>
    %189 = vector.broadcast %188 : vector<1x128xf32> to vector<16x128xf32>
    %190 = arith.addf %186, %189 : vector<16x128xf32>
    %cst_78 = arith.constant 0.000000e+00 : f32
    %191 = vector.broadcast %cst_78 : f32 to vector<16x128xf32>
    %192 = arith.maximumf %190, %191 : vector<16x128xf32>
    %c3_79 = arith.constant 3 : index
    %c0_80 = arith.constant 0 : index
    %c0_81 = arith.constant 0 : index
    %193 = vector.load %arg4[%c3_79, %c0_80, %c0_81] : memref<8x128x128xf32, #tpu.memory_space<vmem>>, vector<1x128x128xf32>
    %194 = vector.shape_cast %193 : vector<1x128x128xf32> to vector<128x128xf32>
    %cst_82 = arith.constant dense<0.000000e+00> : vector<16x128xf32>
    %195 = tpu.matmul %192, %194, %cst_82 {dimension_numbers = #tpu.dot_dimension_numbers<[1], [0], [0], [1], [0, 0, 1, 1], [], []>} : vector<16x128xf32>, vector<128x128xf32>, vector<16x128xf32> -> vector<16x128xf32>
    %c3_83 = arith.constant 3 : index
    %c0_84 = arith.constant 0 : index
    %c0_85 = arith.constant 0 : index
    %196 = vector.load %arg5[%c3_83, %c0_84, %c0_85] : memref<8x1x128xf32, #tpu.memory_space<vmem>>, vector<1x1x128xf32>
    %197 = vector.shape_cast %196 : vector<1x1x128xf32> to vector<1x128xf32>
    %198 = vector.broadcast %197 : vector<1x128xf32> to vector<16x128xf32>
    %199 = arith.addf %195, %198 : vector<16x128xf32>
    %c0_86 = arith.constant 0 : index
    %c0_87 = arith.constant 0 : index
    %200 = vector.load %arg3[%c0_86, %c0_87] : memref<16x16xf32, #tpu.memory_space<vmem>>, vector<16x16xf32>
    %cst_88 = arith.constant dense<0.000000e+00> : vector<16x128xf32>
    %201 = tpu.matmul %200, %199, %cst_88 {dimension_numbers = #tpu.dot_dimension_numbers<[1], [0], [0], [1], [0, 0, 1, 1], [], []>} : vector<16x16xf32>, vector<16x128xf32>, vector<16x128xf32> -> vector<16x128xf32>
    %c4 = arith.constant 4 : index
    %c0_89 = arith.constant 0 : index
    %c0_90 = arith.constant 0 : index
    %202 = vector.load %arg4[%c4, %c0_89, %c0_90] : memref<8x128x128xf32, #tpu.memory_space<vmem>>, vector<1x128x128xf32>
    %203 = vector.shape_cast %202 : vector<1x128x128xf32> to vector<128x128xf32>
    %cst_91 = arith.constant dense<0.000000e+00> : vector<16x128xf32>
    %204 = tpu.matmul %199, %203, %cst_91 {dimension_numbers = #tpu.dot_dimension_numbers<[1], [0], [0], [1], [0, 0, 1, 1], [], []>} : vector<16x128xf32>, vector<128x128xf32>, vector<16x128xf32> -> vector<16x128xf32>
    %c5 = arith.constant 5 : index
    %c0_92 = arith.constant 0 : index
    %c0_93 = arith.constant 0 : index
    %205 = vector.load %arg4[%c5, %c0_92, %c0_93] : memref<8x128x128xf32, #tpu.memory_space<vmem>>, vector<1x128x128xf32>
    %206 = vector.shape_cast %205 : vector<1x128x128xf32> to vector<128x128xf32>
    %cst_94 = arith.constant dense<0.000000e+00> : vector<16x128xf32>
    %207 = tpu.matmul %201, %206, %cst_94 {dimension_numbers = #tpu.dot_dimension_numbers<[1], [0], [0], [1], [0, 0, 1, 1], [], []>} : vector<16x128xf32>, vector<128x128xf32>, vector<16x128xf32> -> vector<16x128xf32>
    %208 = arith.addf %204, %207 : vector<16x128xf32>
    %c4_95 = arith.constant 4 : index
    %c0_96 = arith.constant 0 : index
    %c0_97 = arith.constant 0 : index
    %209 = vector.load %arg5[%c4_95, %c0_96, %c0_97] : memref<8x1x128xf32, #tpu.memory_space<vmem>>, vector<1x1x128xf32>
    %210 = vector.shape_cast %209 : vector<1x1x128xf32> to vector<1x128xf32>
    %211 = vector.broadcast %210 : vector<1x128xf32> to vector<16x128xf32>
    %212 = arith.addf %208, %211 : vector<16x128xf32>
    %cst_98 = arith.constant 0.000000e+00 : f32
    %213 = vector.broadcast %cst_98 : f32 to vector<16x128xf32>
    %214 = arith.maximumf %212, %213 : vector<16x128xf32>
    %c6 = arith.constant 6 : index
    %c0_99 = arith.constant 0 : index
    %c0_100 = arith.constant 0 : index
    %215 = vector.load %arg4[%c6, %c0_99, %c0_100] : memref<8x128x128xf32, #tpu.memory_space<vmem>>, vector<1x128x128xf32>
    %216 = vector.shape_cast %215 : vector<1x128x128xf32> to vector<128x128xf32>
    %cst_101 = arith.constant dense<0.000000e+00> : vector<16x128xf32>
    %217 = tpu.matmul %214, %216, %cst_101 {dimension_numbers = #tpu.dot_dimension_numbers<[1], [0], [0], [1], [0, 0, 1, 1], [], []>} : vector<16x128xf32>, vector<128x128xf32>, vector<16x128xf32> -> vector<16x128xf32>
    %c6_102 = arith.constant 6 : index
    %c0_103 = arith.constant 0 : index
    %c0_104 = arith.constant 0 : index
    %218 = vector.load %arg5[%c6_102, %c0_103, %c0_104] : memref<8x1x128xf32, #tpu.memory_space<vmem>>, vector<1x1x128xf32>
    %219 = vector.shape_cast %218 : vector<1x1x128xf32> to vector<1x128xf32>
    %220 = vector.broadcast %219 : vector<1x128xf32> to vector<16x128xf32>
    %221 = arith.addf %217, %220 : vector<16x128xf32>
    %cst_105 = arith.constant 0.000000e+00 : f32
    %222 = vector.broadcast %cst_105 : f32 to vector<16x128xf32>
    %223 = arith.maximumf %221, %222 : vector<16x128xf32>
    %c7 = arith.constant 7 : index
    %c0_106 = arith.constant 0 : index
    %c0_107 = arith.constant 0 : index
    %224 = vector.load %arg4[%c7, %c0_106, %c0_107] : memref<8x128x128xf32, #tpu.memory_space<vmem>>, vector<1x128x128xf32>
    %225 = vector.shape_cast %224 : vector<1x128x128xf32> to vector<128x128xf32>
    %cst_108 = arith.constant dense<0.000000e+00> : vector<16x128xf32>
    %226 = tpu.matmul %223, %225, %cst_108 {dimension_numbers = #tpu.dot_dimension_numbers<[1], [0], [0], [1], [0, 0, 1, 1], [], []>} : vector<16x128xf32>, vector<128x128xf32>, vector<16x128xf32> -> vector<16x128xf32>
    %c7_109 = arith.constant 7 : index
    %c0_110 = arith.constant 0 : index
    %c0_111 = arith.constant 0 : index
    %227 = vector.load %arg5[%c7_109, %c0_110, %c0_111] : memref<8x1x128xf32, #tpu.memory_space<vmem>>, vector<1x1x128xf32>
    %228 = vector.shape_cast %227 : vector<1x1x128xf32> to vector<1x128xf32>
    %229 = vector.broadcast %228 : vector<1x128xf32> to vector<16x128xf32>
    %230 = arith.addf %226, %229 : vector<16x128xf32>
    %c0_112 = arith.constant 0 : index
    %c0_113 = arith.constant 0 : index
    %231 = vector.load %arg10[%c0_112, %c0_113] : memref<16x128xf32, #tpu.memory_space<vmem>>, vector<16x128xf32>
    tpu.vector_store %arg10[%c0_112, %c0_113], %230 {strides = array<i32>} : memref<16x128xf32, #tpu.memory_space<vmem>>, vector<16x128xf32>,
    return
  }
  func.func @transform_0(%arg0: i32) -> (i32, i32) {
    %c0_i32 = arith.constant 0 : i32
    %c0_i32_0 = arith.constant 0 : i32
    %c0_i32_1 = arith.constant 0 : i32
    return %c0_i32, %c0_i32_0 : i32, i32
  }
  func.func @transform_1(%arg0: i32) -> (i32, i32) {
    %c0_i32 = arith.constant 0 : i32
    %c0_i32_0 = arith.constant 0 : i32
    %c0_i32_1 = arith.constant 0 : i32
    return %c0_i32, %c0_i32_0 : i32, i32
  }
  func.func @transform_2(%arg0: i32) -> (i32, i32) {
    %c0_i32 = arith.constant 0 : i32
    %c0_i32_0 = arith.constant 0 : i32
    %c0_i32_1 = arith.constant 0 : i32
    return %c0_i32, %c0_i32_0 : i32, i32
  }
  func.func @transform_3(%arg0: i32) -> (i32, i32, i32) {
    %c0_i32 = arith.constant 0 : i32
    %c0_i32_0 = arith.constant 0 : i32
    %c0_i32_1 = arith.constant 0 : i32
    %c0_i32_2 = arith.constant 0 : i32
    return %c0_i32, %c0_i32_0, %c0_i32_1 : i32, i32, i32
  }
  func.func @transform_4(%arg0: i32) -> (i32, i32, i32) {
    %c0_i32 = arith.constant 0 : i32
    %c0_i32_0 = arith.constant 0 : i32
    %c0_i32_1 = arith.constant 0 : i32
    %c0_i32_2 = arith.constant 0 : i32
    return %c0_i32, %c0_i32_0, %c0_i32_1 : i32, i32, i32
  }
  func.func @transform_5(%arg0: i32) -> (i32, i32, i32) {
    %c0_i32 = arith.constant 0 : i32
    %c0_i32_0 = arith.constant 0 : i32
    %c0_i32_1 = arith.constant 0 : i32
    %c0_i32_2 = arith.constant 0 : i32
    return %c0_i32, %c0_i32_0, %c0_i32_1 : i32, i32, i32
  }
  func.func @transform_6(%arg0: i32) -> (i32, i32, i32) {
    %c0_i32 = arith.constant 0 : i32
    %c0_i32_0 = arith.constant 0 : i32
    %c0_i32_1 = arith.constant 0 : i32
    %c0_i32_2 = arith.constant 0 : i32
    return %c0_i32, %c0_i32_0, %c0_i32_1 : i32, i32, i32
  }
  func.func @transform_7(%arg0: i32) -> (i32, i32, i32) {
    %c0_i32 = arith.constant 0 : i32
    %c0_i32_0 = arith.constant 0 : i32
    %c0_i32_1 = arith.constant 0 : i32
    %c0_i32_2 = arith.constant 0 : i32
    return %c0_i32, %c0_i32_0, %c0_i32_1 : i32, i32, i32
  }
  func.func @transform_8(%arg0: i32) -> (i32, i32, i32) {
    %c0_i32 = arith.constant 0 : i32
    %c0_i32_0 = arith.constant 0 : i32
    %c0_i32_1 = arith.constant 0 : i32
    %c0_i32_2 = arith.constant 0 : i32
    return %c0_i32, %c0_i32_0, %c0_i32_1 : i32, i32, i32
  }
  func.func @transform_9(%arg0: i32) -> (i32, i32) {
    %c0_i32 = arith.constant 0 : i32
    %c0_i32_0 = arith.constant 0 : i32
    %c0_i32_1 = arith.constant 0 : i32
    return %c0_i32, %c0_i32_0 : i32, i32
  }
}

</mosaic_0001>

<bundles_post_ra>
// kernel: tpu_custom_call.1
= control target key start
LH: loop header
LB: loop body
LE: loop exit
PB: predicated region body
PF: predicated region fallthrough
CT: control target
= control target key end

     0   :  { %14 = vsyncpa [#allocation3], 0  ;;  %s5775_s0 = inlined_call_operand.hbm [shape: f32[16,128], index: 0, kind: input, shape index: {}]   ;;  %s5776_s1 = inlined_call_operand.hbm [shape: f32[16,16], index: 1, kind: input, shape index: {}]   ;;  %s5777_s2 = inlined_call_operand.hbm [shape: f32[16,16], index: 2, kind: input, shape index: {}]   ;;  %s5778_s3 = inlined_call_operand.hbm [shape: f32[8,128,128], index: 3, kind: input, shape index: {}]   ;;  %s5779_s4 = inlined_call_operand.hbm [shape: f32[8,1,128], index: 4, kind: input, shape index: {}]   ;;  %s5780_s5 = inlined_call_operand.hbm [shape: f32[4,128,512], index: 5, kind: input, shape index: {}]   ;;  %s5781_s6 = inlined_call_operand.hbm [shape: f32[2,128,384], index: 6, kind: input, shape index: {}]   ;;  %s5782_s7 = inlined_call_operand.hbm [shape: f32[2,1,384], index: 7, kind: input, shape index: {}]   ;;  %s5783_s8 = inlined_call_operand.hbm [shape: f32[2,1,384], index: 8, kind: input, shape index: {}]   ;;  %s5784_s9 = inlined_call_operand.hbm [shape: f32[16,128], index: 9, kind: output, shape index: {}]  }
   0x1   :  { %15 = vsyncpa [#allocation6], 0 }
   0x2   :  { %16 = vsyncpa [#allocation9], 0 }
   0x3   :  { %17 = vsyncpa [#allocation12], 0 }
   0x4   :  { %18 = vsyncpa [#allocation15], 0 }
   0x5   :  { %19 = vsyncpa [#allocation4], 0  ;;  %s5069_s30 = smov [#allocation5]   ;;  %s5070_s11 = smov [#allocation8]  }
   0x6   :  { %s37_s10 = sshll.u32 %s5069_s30, 4  ;;  %s61_s12 = sshll.u32 %s5070_s11, 4  ;;  %s38_s10 = int_to_ptr.vmem [resolvable:$true] %s37_s10  ;;  %s5140_s12 = int_to_ptr.vmem [resolvable:$true] %s61_s12 }
   0x7   :  { %s4837_s15 = scalar_lea.hbm %s5776_s1, 256 }
   0x8   :  { %p4838_p0 = scmp.ne.s32.totalorder %s5776_s1, %s4837_s15  ;;  %p4841_p1 = scmp.lt.u32.totalorder %s4837_s15, %s5776_s1 }
   0xa   :  { %p4843_p2 = pnand %p4841_p1, %p4838_p0 }
   0xc   :  { %4846 = shalt.err (!%p4843_p2)
}
   0xd   :  { %s4847_s20 = scalar_lea.vmem %s38_s10, 256  ;;  %p4852_p4 = scmp.lt.s32.totalorder %s38_s10, %s38_s10 }
   0xe   :  { %p4848_p3 = scmp.ne.s32.totalorder %s38_s10, %s4847_s20  ;;  %p4853_p5 = scmp.lt.s32.totalorder %s4847_s20, %s4847_s20 }
  0x10   :  { %p4854_p6 = por %p4853_p5, %p4852_p4 }
  0x12   :  { %p4855_p7 = pnand %p4854_p6, %p4848_p3 }
  0x14   :  { %4858 = shalt.err (!%p4855_p7)
}
  0x15   :  { %s5071_s21 = smov 128   ;;  %s5072_s22 = smov 8  }
  0x16   :  { %43 = dma.hbm_to_vmem [thread:$0]  %s5776_s1, 256, %s38_s10, [#allocation6], %s5071_s21, %s5071_s21, %s5072_s22  }
  0x17   :  { %s4859_s27 = scalar_lea.hbm %s5778_s3, 16384 }
  0x18   :  { %p4860_p8 = scmp.ne.s32.totalorder %s5778_s3, %s4859_s27  ;;  %p4863_p9 = scmp.lt.u32.totalorder %s4859_s27, %s5778_s3 }
  0x1a   :  { %p4865_p10 = pnand %p4863_p9, %p4860_p8 }
  0x1c   :  { %4868 = shalt.err (!%p4865_p10)
}
  0x1d   :  { %s4869_s13 = scalar_lea.vmem %s5140_s12, 16384  ;;  %p4874_p12 = scmp.lt.s32.totalorder %s5140_s12, %s5140_s12 }
  0x1e   :  { %p4870_p11 = scmp.ne.s32.totalorder %s5140_s12, %s4869_s13  ;;  %p4875_p13 = scmp.lt.s32.totalorder %s4869_s13, %s4869_s13 }
  0x20   :  { %p4876_p0 = por %p4875_p13, %p4874_p12 }
  0x22   :  { %p4877_p1 = pnand %p4876_p0, %p4870_p11 }
  0x24   :  { %4880 = shalt.err (!%p4877_p1)
}
  0x25   :  { %67 = dma.hbm_to_vmem [thread:$0]  %s5778_s3, 16384, %s5140_s12, [#allocation9], %s5071_s21, %s5071_s21, %s5072_s22  }
  0x26   :  { %s5073_s14 = smov [#allocation11]   ;;  %s4881_s18 = scalar_lea.hbm %s5780_s5, 32768 }
  0x27   :  { %s85_s15 = sshll.u32 %s5073_s14, 4  ;;  %p4882_p2 = scmp.ne.s32.totalorder %s5780_s5, %s4881_s18  ;;  %s86_s15 = int_to_ptr.vmem [resolvable:$true] %s85_s15 }
  0x28   :  { %p4885_p3 = scmp.lt.u32.totalorder %s4881_s18, %s5780_s5 }
  0x2a   :  { %p4887_p4 = pnand %p4885_p3, %p4882_p2 }
  0x2c   :  { %4890 = shalt.err (!%p4887_p4)
}
  0x2d   :  { %s4891_s25 = scalar_lea.vmem %s86_s15, 32768  ;;  %p4896_p6 = scmp.lt.s32.totalorder %s86_s15, %s86_s15 }
  0x2e   :  { %p4892_p5 = scmp.ne.s32.totalorder %s86_s15, %s4891_s25  ;;  %p4897_p7 = scmp.lt.s32.totalorder %s4891_s25, %s4891_s25 }
  0x30   :  { %p4898_p8 = por %p4897_p7, %p4896_p6 }
  0x32   :  { %p4899_p9 = pnand %p4898_p8, %p4892_p5 }
  0x34   :  { %4902 = shalt.err (!%p4899_p9)
}
  0x35   :  { %s5074_s3 = smov 512   ;;  %s5075_s12 = smov 32  }
  0x36   :  { %91 = dma.hbm_to_vmem [thread:$0]  %s5780_s5, 32768, %s86_s15, [#allocation12], %s5074_s3, %s5074_s3, %s5075_s12  }
  0x37   :  { %s5076_s28 = smov [#allocation14]   ;;  %s4903_s13 = scalar_lea.hbm %s5782_s7, 96 }
  0x38   :  { %s109_s29 = sshll.u32 %s5076_s28, 4  ;;  %p4904_p10 = scmp.ne.s32.totalorder %s5782_s7, %s4903_s13  ;;  %s110_s29 = int_to_ptr.vmem [resolvable:$true] %s109_s29 }
  0x39   :  { %p4907_p11 = scmp.lt.u32.totalorder %s4903_s13, %s5782_s7 }
  0x3b   :  { %p4909_p12 = pnand %p4907_p11, %p4904_p10 }
  0x3d   :  { %4912 = shalt.err (!%p4909_p12)
}
  0x3e   :  { %s4913_s17 = scalar_lea.vmem %s110_s29, 96  ;;  %p4918_p0 = scmp.lt.s32.totalorder %s110_s29, %s110_s29 }
  0x3f   :  { %p4914_p13 = scmp.ne.s32.totalorder %s110_s29, %s4913_s17  ;;  %p4919_p1 = scmp.lt.s32.totalorder %s4913_s17, %s4913_s17 }
  0x41   :  { %p4920_p2 = por %p4919_p1, %p4918_p0 }
  0x43   :  { %p4921_p3 = pnand %p4920_p2, %p4914_p13 }
  0x45   :  { %4924 = shalt.err (!%p4921_p3)
}
  0x46   :  { %s5077_s5 = smov 48   ;;  %s5078_s15 = smov 3  }
  0x47   :  { %115 = dma.hbm_to_vmem [thread:$0]  %s5782_s7, 96, %s110_s29, [#allocation15], %s5077_s5, %s5077_s5, %s5078_s15  }
  0x48   :  { %s5079_s20 = smov [#allocation2]   ;;  %s5080_s24 = smov [#allocation7]  }
  0x49   :  { %s25_s23 = sshll.u32 %s5079_s20, 4  ;;  %s49_s25 = sshll.u32 %s5080_s24, 4  ;;  %s26_s23 = int_to_ptr.vmem [resolvable:$true] %s25_s23  ;;  %s5204_s25 = int_to_ptr.vmem [resolvable:$true] %s49_s25 }
  0x4a   :  { %s4925_s26 = scalar_lea.hbm %s5775_s0, 256 }
  0x4b   :  { %p4926_p4 = scmp.ne.s32.totalorder %s5775_s0, %s4925_s26  ;;  %p4929_p5 = scmp.lt.u32.totalorder %s4925_s26, %s5775_s0 }
  0x4d   :  { %p4931_p6 = pnand %p4929_p5, %p4926_p4 }
  0x4f   :  { %4934 = shalt.err (!%p4931_p6)
}
  0x50   :  { %s4935_s7 = scalar_lea.vmem %s26_s23, 256  ;;  %p4940_p8 = scmp.lt.s32.totalorder %s26_s23, %s26_s23 }
  0x51   :  { %p4936_p7 = scmp.ne.s32.totalorder %s26_s23, %s4935_s7  ;;  %p4941_p9 = scmp.lt.s32.totalorder %s4935_s7, %s4935_s7 }
  0x53   :  { %p4942_p10 = por %p4941_p9, %p4940_p8 }
  0x55   :  { %p4943_p11 = pnand %p4942_p10, %p4936_p7 }
  0x57   :  { %4946 = shalt.err (!%p4943_p11)
}
  0x58   :  { %31 = dma.hbm_to_vmem [thread:$0]  %s5775_s0, 256, %s26_s23, [#allocation3], %s5071_s21, %s5071_s21, %s5072_s22  }
  0x59   :  { %s4947_s14 = scalar_lea.hbm %s5777_s2, 256 }
  0x5a   :  { %p4948_p12 = scmp.ne.s32.totalorder %s5777_s2, %s4947_s14  ;;  %p4951_p13 = scmp.lt.u32.totalorder %s4947_s14, %s5777_s2 }
  0x5c   :  { %p4953_p0 = pnand %p4951_p13, %p4948_p12 }
  0x5e   :  { %4956 = shalt.err (!%p4953_p0)
}
  0x5f   :  { %s4957_s20 = scalar_lea.vmem %s5204_s25, 256  ;;  %p4962_p2 = scmp.lt.s32.totalorder %s5204_s25, %s5204_s25 }
  0x60   :  { %p4958_p1 = scmp.ne.s32.totalorder %s5204_s25, %s4957_s20  ;;  %p4963_p3 = scmp.lt.s32.totalorder %s4957_s20, %s4957_s20 }
  0x62   :  { %p4964_p4 = por %p4963_p3, %p4962_p2 }
  0x64   :  { %p4965_p5 = pnand %p4964_p4, %p4958_p1 }
  0x66   :  { %4968 = shalt.err (!%p4965_p5)
}
  0x67   :  { %55 = dma.hbm_to_vmem [thread:$0]  %s5777_s2, 256, %s5204_s25, [#allocation6], %s5071_s21, %s5071_s21, %s5072_s22  }
  0x68   :  { %s5081_s24 = smov [#allocation10]   ;;  %s4969_s27 = scalar_lea.hbm %s5779_s4, 128 }
  0x69   :  { %s73_s3 = sshll.u32 %s5081_s24, 4  ;;  %p4970_p6 = scmp.ne.s32.totalorder %s5779_s4, %s4969_s27  ;;  %s74_s3 = int_to_ptr.vmem [resolvable:$true] %s73_s3 }
  0x6a   :  { %p4973_p7 = scmp.lt.u32.totalorder %s4969_s27, %s5779_s4 }
  0x6c   :  { %p4975_p8 = pnand %p4973_p7, %p4970_p6 }
  0x6e   :  { %4978 = shalt.err (!%p4975_p8)
}
  0x6f   :  { %s4979_s29 = scalar_lea.vmem %s74_s3, 128  ;;  %p4984_p10 = scmp.lt.s32.totalorder %s74_s3, %s74_s3 }
  0x70   :  { %p4980_p9 = scmp.ne.s32.totalorder %s74_s3, %s4979_s29  ;;  %p4985_p11 = scmp.lt.s32.totalorder %s4979_s29, %s4979_s29 }
  0x72   :  { %p4986_p12 = por %p4985_p11, %p4984_p10 }
  0x74   :  { %p4987_p13 = pnand %p4986_p12, %p4980_p9 }
  0x76   :  { %4990 = shalt.err (!%p4987_p13)
}
  0x77   :  { %s5082_s2 = smov 16   ;;  %s5083_s25 = smov 1  }
  0x78   :  { %79 = dma.hbm_to_vmem [thread:$0]  %s5779_s4, 128, %s74_s3, [#allocation9], %s5082_s2, %s5082_s2, %s5083_s25  }
  0x79   :  { %s5084_s10 = smov [#allocation13]   ;;  %s4991_s18 = scalar_lea.hbm %s5781_s6, 12288 }
  0x7a   :  { %s97_s14 = sshll.u32 %s5084_s10, 4  ;;  %p4992_p0 = scmp.ne.s32.totalorder %s5781_s6, %s4991_s18  ;;  %s98_s14 = int_to_ptr.vmem [resolvable:$true] %s97_s14 }
  0x7b   :  { %p4995_p1 = scmp.lt.u32.totalorder %s4991_s18, %s5781_s6 }
  0x7d   :  { %p4997_p2 = pnand %p4995_p1, %p4992_p0 }
  0x7f   :  { %5000 = shalt.err (!%p4997_p2)
}
  0x80   :  { %s5001_s24 = scalar_lea.vmem %s98_s14, 12288  ;;  %p5006_p4 = scmp.lt.s32.totalorder %s98_s14, %s98_s14 }
  0x81   :  { %p5002_p3 = scmp.ne.s32.totalorder %s98_s14, %s5001_s24  ;;  %p5007_p5 = scmp.lt.s32.totalorder %s5001_s24, %s5001_s24 }
  0x83   :  { %p5008_p6 = por %p5007_p5, %p5006_p4 }
  0x85   :  { %p5009_p7 = pnand %p5008_p6, %p5002_p3 }
  0x87   :  { %5012 = shalt.err (!%p5009_p7)
}
  0x88   :  { %s5085_s4 = smov 384   ;;  %s5086_s3 = smov 24  }
  0x89   :  { %103 = dma.hbm_to_vmem [thread:$0]  %s5781_s6, 12288, %s98_s14, [#allocation12], %s5085_s4, %s5085_s4, %s5086_s3  }
  0x8a   :  { %s5087_s27 = smov [#allocation16]   ;;  %s5013_s7 = scalar_lea.hbm %s5783_s8, 96 }
  0x8b   :  { %s121_s28 = sshll.u32 %s5087_s27, 4  ;;  %p5014_p8 = scmp.ne.s32.totalorder %s5783_s8, %s5013_s7  ;;  %s122_s28 = int_to_ptr.vmem [resolvable:$true] %s121_s28 }
  0x8c   :  { %p5017_p9 = scmp.lt.u32.totalorder %s5013_s7, %s5783_s8 }
  0x8e   :  { %p5019_p10 = pnand %p5017_p9, %p5014_p8 }
  0x90   :  { %5022 = shalt.err (!%p5019_p10)
}
  0x91   :  { %s5023_s1 = scalar_lea.vmem %s122_s28, 96  ;;  %p5028_p12 = scmp.lt.s32.totalorder %s122_s28, %s122_s28 }
  0x92   :  { %p5024_p11 = scmp.ne.s32.totalorder %s122_s28, %s5023_s1  ;;  %p5029_p13 = scmp.lt.s32.totalorder %s5023_s1, %s5023_s1 }
  0x94   :  { %p5030_p0 = por %p5029_p13, %p5028_p12 }
  0x96   :  { %p5031_p1 = pnand %p5030_p0, %p5024_p11 }
  0x98   :  { %5034 = shalt.err (!%p5031_p1)
}
  0x99   :  { %127 = dma.hbm_to_vmem [thread:$0]  %s5783_s8, 96, %s122_s28, [#allocation15], %s5077_s5, %s5077_s5, %s5078_s15  }
  0x9a   :  { %5057 = dma.done.wait [#allocation3], 256  }
  0x9b   :  { %5058 = vsyncadd [#allocation3], 4294967040 }
  0x9c   :  { %5059 = dma.done.wait [#allocation6], 512  }
  0x9d   :  { %5060 = vsyncadd [#allocation6], 4294966784 }
  0x9e   :  { %5061 = dma.done.wait [#allocation9], 16512  }
  0x9f   :  { %5062 = vsyncadd [#allocation9], 4294950784 }
  0xa0   :  { %5063 = dma.done.wait [#allocation12], 45056  }
  0xa1   :  { %5064 = vsyncadd [#allocation12], 4294922240 }
  0xa2   :  { %5065 = dma.done.wait [#allocation15], 192  }
  0xa3   :  { %5066 = vsyncadd [#allocation15], 4294967104  ;;  %v159_v0 = vld [vmem:[#allocation8] sm:$0xff]  ;;  %v160_v1 = vld [vmem:[#allocation8 + $0x8] sm:$0xff]  ;;  %vm629_vm0 = vcmask 130048   ;;  %s5089_s8 = smov [#allocation17]  }
  0xa4   :  { %v161_v2 = vld [vmem:[#allocation8 + $0x10] sm:$0xff]  ;;  %v3944_v3 = vpack.c.bf16 %v160_v1, %v159_v0  ;;  %v162_v4 = vld [vmem:[#allocation8 + $0x18] sm:$0xff]  ;;  %v163_v6 = vld [vmem:[#allocation8 + $0x20] sm:$0xff]  ;;  %s3204_s5 = sshll.u32 %s5089_s8, 4  ;;  %s3205_s5 = int_to_ptr.vmem [resolvable:$true] %s3204_s5 }
  0xa5   :  { %v3948_v5 = vpack.c.bf16 %v162_v4, %v161_v2  ;;  %v164_v7 = vld [vmem:[#allocation8 + $0x28] sm:$0xff]  ;;  %v165_v9 = vld [vmem:[#allocation8 + $0x30] sm:$0xff]  ;;  %v166_v10 = vld [vmem:[#allocation8 + $0x38] sm:$0xff]  ;;  %s5035_s15 = scalar_lea.vmem %s3205_s5, 256  ;;  %p5040_p3 = scmp.lt.s32.totalorder %s3205_s5, %s3205_s5 }
  0xa6   :  { %3945 = vmatprep.subr.bf16.mxu0 %v3944_v3  ;;  %v3952_v8 = vpack.c.bf16 %v164_v7, %v163_v6  ;;  %v155_v11 = vld [vmem:[#allocation2] sm:$0xff]  ;;  %v260_v12 = vld [vmem:[#allocation8 + $0x80] sm:$0xff]  ;;  %v261_v13 = vld [vmem:[#allocation8 + $0x88] sm:$0xff]  ;;  %v3956_v20 = vpack.c.bf16 %v166_v10, %v165_v9  ;;  %p5036_p2 = scmp.ne.s32.totalorder %s3205_s5, %s5035_s15  ;;  %p5041_p4 = scmp.lt.s32.totalorder %s5035_s15, %s5035_s15 }
  0xa7   :  { %3947 = vmatpush3.bf16.msra.mxu0 %v3944_v3  ;;  %3521 = vmatprep.mubr.f32.mxu0 %v155_v11  ;;  %v262_v14 = vld [vmem:[#allocation8 + $0x90] sm:$0xff]  ;;  %v3976_v15 = vpack.c.bf16 %v261_v13, %v260_v12  ;;  %v263_v16 = vld [vmem:[#allocation8 + $0x98] sm:$0xff]  ;;  %v264_v18 = vld [vmem:[#allocation8 + $0xa0] sm:$0xff] }
  0xa8   :  { %3949 = vmatprep.subr.bf16.mxu0 %v3948_v5  ;;  %v3980_v17 = vpack.c.bf16 %v263_v16, %v262_v14  ;;  %v265_v19 = vld [vmem:[#allocation8 + $0xa8] sm:$0xff]  ;;  %v167_v21 = vld [vmem:[#allocation8 + $0x40] sm:$0xff]  ;;  %v266_v24 = vld [vmem:[#allocation8 + $0xb0] sm:$0xff]  ;;  %p5042_p5 = por %p5041_p4, %p5040_p3 }
  0xa9   :  { %3977 = vmatprep.subr.bf16.mxu1 %v3976_v15  ;;  %v168_v22 = vld [vmem:[#allocation8 + $0x48] sm:$0xff]  ;;  %v3984_v23 = vpack.c.bf16 %v265_v19, %v264_v18  ;;  %v267_v25 = vld [vmem:[#allocation8 + $0xb8] sm:$0xff]  ;;  %v169_v27 = vld [vmem:[#allocation8 + $0x50] sm:$0xff] }
  0xaa   :  { %3979 = vmatpush3.bf16.msra.mxu1 %v3976_v15  ;;  %v3960_v26 = vpack.c.bf16 %v168_v22, %v167_v21  ;;  %v170_v28 = vld [vmem:[#allocation8 + $0x58] sm:$0xff]  ;;  %v3988_v29 = vpack.c.bf16 %v267_v25, %v266_v24  ;;  %v268_v30 = vld [vmem:[#allocation8 + $0xc0] sm:$0xff]  ;;  %v269_v31 = vld [vmem:[#allocation8 + $0xc8] sm:$0xff]  ;;  %p5043_p6 = pnand %p5042_p5, %p5036_p2 }
  0xab   :  { %3951 = vmatpush3.bf16.msra.mxu0 %v3948_v5  ;;  %3981 = vmatprep.subr.bf16.mxu1 %v3980_v17  ;;  %v3964_v32 = vpack.c.bf16 %v170_v28, %v169_v27  ;;  %v171_v33 = vld [vmem:[#allocation8 + $0x60] sm:$0xff]  ;;  %v172_v34 = vld [vmem:[#allocation8 + $0x68] sm:$0xff]  ;;  %v3992_v35 = vpack.c.bf16 %v269_v31, %v268_v30  ;;  %v270_v36 = vld [vmem:[#allocation8 + $0xd0] sm:$0xff] }
  0xac   :  { %3953 = vmatprep.subr.bf16.mxu0 %v3952_v8  ;;  %v271_v37 = vld [vmem:[#allocation8 + $0xd8] sm:$0xff]  ;;  %v3968_v38 = vpack.c.bf16 %v172_v34, %v171_v33  ;;  %v173_v39 = vld [vmem:[#allocation8 + $0x70] sm:$0xff]  ;;  %v272_v42 = vld [vmem:[#allocation8 + $0xe0] sm:$0xff] }
  0xad   :  { %v174_v40 = vld [vmem:[#allocation8 + $0x78] sm:$0xff]  ;;  %v3996_v41 = vpack.c.bf16 %v271_v37, %v270_v36  ;;  %v273_v43 = vld [vmem:[#allocation8 + $0xe8] sm:$0xff]  ;;  %v274_v47 = vld [vmem:[#allocation8 + $0xf0] sm:$0xff] }
  0xae   :  { %3983 = vmatpush3.bf16.msra.mxu1 %v3980_v17  ;;  %v3972_v44 = vpack.c.bf16 %v174_v40, %v173_v39  ;;  %v4000_v45 = vpack.c.bf16 %v273_v43, %v272_v42  ;;  %v156_v46 = vld [vmem:[#allocation2 + $0x8] sm:$0xff]  ;;  %v412_v50 = vld [vmem:[#allocation11 + $0x8] sm:$0xff]  ;;  %v414_v52 = vld [vmem:[#allocation11 + $0x18] sm:$0xff] }
  0xaf   :  { %3955 = vmatpush3.bf16.msra.mxu0 %v3952_v8  ;;  %3985 = vmatprep.subr.bf16.mxu1 %v3984_v23  ;;  %v275_v48 = vld [vmem:[#allocation8 + $0xf8] sm:$0xff]  ;;  %v416_v51 = vld [vmem:[#allocation11 + $0x28] sm:$0xff]  ;;  %v418_v54 = vld [vmem:[#allocation11 + $0x38] sm:$0xff] }
  0xb0   :  { %3957 = vmatprep.subr.bf16.mxu0 %v3956_v20  ;;  %v4004_v49 = vpack.c.bf16 %v275_v48, %v274_v47  ;;  %v4008_v53 = vpack.c.bf16 %v416_v51, %v412_v50  ;;  %v411_v55 = vld [vmem:[#allocation11] sm:$0xff]  ;;  %v4040_v57 = vpack.c.bf16 %v418_v54, %v414_v52  ;;  %v420_v59 = vld [vmem:[#allocation11 + $0x48] sm:$0xff]  ;;  %v3220_v31 = vld [vmem:[#allocation10] ss:$0 sm:$0xff] }
  0xb1   :  { %v415_v56 = vld [vmem:[#allocation11 + $0x20] sm:$0xff]  ;;  %v424_v60 = vld [vmem:[#allocation11 + $0x68] sm:$0xff]  ;;  %v417_v36 = vld [vmem:[#allocation11 + $0x30] sm:$0xff] }
  0xb2   :  { %3987 = vmatpush3.bf16.msra.mxu1 %v3984_v23  ;;  %v4010_v58 = vpack.c.bf16 %v415_v56, %v411_v55  ;;  %v4012_v61 = vpack.c.bf16 %v424_v60, %v420_v59  ;;  %v419_v62 = vld [vmem:[#allocation11 + $0x40] sm:$0xff]  ;;  %v428_v1 = vld [vmem:[#allocation11 + $0x88] sm:$0xff]  ;;  %v426_v39 = vld [vmem:[#allocation11 + $0x78] sm:$0xff] }
  0xb3   :  { %3959 = vmatpush3.bf16.msra.mxu0 %v3956_v20  ;;  %3989 = vmatprep.subr.bf16.mxu1 %v3988_v29  ;;  %v423_v63 = vld [vmem:[#allocation11 + $0x60] sm:$0xff]  ;;  %v432_v2 = vld [vmem:[#allocation11 + $0xa8] sm:$0xff]  ;;  %v434_v47 = vld [vmem:[#allocation11 + $0xb8] sm:$0xff] }
  0xb4   :  { %3961 = vmatprep.subr.bf16.mxu0 %v3960_v26  ;;  %v4014_v0 = vpack.c.bf16 %v423_v63, %v419_v62  ;;  %v4016_v3 = vpack.c.bf16 %v432_v2, %v428_v1  ;;  %v427_v4 = vld [vmem:[#allocation11 + $0x80] sm:$0xff]  ;;  %v436_v7 = vld [vmem:[#allocation11 + $0xc8] sm:$0xff]  ;;  %v429_v50 = vld [vmem:[#allocation11 + $0x90] sm:$0xff] }
  0xb5   :  { %v431_v5 = vld [vmem:[#allocation11 + $0xa0] sm:$0xff]  ;;  %v440_v8 = vld [vmem:[#allocation11 + $0xe8] sm:$0xff]  ;;  %v433_v51 = vld [vmem:[#allocation11 + $0xb0] sm:$0xff] }
  0xb6   :  { %3991 = vmatpush3.bf16.msra.mxu1 %v3988_v29  ;;  %v4018_v6 = vpack.c.bf16 %v431_v5, %v427_v4  ;;  %v4020_v9 = vpack.c.bf16 %v440_v8, %v436_v7  ;;  %v435_v10 = vld [vmem:[#allocation11 + $0xc0] sm:$0xff]  ;;  %v444_v13 = vld [vmem:[#allocation11 + $0x108] sm:$0xff]  ;;  %v438_v52 = vld [vmem:[#allocation11 + $0xd8] sm:$0xff]  ;;  %v4050_v54 = vpack.c.bf16 %v433_v51, %v429_v50 }
  0xb7   :  { %3963 = vmatpush3.bf16.msra.mxu0 %v3960_v26  ;;  %3993 = vmatprep.subr.bf16.mxu1 %v3992_v35  ;;  %v439_v11 = vld [vmem:[#allocation11 + $0xe0] sm:$0xff]  ;;  %v448_v14 = vld [vmem:[#allocation11 + $0x128] sm:$0xff]  ;;  %v437_v56 = vld [vmem:[#allocation11 + $0xd0] sm:$0xff] }
  0xb8   :  { %3965 = vmatprep.subr.bf16.mxu0 %v3964_v32  ;;  %v4022_v12 = vpack.c.bf16 %v439_v11, %v435_v10  ;;  %v4024_v15 = vpack.c.bf16 %v448_v14, %v444_v13  ;;  %v443_v16 = vld [vmem:[#allocation11 + $0x100] sm:$0xff]  ;;  %v452_v19 = vld [vmem:[#allocation11 + $0x148] sm:$0xff]  ;;  %v450_v59 = vld [vmem:[#allocation11 + $0x138] sm:$0xff] }
  0xb9   :  { %v447_v17 = vld [vmem:[#allocation11 + $0x120] sm:$0xff]  ;;  %v456_v20 = vld [vmem:[#allocation11 + $0x168] sm:$0xff]  ;;  %v445_v62 = vld [vmem:[#allocation11 + $0x110] sm:$0xff] }
  0xba   :  { %3995 = vmatpush3.bf16.msra.mxu1 %v3992_v35  ;;  %v4026_v18 = vpack.c.bf16 %v447_v17, %v443_v16  ;;  %v4028_v21 = vpack.c.bf16 %v456_v20, %v452_v19  ;;  %v451_v22 = vld [vmem:[#allocation11 + $0x140] sm:$0xff]  ;;  %v460_v25 = vld [vmem:[#allocation11 + $0x188] sm:$0xff]  ;;  %v413_v35 = vld [vmem:[#allocation11 + $0x10] sm:$0xff] }
  0xbb   :  { %3967 = vmatpush3.bf16.msra.mxu0 %v3964_v32  ;;  %3997 = vmatprep.subr.bf16.mxu1 %v3996_v41  ;;  %v455_v23 = vld [vmem:[#allocation11 + $0x160] sm:$0xff]  ;;  %v464_v26 = vld [vmem:[#allocation11 + $0x1a8] sm:$0xff]  ;;  %v449_v63 = vld [vmem:[#allocation11 + $0x130] sm:$0xff] }
  0xbc   :  { %3969 = vmatprep.subr.bf16.mxu0 %v3968_v38  ;;  %v4030_v24 = vpack.c.bf16 %v455_v23, %v451_v22  ;;  %v4032_v27 = vpack.c.bf16 %v464_v26, %v460_v25  ;;  %v459_v28 = vld [vmem:[#allocation11 + $0x180] sm:$0xff]  ;;  %v458_v1 = vld [vmem:[#allocation11 + $0x178] sm:$0xff]  ;;  %v4058_v2 = vpack.c.bf16 %v449_v63, %v445_v62  ;;  %v453_v4 = vld [vmem:[#allocation11 + $0x150] sm:$0xff]  ;;  %v5088_v25 = vmov 0.0  }
  0xbd   :  { %v463_v29 = vld [vmem:[#allocation11 + $0x1a0] sm:$0xff]  ;;  %v457_v5 = vld [vmem:[#allocation11 + $0x170] sm:$0xff]  ;;  %v466_v7 = vld [vmem:[#allocation11 + $0x1b8] sm:$0xff] }
  0xbe   :  { %3999 = vmatpush3.bf16.msra.mxu1 %v3996_v41  ;;  %v4034_v30 = vpack.c.bf16 %v463_v29, %v459_v28  ;;  %v4042_v41 = vpack.c.bf16 %v417_v36, %v413_v35  ;;  %v4062_v8 = vpack.c.bf16 %v457_v5, %v453_v4  ;;  %v461_v10 = vld [vmem:[#allocation11 + $0x190] sm:$0xff]  ;;  %v468_v13 = vld [vmem:[#allocation11 + $0x1c8] sm:$0xff]  ;;  %v474_v17 = vld [vmem:[#allocation11 + $0x1f8] sm:$0xff] }
  0xbf   :  { %3971 = vmatpush3.bf16.msra.mxu0 %v3968_v38  ;;  %4001 = vmatprep.subr.bf16.mxu1 %v4000_v45  ;;  %v422_v38 = vld [vmem:[#allocation11 + $0x58] sm:$0xff]  ;;  %v465_v11 = vld [vmem:[#allocation11 + $0x1b0] sm:$0xff]  ;;  %v472_v14 = vld [vmem:[#allocation11 + $0x1e8] sm:$0xff] }
  0xc0   :  { %3973 = vmatprep.subr.bf16.mxu0 %v3972_v44  ;;  %v4044_v43 = vpack.c.bf16 %v426_v39, %v422_v38  ;;  %v4036_v16 = vpack.c.bf16 %v472_v14, %v468_v13  ;;  %v471_v20 = vld [vmem:[#allocation11 + $0x1e0] sm:$0xff]  ;;  %v473_v22 = vld [vmem:[#allocation11 + $0x1f0] sm:$0xff]  ;;  %v3221_v26 = vld [vmem:[#allocation10 + $0x1] ss:$0 sm:$0xff] }
  0xc1   :  { %v365_v35 = vld [vmem:[#allocation13 + $0x20] sm:$0xff]  ;;  %v364_v38 = vld [vmem:[#allocation13 + $0x18] sm:$0xff]  ;;  %v394_v4 = vld [vmem:[#allocation13 + $0x108] sm:$0xff] }
  0xc2   :  { %4003 = vmatpush3.bf16.msra.mxu1 %v4000_v45  ;;  %v425_v45 = vld [vmem:[#allocation11 + $0x70] sm:$0xff]  ;;  %v361_v36 = vld [vmem:[#allocation13] sm:$0xff]  ;;  %v376_v50 = vld [vmem:[#allocation13 + $0x78] sm:$0xff] }
  0xc3   :  { %3975 = vmatpush3.bf16.msra.mxu0 %v3972_v44  ;;  %4005 = vmatprep.subr.bf16.mxu1 %v4004_v49  ;;  %v421_v44 = vld [vmem:[#allocation11 + $0x50] sm:$0xff]  ;;  %v5299_v39 = vpack.c.bf16 %v364_v38, %v361_v36  ;;  %v388_v62 = vld [vmem:[#allocation13 + $0xd8] sm:$0xff]  ;;  %v5359_v36 = vld [vmem:[#allocation5 + $0x8] sm:$0xff] }
  0xc4   :  { %4009 = vmatprep.subr.bf16.mxu0 %v4008_v53  ;;  %v4046_v48 = vpack.c.bf16 %v425_v45, %v421_v44  ;;  %v442_v53 = vld [vmem:[#allocation11 + $0xf8] sm:$0xff]  ;;  %v370_v44 = vld [vmem:[#allocation13 + $0x48] sm:$0xff]  ;;  %v407_v13 = vld [vmem:[#allocation13 + $0x170] sm:$0xff] }
  0xc5   :  { %v4052_v55 = vpack.c.bf16 %v442_v53, %v438_v52  ;;  %v380_v52 = vld [vmem:[#allocation13 + $0x98] sm:$0xff]  ;;  %v383_v53 = vld [vmem:[#allocation13 + $0xb0] sm:$0xff] }
  0xc6   :  { %3522 = vmatmul.mubr.f32.vlgmr.msra.gmra.mrb[0].mxu0 %v156_v46  ;;  %4007 = vmatpush3.bf16.msra.mxu1 %v4004_v49  ;;  %v430_v46 = vld [vmem:[#allocation11 + $0x98] sm:$0xff]  ;;  %v403_v14 = vld [vmem:[#allocation13 + $0x150] sm:$0xff] }
  0xc7   :  { %4041 = vmatprep.subr.bf16.mxu1 %v4040_v57  ;;  %4011 = vmatpush1.bf16.msra.mxu0 %v4010_v58  ;;  %v4048_v49 = vpack.c.bf16 %v434_v47, %v430_v46  ;;  %v441_v57 = vld [vmem:[#allocation11 + $0xf0] sm:$0xff]  ;;  %v446_v58 = vld [vmem:[#allocation11 + $0x118] sm:$0xff]  ;;  %v374_v46 = vld [vmem:[#allocation13 + $0x68] sm:$0xff] }
  0xc8   :  { %4013 = vmatprep.subr.bf16.mxu0 %v4012_v61  ;;  %v4054_v60 = vpack.c.bf16 %v441_v57, %v437_v56  ;;  %v4056_v61 = vpack.c.bf16 %v450_v59, %v446_v58  ;;  %539 = vmatprep.mubr.f32.mxu0 %v5088_v25  ;;  %v377_v47 = vld [vmem:[#allocation13 + $0x80] sm:$0xff]  ;;  %v382_v56 = vld [vmem:[#allocation13 + $0xa8] sm:$0xff] }
  0xc9   :  { %v386_v58 = vld [vmem:[#allocation13 + $0xc8] sm:$0xff]  ;;  %v389_v59 = vld [vmem:[#allocation13 + $0xe0] sm:$0xff] }
  0xcb   :  { %4015 = vmatpush1.bf16.msra.mxu0 %v4014_v0  ;;  %v454_v0 = vld [vmem:[#allocation11 + $0x158] sm:$0xff] }
  0xcc   :  { %4017 = vmatprep.subr.bf16.mxu0 %v4016_v3  ;;  %v4060_v3 = vpack.c.bf16 %v458_v1, %v454_v0  ;;  %v392_v0 = vld [vmem:[#allocation13 + $0xf8] sm:$0xff]  ;;  %v395_v1 = vld [vmem:[#allocation13 + $0x110] sm:$0xff] }
  0xcf   :  { %4019 = vmatpush1.bf16.msra.mxu0 %v4018_v6  ;;  %v462_v6 = vld [vmem:[#allocation11 + $0x198] sm:$0xff] }
  0xd0   :  { %4021 = vmatprep.subr.bf16.mxu0 %v4020_v9  ;;  %v4064_v9 = vpack.c.bf16 %v466_v7, %v462_v6  ;;  %v398_v6 = vld [vmem:[#allocation13 + $0x128] sm:$0xff]  ;;  %v401_v7 = vld [vmem:[#allocation13 + $0x140] sm:$0xff] }
  0xd3   :  { %4023 = vmatpush1.bf16.msra.mxu0 %v4022_v12  ;;  %v4066_v12 = vpack.c.bf16 %v465_v11, %v461_v10  ;;  %v400_v10 = vld [vmem:[#allocation13 + $0x138] sm:$0xff] }
  0xd4   :  { %4025 = vmatprep.subr.bf16.mxu0 %v4024_v15  ;;  %v470_v15 = vld [vmem:[#allocation11 + $0x1d8] sm:$0xff] }
  0xd5   :  { %v4068_v19 = vpack.c.bf16 %v474_v17, %v470_v15 }
  0xd7   :  { %4027 = vmatpush1.bf16.msra.mxu0 %v4026_v18  ;;  %v467_v18 = vld [vmem:[#allocation11 + $0x1c0] sm:$0xff] }
  0xd8   :  { %4029 = vmatprep.subr.bf16.mxu0 %v4028_v21  ;;  %v469_v21 = vld [vmem:[#allocation11 + $0x1d0] sm:$0xff]  ;;  %v4038_v23 = vpack.c.bf16 %v471_v20, %v467_v18 }
  0xdb   :  { %4031 = vmatpush1.bf16.msra.mxu0 %v4030_v24  ;;  %v4070_v24 = vpack.c.bf16 %v473_v22, %v469_v21  ;;  %v363_v22 = vld [vmem:[#allocation13 + $0x10] sm:$0xff] }
  0xdc   :  { %4033 = vmatprep.subr.bf16.mxu0 %v4032_v27 }
  0xdf   :  { %4035 = vmatpush1.bf16.msra.mxu0 %v4034_v30 }
  0xe0   :  { %4037 = vmatprep.subr.bf16.mxu0 %v4036_v16  ;;  %v406_v16 = vld [vmem:[#allocation13 + $0x168] sm:$0xff] }
  0xe1   :  { %v5341_v17 = vpack.c.bf16 %v406_v16, %v403_v14  ;;  %v948_v14 = vld [vmem:[#allocation11 + $0x220] sm:$0xff] }
  0xe3   :  { %4039 = vmatpush1.bf16.msra.mxu0 %v4038_v23  ;;  %v366_v23 = vld [vmem:[#allocation13 + $0x28] sm:$0xff] }
 0x199   :  { %v3523_v32 = vpop.f32.mrb[0].mxu0 }
 0x19a   :  { %v254_v33 = vadd.f32 %v3523_v32, %v3220_v31  ;;  %v248_v34 = vpop.f32.mrb[1].mxu0 }
 0x19b   :  { %v249_v37 = vadd.f32 %v3220_v31, %v248_v34  ;;  %v362_v34 = vld [vmem:[#allocation13 + $0x8] sm:$0xff] }
 0x19c   :  { %v258_v42 = vmax.f32 %v254_v33, 0.0  ;;  %v5293_v33 = vld [vmem:[#allocation5] sm:$0xff] }
 0x19d   :  { %v257_v40 = vmax.f32 %v249_v37, 0.0  ;;  %v5297_v37 = vpack.c.bf16 %v365_v35, %v362_v34  ;;  %v369_v34 = vld [vmem:[#allocation13 + $0x40] sm:$0xff]  ;;  %v372_v35 = vld [vmem:[#allocation13 + $0x58] sm:$0xff] }
 0x19e   :  { %v5362_v38 = vpack.c.bf16 %v372_v35, %v369_v34  ;;  %v957_v34 = vld [vmem:[#allocation11 + $0x268] sm:$0xff]  ;;  %v955_v35 = vld [vmem:[#allocation11 + $0x258] sm:$0xff] }
 0x19f   :  { %3556 = vmatprep.mubr.f32.mxu1 %v257_v40  ;;  %v368_v40 = vld [vmem:[#allocation13 + $0x38] sm:$0xff] }
 0x1a0   :  { %3557 = vmatmul.mubr.f32.vlgmr.msra.gmra.mrb[0].mxu1 %v258_v42  ;;  %v367_v42 = vld [vmem:[#allocation13 + $0x30] sm:$0xff] }
 0x1a1   :  { %4043 = vmatpush1.bf16.msra.mxu1 %v4042_v41  ;;  %616 = vmatprep.mubr.f32.mxu1 %v5088_v25  ;;  %v371_v41 = vld [vmem:[#allocation13 + $0x50] sm:$0xff]  ;;  %v5305_v45 = vpack.c.bf16 %v370_v44, %v367_v42  ;;  %v381_v44 = vld [vmem:[#allocation13 + $0xa0] sm:$0xff] }
 0x1a2   :  { %4045 = vmatprep.subr.bf16.mxu1 %v4044_v43  ;;  %v5302_v43 = vpack.c.bf16 %v371_v41, %v368_v40  ;;  %v375_v40 = vld [vmem:[#allocation13 + $0x70] sm:$0xff]  ;;  %v378_v41 = vld [vmem:[#allocation13 + $0x88] sm:$0xff] }
 0x1a3   :  { %v5368_v42 = vpack.c.bf16 %v378_v41, %v375_v40  ;;  %v959_v41 = vld [vmem:[#allocation11 + $0x278] sm:$0xff] }
 0x1a5   :  { %4047 = vmatpush1.bf16.msra.mxu1 %v4046_v48  ;;  %v373_v48 = vld [vmem:[#allocation13 + $0x60] sm:$0xff] }
 0x1a6   :  { %4049 = vmatprep.subr.bf16.mxu1 %v4048_v49  ;;  %v5308_v49 = vpack.c.bf16 %v377_v47, %v374_v46  ;;  %v5311_v51 = vpack.c.bf16 %v376_v50, %v373_v48  ;;  %v384_v46 = vld [vmem:[#allocation13 + $0xb8] sm:$0xff]  ;;  %v387_v48 = vld [vmem:[#allocation13 + $0xd0] sm:$0xff]  ;;  %v390_v50 = vld [vmem:[#allocation13 + $0xe8] sm:$0xff] }
 0x1a7   :  { %v5372_v47 = vpack.c.bf16 %v384_v46, %v381_v44  ;;  %v952_v44 = vld [vmem:[#allocation11 + $0x240] sm:$0xff] }
 0x1a8   :  { %v956_v46 = vld [vmem:[#allocation11 + $0x260] sm:$0xff] }
 0x1a9   :  { %4051 = vmatpush1.bf16.msra.mxu1 %v4050_v54  ;;  %v379_v54 = vld [vmem:[#allocation13 + $0x90] sm:$0xff] }
 0x1aa   :  { %4053 = vmatprep.subr.bf16.mxu1 %v4052_v55  ;;  %v5314_v55 = vpack.c.bf16 %v383_v53, %v380_v52  ;;  %v5317_v57 = vpack.c.bf16 %v382_v56, %v379_v54  ;;  %v5376_v52 = vpack.c.bf16 %v390_v50, %v387_v48  ;;  %v393_v53 = vld [vmem:[#allocation13 + $0x100] sm:$0xff]  ;;  %v396_v54 = vld [vmem:[#allocation13 + $0x118] sm:$0xff]  ;;  %v4176_v48 = vpack.c.bf16 %v959_v41, %v955_v35  ;;  %v970_v41 = vld [vmem:[#allocation11 + $0x2d0] sm:$0xff] }
 0x1ab   :  { %v5380_v56 = vpack.c.bf16 %v396_v54, %v393_v53  ;;  %v4146_v50 = vpack.c.bf16 %v956_v46, %v952_v44  ;;  %v954_v53 = vld [vmem:[#allocation11 + $0x250] sm:$0xff] }
 0x1ac   :  { %v958_v54 = vld [vmem:[#allocation11 + $0x270] sm:$0xff] }
 0x1ad   :  { %4055 = vmatpush1.bf16.msra.mxu1 %v4054_v60  ;;  %v385_v60 = vld [vmem:[#allocation13 + $0xc0] sm:$0xff]  ;;  %v974_v44 = vld [vmem:[#allocation11 + $0x2f0] sm:$0xff] }
 0x1ae   :  { %4057 = vmatprep.subr.bf16.mxu1 %v4056_v61  ;;  %v5320_v61 = vpack.c.bf16 %v389_v59, %v386_v58  ;;  %v5323_v63 = vpack.c.bf16 %v388_v62, %v385_v60  ;;  %v399_v58 = vld [vmem:[#allocation13 + $0x130] sm:$0xff]  ;;  %v402_v59 = vld [vmem:[#allocation13 + $0x148] sm:$0xff]  ;;  %v405_v62 = vld [vmem:[#allocation13 + $0x160] sm:$0xff]  ;;  %v4186_v46 = vpack.c.bf16 %v974_v44, %v970_v41 }
 0x1af   :  { %v5384_v60 = vpack.c.bf16 %v402_v59, %v399_v58  ;;  %v4178_v58 = vpack.c.bf16 %v958_v54, %v954_v53  ;;  %v961_v59 = vld [vmem:[#allocation11 + $0x288] sm:$0xff]  ;;  %v979_v53 = vld [vmem:[#allocation11 + $0x318] sm:$0xff] }
 0x1b0   :  { %v995_v41 = vld [vmem:[#allocation11 + $0x398] sm:$0xff] }
 0x1b1   :  { %4059 = vmatpush1.bf16.msra.mxu1 %v4058_v2  ;;  %v391_v2 = vld [vmem:[#allocation13 + $0xf0] sm:$0xff]  ;;  %v999_v44 = vld [vmem:[#allocation11 + $0x3b8] sm:$0xff] }
 0x1b2   :  { %4061 = vmatprep.subr.bf16.mxu1 %v4060_v3  ;;  %v5326_v3 = vpack.c.bf16 %v395_v1, %v392_v0  ;;  %v5329_v5 = vpack.c.bf16 %v394_v4, %v391_v2  ;;  %v408_v0 = vld [vmem:[#allocation13 + $0x178] sm:$0xff] }
 0x1b3   :  { %v5388_v1 = vpack.c.bf16 %v408_v0, %v405_v62  ;;  %v965_v62 = vld [vmem:[#allocation11 + $0x2a8] sm:$0xff]  ;;  %v963_v0 = vld [vmem:[#allocation11 + $0x298] sm:$0xff] }
 0x1b5   :  { %4063 = vmatpush1.bf16.msra.mxu1 %v4062_v8  ;;  %v397_v8 = vld [vmem:[#allocation13 + $0x120] sm:$0xff] }
 0x1b6   :  { %4065 = vmatprep.subr.bf16.mxu1 %v4064_v9  ;;  %v5332_v9 = vpack.c.bf16 %v401_v7, %v398_v6  ;;  %v5335_v11 = vpack.c.bf16 %v400_v10, %v397_v8  ;;  %v945_v6 = vld [vmem:[#allocation11 + $0x208] sm:$0xff]  ;;  %v947_v8 = vld [vmem:[#allocation11 + $0x218] sm:$0xff] }
 0x1b7   :  { %v949_v7 = vld [vmem:[#allocation11 + $0x228] sm:$0xff] }
 0x1b8   :  { %v4140_v10 = vpack.c.bf16 %v949_v7, %v945_v6  ;;  %v960_v6 = vld [vmem:[#allocation11 + $0x280] sm:$0xff] }
 0x1b9   :  { %4067 = vmatpush1.bf16.msra.mxu1 %v4066_v12  ;;  %v404_v12 = vld [vmem:[#allocation13 + $0x158] sm:$0xff]  ;;  %v964_v7 = vld [vmem:[#allocation11 + $0x2a0] sm:$0xff] }
 0x1ba   :  { %4069 = vmatprep.subr.bf16.mxu1 %v4068_v19  ;;  %v5338_v15 = vpack.c.bf16 %v407_v13, %v404_v12  ;;  %v951_v12 = vld [vmem:[#allocation11 + $0x238] sm:$0xff]  ;;  %v944_v13 = vld [vmem:[#allocation11 + $0x200] sm:$0xff] }
 0x1bb   :  { %v4172_v16 = vpack.c.bf16 %v951_v12, %v947_v8  ;;  %v962_v12 = vld [vmem:[#allocation11 + $0x290] sm:$0xff] }
 0x1bd   :  { %4071 = vmatpush1.bf16.msra.mxu1 %v4070_v24 }
 0x1be   :  { %4077 = vmatprep.subr.bf16.mxu1 %v5297_v37 }
 0x273   :  { %v3558_v27 = vpop.f32.mrb[0].mxu1 }
 0x274   :  { %v350_v28 = vpop.f32.mrb[1].mxu1  ;;  %v356_v30 = vadd.f32 %v3558_v27, %v3221_v26 }
 0x275   :  { %v351_v29 = vadd.f32 %v3221_v26, %v350_v28 }
 0x276   :  { %v5288_v32 = vmax.f32 %v356_v30, 0.0  ;;  %v5357_v30 = vpack.c.bf16 %v366_v23, %v363_v22  ;;  %v946_v22 = vld [vmem:[#allocation11 + $0x210] sm:$0xff] }
 0x277   :  { %v5282_v31 = vmax.f32 %v351_v29, 0.0  ;;  %v950_v23 = vld [vmem:[#allocation11 + $0x230] sm:$0xff] }
 0x279   :  { %540 = vmatmul.mubr.f32.vlgmr.msra.gmra.mrb[2].mxu0 %v5282_v31  ;;  %617 = vmatmul.mubr.f32.vlgmr.msra.gmra.mrb[2].mxu1 %v5282_v31 }
 0x27a   :  { %545 = vmatprep.mubr.f32.mxu0 %v5088_v25  ;;  %622 = vmatprep.mubr.f32.mxu1 %v5088_v25 }
 0x27b   :  { %4079 = vmatpush1.bf16.msra.mxu1 %v5299_v39 }
 0x27c   :  { %4081 = vmatprep.subr.bf16.mxu1 %v5302_v43 }
 0x27d   :  { %546 = vmatmul.mubr.f32.gmra.mrb[4].mxu0 %v5288_v32  ;;  %623 = vmatmul.mubr.f32.gmra.mrb[4].mxu1 %v5288_v32 }
 0x27e   :  { %791 = vmatprep.mubr.f32.mxu1 %v5088_v25  ;;  %3563 = vmatprep.mubr.msk.f32.mxu0 %vm629_vm0, %v5293_v33 }
 0x27f   :  { %4083 = vmatpush1.bf16.msra.mxu1 %v5305_v45 }
 0x280   :  { %4085 = vmatprep.subr.bf16.mxu1 %v5308_v49 }
 0x283   :  { %4087 = vmatpush1.bf16.msra.mxu1 %v5311_v51 }
 0x284   :  { %4089 = vmatprep.subr.bf16.mxu1 %v5314_v55 }
 0x287   :  { %4091 = vmatpush1.bf16.msra.mxu1 %v5317_v57 }
 0x288   :  { %4093 = vmatprep.subr.bf16.mxu1 %v5320_v61 }
 0x28b   :  { %4095 = vmatpush1.bf16.msra.mxu1 %v5323_v63 }
 0x28c   :  { %4097 = vmatprep.subr.bf16.mxu1 %v5326_v3 }
 0x28f   :  { %4099 = vmatpush1.bf16.msra.mxu1 %v5329_v5 }
 0x290   :  { %4101 = vmatprep.subr.bf16.mxu1 %v5332_v9 }
 0x293   :  { %4103 = vmatpush1.bf16.msra.mxu1 %v5335_v11 }
 0x294   :  { %4105 = vmatprep.subr.bf16.mxu1 %v5338_v15 }
 0x297   :  { %4107 = vmatpush1.bf16.msra.mxu1 %v5341_v17 }
 0x298   :  { %4141 = vmatprep.subr.bf16.mxu1 %v4140_v10  ;;  %v4150_v10 = vpack.c.bf16 %v964_v7, %v960_v6  ;;  %v982_v6 = vld [vmem:[#allocation11 + $0x330] sm:$0xff] }
 0x34c   :  { %v541_v18 = vpop.f32.mrb[2].mxu0  ;;  %v5345_v19 = vpop.f32.mrb[2].mxu1 }
 0x34d   :  { %v5347_v20 = vpop.f32.mrb[3].mxu0  ;;  %v5349_v21 = vpop.f32.mrb[3].mxu1 }
 0x350   :  { %v547_v24 = vpop.f32.mrb[4].mxu0  ;;  %v5351_v26 = vpop.f32.mrb[4].mxu1 }
 0x351   :  { %v4072_v27 = vpack.c.bf16 %v547_v24, %v541_v18  ;;  %v5353_v28 = vpop.f32.mrb[5].mxu0  ;;  %v5355_v29 = vpop.f32.mrb[5].mxu1  ;;  %v4142_v18 = vpack.c.bf16 %v948_v14, %v944_v13  ;;  %v4174_v24 = vpack.c.bf16 %v950_v23, %v946_v22  ;;  %v966_v13 = vld [vmem:[#allocation11 + $0x2b0] sm:$0xff]  ;;  %v971_v22 = vld [vmem:[#allocation11 + $0x2d8] sm:$0xff] }
 0x352   :  { %v4182_v14 = vpack.c.bf16 %v966_v13, %v962_v12  ;;  %v987_v12 = vld [vmem:[#allocation11 + $0x358] sm:$0xff] }
 0x353   :  { %4073 = vmatprep.subr.bf16.mxu0 %v4072_v27 }
 0x354   :  { %4075 = vmatpush3.bf16.msra.mxu0 %v4072_v27  ;;  %v953_v27 = vld [vmem:[#allocation11 + $0x248] sm:$0xff] }
 0x355   :  { %4109 = vmatprep.subr.bf16.mxu0 %v5357_v30  ;;  %v4144_v40 = vpack.c.bf16 %v957_v34, %v953_v27  ;;  %v968_v27 = vld [vmem:[#allocation11 + $0x2c0] sm:$0xff] }
 0x356   :  { %v972_v34 = vld [vmem:[#allocation11 + $0x2e0] sm:$0xff] }
 0x357   :  { %3564 = vmatmul.mubr.msk.f32.vlgmr.msra.gmra.mrb[6].mxu0 %vm629_vm0, %v5359_v36 }
 0x358   :  { %4111 = vmatpush3.bf16.msra.mxu0 %v5357_v30 }
 0x359   :  { %4113 = vmatprep.subr.bf16.mxu0 %v5362_v38 }
 0x35c   :  { %4115 = vmatpush3.bf16.msra.mxu0 %v5362_v38 }
 0x35d   :  { %4117 = vmatprep.subr.bf16.mxu0 %v5368_v42 }
 0x360   :  { %4119 = vmatpush3.bf16.msra.mxu0 %v5368_v42 }
 0x361   :  { %4121 = vmatprep.subr.bf16.mxu0 %v5372_v47 }
 0x364   :  { %4123 = vmatpush3.bf16.msra.mxu0 %v5372_v47 }
 0x365   :  { %4125 = vmatprep.subr.bf16.mxu0 %v5376_v52 }
 0x368   :  { %4127 = vmatpush3.bf16.msra.mxu0 %v5376_v52 }
 0x369   :  { %4129 = vmatprep.subr.bf16.mxu0 %v5380_v56 }
 0x36c   :  { %4131 = vmatpush3.bf16.msra.mxu0 %v5380_v56 }
 0x36d   :  { %4133 = vmatprep.subr.bf16.mxu0 %v5384_v60 }
 0x370   :  { %4135 = vmatpush3.bf16.msra.mxu0 %v5384_v60 }
 0x371   :  { %4137 = vmatprep.subr.bf16.mxu0 %v5388_v1 }
 0x374   :  { %4139 = vmatpush3.bf16.msra.mxu0 %v5388_v1 }
 0x375   :  { %4173 = vmatprep.subr.bf16.mxu0 %v4172_v16  ;;  %v969_v16 = vld [vmem:[#allocation11 + $0x2c8] sm:$0xff] }
 0x42a   :  { %v3565_v2 = vpop.f32.mrb[6].mxu0 }
 0x42b   :  { %v702_v4 = vpop.f32.mrb[7].mxu0 }
 0x42c   :  { %792 = vmatmul.mubr.f32.vlgmr.msra.gmra.mrb[6].mxu1 %v702_v4  ;;  %3598 = vmatprep.mubr.f32.mxu0 %v702_v4  ;;  %v967_v4 = vld [vmem:[#allocation11 + $0x2b8] sm:$0xff] }
 0x42d   :  { %3599 = vmatmul.mubr.f32.vlgmr.msra.gmra.mrb[8].mxu0 %v3565_v2  ;;  %797 = vmatprep.mubr.f32.mxu1 %v5088_v25  ;;  %v4180_v8 = vpack.c.bf16 %v967_v4, %v963_v0  ;;  %v978_v4 = vld [vmem:[#allocation11 + $0x310] sm:$0xff] }
 0x42e   :  { %1149 = vmatprep.mubr.f32.mxu0 %v5088_v25  ;;  %4143 = vmatpush1.bf16.msra.mxu1 %v4142_v18  ;;  %v973_v18 = vld [vmem:[#allocation11 + $0x2e8] sm:$0xff]  ;;  %v4190_v7 = vpack.c.bf16 %v982_v6, %v978_v4  ;;  %v1003_v6 = vld [vmem:[#allocation11 + $0x3d8] sm:$0xff] }
 0x42f   :  { %4175 = vmatpush1.bf16.msra.mxu0 %v4174_v24  ;;  %4145 = vmatprep.subr.bf16.mxu1 %v4144_v40  ;;  %v4152_v23 = vpack.c.bf16 %v973_v18, %v969_v16  ;;  %v975_v24 = vld [vmem:[#allocation11 + $0x2f8] sm:$0xff]  ;;  %v4154_v40 = vpack.c.bf16 %v972_v34, %v968_v27  ;;  %v984_v16 = vld [vmem:[#allocation11 + $0x340] sm:$0xff]  ;;  %v990_v27 = vld [vmem:[#allocation11 + $0x370] sm:$0xff] }
 0x430   :  { %798 = vmatmul.mubr.f32.gmra.mrb[8].mxu1 %v3565_v2  ;;  %4177 = vmatprep.subr.bf16.mxu0 %v4176_v48  ;;  %v4148_v2 = vpack.c.bf16 %v965_v62, %v961_v59  ;;  %v4184_v35 = vpack.c.bf16 %v975_v24, %v971_v22  ;;  %v977_v48 = vld [vmem:[#allocation11 + $0x308] sm:$0xff]  ;;  %v976_v59 = vld [vmem:[#allocation11 + $0x300] sm:$0xff]  ;;  %v986_v24 = vld [vmem:[#allocation11 + $0x350] sm:$0xff] }
 0x431   :  { %1072 = vmatprep.mubr.f32.mxu1 %v5088_v25  ;;  %v980_v62 = vld [vmem:[#allocation11 + $0x320] sm:$0xff]  ;;  %v993_v34 = vld [vmem:[#allocation11 + $0x388] sm:$0xff] }
 0x432   :  { %4147 = vmatpush1.bf16.msra.mxu1 %v4146_v50  ;;  %v981_v50 = vld [vmem:[#allocation11 + $0x328] sm:$0xff]  ;;  %v988_v18 = vld [vmem:[#allocation11 + $0x360] sm:$0xff] }
 0x433   :  { %4179 = vmatpush1.bf16.msra.mxu0 %v4178_v58  ;;  %4149 = vmatprep.subr.bf16.mxu1 %v4148_v2  ;;  %v4156_v54 = vpack.c.bf16 %v981_v50, %v977_v48  ;;  %v983_v58 = vld [vmem:[#allocation11 + $0x338] sm:$0xff]  ;;  %v4158_v2 = vpack.c.bf16 %v980_v62, %v976_v59  ;;  %v4196_v48 = vpack.c.bf16 %v999_v44, %v995_v41  ;;  %v992_v50 = vld [vmem:[#allocation11 + $0x380] sm:$0xff]  ;;  %v998_v59 = vld [vmem:[#allocation11 + $0x3b0] sm:$0xff] }
 0x434   :  { %4181 = vmatprep.subr.bf16.mxu0 %v4180_v8  ;;  %v4188_v0 = vpack.c.bf16 %v983_v58, %v979_v53  ;;  %v985_v8 = vld [vmem:[#allocation11 + $0x348] sm:$0xff]  ;;  %v996_v53 = vld [vmem:[#allocation11 + $0x3a0] sm:$0xff] }
 0x435   :  { %v4166_v58 = vpack.c.bf16 %v996_v53, %v992_v50  ;;  %v1001_v62 = vld [vmem:[#allocation11 + $0x3c8] sm:$0xff] }
 0x436   :  { %4151 = vmatpush1.bf16.msra.mxu1 %v4150_v10  ;;  %v989_v10 = vld [vmem:[#allocation11 + $0x368] sm:$0xff] }
 0x437   :  { %4183 = vmatpush1.bf16.msra.mxu0 %v4182_v14  ;;  %4153 = vmatprep.subr.bf16.mxu1 %v4152_v23  ;;  %v4160_v13 = vpack.c.bf16 %v989_v10, %v985_v8  ;;  %v991_v14 = vld [vmem:[#allocation11 + $0x378] sm:$0xff]  ;;  %v4162_v23 = vpack.c.bf16 %v988_v18, %v984_v16  ;;  %v1000_v8 = vld [vmem:[#allocation11 + $0x3c0] sm:$0xff] }
 0x438   :  { %4185 = vmatprep.subr.bf16.mxu0 %v4184_v35  ;;  %v4192_v22 = vpack.c.bf16 %v991_v14, %v987_v12  ;;  %v4194_v35 = vpack.c.bf16 %v990_v27, %v986_v24  ;;  %v1004_v12 = vld [vmem:[#allocation11 + $0x3e0] sm:$0xff]  ;;  %v1006_v14 = vld [vmem:[#allocation11 + $0x3f0] sm:$0xff] }
 0x439   :  { %v4170_v16 = vpack.c.bf16 %v1004_v12, %v1000_v8  ;;  %v410_v27 = vld [vmem:[#allocation16] sm:$0x7] }
 0x43a   :  { %4155 = vmatpush1.bf16.msra.mxu1 %v4154_v40  ;;  %v997_v40 = vld [vmem:[#allocation11 + $0x3a8] sm:$0xff] }
 0x43b   :  { %4187 = vmatpush1.bf16.msra.mxu0 %v4186_v46  ;;  %4157 = vmatprep.subr.bf16.mxu1 %v4156_v54  ;;  %v4164_v46 = vpack.c.bf16 %v997_v40, %v993_v34  ;;  %v994_v54 = vld [vmem:[#allocation11 + $0x390] sm:$0xff] }
 0x43c   :  { %4189 = vmatprep.subr.bf16.mxu0 %v4188_v0  ;;  %v1005_v0 = vld [vmem:[#allocation11 + $0x3e8] sm:$0xff] }
 0x43d   :  { %v4168_v4 = vpack.c.bf16 %v1005_v0, %v1001_v62 }
 0x43e   :  { %4159 = vmatpush1.bf16.msra.mxu1 %v4158_v2  ;;  %v4198_v2 = vpack.c.bf16 %v998_v59, %v994_v54 }
 0x43f   :  { %4191 = vmatpush1.bf16.msra.mxu0 %v4190_v7  ;;  %4161 = vmatprep.subr.bf16.mxu1 %v4160_v13  ;;  %v1007_v7 = vld [vmem:[#allocation11 + $0x3f8] sm:$0xff]  ;;  %v1002_v13 = vld [vmem:[#allocation11 + $0x3d0] sm:$0xff] }
 0x440   :  { %4193 = vmatprep.subr.bf16.mxu0 %v4192_v22  ;;  %v4200_v10 = vpack.c.bf16 %v1007_v7, %v1003_v6  ;;  %v4202_v18 = vpack.c.bf16 %v1006_v14, %v1002_v13  ;;  %v712_v22 = vlaneseq }
 0x442   :  { %4163 = vmatpush1.bf16.msra.mxu1 %v4162_v23  ;;  %v713_v23 = vshrl.u32 %v712_v22, 7 }
 0x443   :  { %4195 = vmatpush1.bf16.msra.mxu0 %v4194_v35  ;;  %4165 = vmatprep.subr.bf16.mxu1 %v4164_v46  ;;  %v409_v35 = vld [vmem:[#allocation14] sm:$0x7] }
 0x444   :  { %4197 = vmatprep.subr.bf16.mxu0 %v4196_v48  ;;  %v5397_v24 = vsub.s32 0, %v713_v23  ;;  %v5399_v34 = vsub.s32 1, %v713_v23 }
 0x446   :  { %4167 = vmatpush1.bf16.msra.mxu1 %v4166_v58  ;;  %v5402_v40 = vrot.slane %v410_v27, %v5397_v24  ;;  %v5405_v41 = vrot.slane %v409_v35, %v5397_v24  ;;  %v5408_v44 = vrot.slane %v410_v27, %v5399_v34  ;;  %v5411_v46 = vrot.slane %v409_v35, %v5399_v34 }
 0x447   :  { %4199 = vmatpush1.bf16.msra.mxu0 %v4198_v2  ;;  %4169 = vmatprep.subr.bf16.mxu1 %v4168_v4 }
 0x448   :  { %4201 = vmatprep.subr.bf16.mxu0 %v4200_v10  ;;  %v895_v48 = vadd.f32 %v5402_v40, %v5347_v20  ;;  %v896_v58 = vadd.f32 %v5408_v44, %v5345_v19  ;;  %v898_v6 = vadd.f32 %v5402_v40, %v5353_v28  ;;  %v899_v10 = vadd.f32 %v5408_v44, %v5351_v26 }
 0x44a   :  { %4171 = vmatpush1.bf16.msra.mxu1 %v4170_v16 }
 0x44b   :  { %4203 = vmatpush1.bf16.msra.mxu0 %v4202_v18 }
 0x44c   :  { %4209 = vmatprep.subr.bf16.mxu0 %v5297_v37 }
 0x4ff   :  { %v793_v37 = vpop.f32.mrb[6].mxu1 }
 0x500   :  { %v794_v50 = vadd.f32 %v793_v37, %v5405_v41  ;;  %v795_v53 = vpop.f32.mrb[7].mxu1  ;;  %v3600_v54 = vpop.f32.mrb[8].mxu0 }
 0x501   :  { %v796_v59 = vadd.f32 %v795_v53, %v5411_v46  ;;  %v870_v62 = vpop.f32.mrb[9].mxu0 }
 0x502   :  { %v901_v0 = vadd.f32 %v895_v48, %v794_v50  ;;  %v5425_v48 = vsub.s32 2, %v713_v23 }
 0x503   :  { %v915_v2 = vadd.f32 %v896_v58, %v796_v59  ;;  %v799_v4 = vpop.f32.mrb[8].mxu1 }
 0x504   :  { %v3224_v7 = vmul.f32 -1.442695, %v901_v0  ;;  %v800_v8 = vadd.f32 %v799_v4, %v5405_v41  ;;  %v801_v20 = vpop.f32.mrb[9].mxu1  ;;  %v5428_v26 = vrot.slane %v410_v27, %v5425_v48  ;;  %v5431_v0 = vrot.slane %v409_v35, %v5425_v48 }
 0x505   :  { %v802_v12 = vadd.f32 %v801_v20, %v5411_v46  ;;  %v3226_v16 = vmul.f32 -1.442695, %v915_v2 }
 0x506   :  { %4755 = vpow2.f32 %v3224_v7  ;;  %v902_v19 = vadd.f32 %v898_v6, %v800_v8  ;;  %v897_v2 = vadd.f32 %v5428_v26, %v5349_v21  ;;  %v871_v23 = vadd.f32 %v870_v62, %v5431_v0 }
 0x507   :  { %v916_v13 = vadd.f32 %v899_v10, %v802_v12  ;;  %v900_v8 = vadd.f32 %v5428_v26, %v5355_v29  ;;  %v876_v10 = vadd.f32 %v3600_v54, %v5431_v0 }
 0x508   :  { %v3225_v14 = vmul.f32 -1.442695, %v902_v19 }
 0x509   :  { %v3227_v18 = vmul.f32 -1.442695, %v916_v13 }
 0x50a   :  { %4757 = vpow2.f32 %v3225_v14 }
 0x50b   :  { %4759 = vpow2.f32 %v3226_v16 }
 0x50c   :  { %4761 = vpow2.f32 %v3227_v18 }
 0x510   :  { %v4756_v22 = vpop.eup %4755 }
 0x511   :  { %v909_v28 = vadd.f32 1.0, %v4756_v22 }
 0x513   :  { %4763 = vrcp.f32 %v909_v28 }
 0x514   :  { %v4758_v37 = vpop.eup %4757 }
 0x515   :  { %v910_v50 = vadd.f32 1.0, %v4758_v37  ;;  %v4760_v53 = vpop.eup %4759 }
 0x516   :  { %v4762_v58 = vpop.eup %4761  ;;  %v923_v59 = vadd.f32 1.0, %v4760_v53  ;;  %v1501_v53 = vld [vmem:[#allocation11 + $0x440] sm:$0xff] }
 0x517   :  { %4765 = vrcp.f32 %v910_v50  ;;  %v924_v6 = vadd.f32 1.0, %v4762_v58  ;;  %v1508_v50 = vld [vmem:[#allocation11 + $0x478] sm:$0xff]  ;;  %v1505_v58 = vld [vmem:[#allocation11 + $0x460] sm:$0xff] }
 0x518   :  { %4767 = vrcp.f32 %v923_v59 }
 0x519   :  { %4769 = vrcp.f32 %v924_v6  ;;  %v1507_v6 = vld [vmem:[#allocation11 + $0x470] sm:$0xff] }
 0x51d   :  { %v4764_v4 = vpop.eup %4763 }
 0x51e   :  { %v929_v7 = vmul.f32 %v4764_v4, %v897_v2  ;;  %v4278_v2 = vpack.c.bf16 %v1505_v58, %v1501_v53  ;;  %v1503_v4 = vld [vmem:[#allocation11 + $0x450] sm:$0xff]  ;;  %v1540_v58 = vld [vmem:[#allocation11 + $0x578] sm:$0xff] }
 0x520   :  { %v931_v20 = vadd.f32 %v929_v7, %v871_v23  ;;  %v4310_v23 = vpack.c.bf16 %v1507_v6, %v1503_v4  ;;  %v1510_v7 = vld [vmem:[#allocation11 + $0x488] sm:$0xff] }
 0x521   :  { %v4766_v27 = vpop.eup %4765 }
 0x522   :  { %4771 = vtanh.f32 %v931_v20  ;;  %v930_v35 = vmul.f32 %v4766_v27, %v900_v8  ;;  %v4768_v19 = vpop.eup %4767  ;;  %v1514_v8 = vld [vmem:[#allocation11 + $0x4a8] sm:$0xff]  ;;  %v1512_v20 = vld [vmem:[#allocation11 + $0x498] sm:$0xff] }
 0x523   :  { %v4770_v21 = vpop.eup %4769  ;;  %v935_v13 = vsub.f32 1.0, %v4768_v19  ;;  %v939_v62 = vmul.f32 %v4768_v19, %v5282_v31  ;;  %v4280_v27 = vpack.c.bf16 %v1514_v8, %v1510_v7  ;;  %v1539_v7 = vld [vmem:[#allocation11 + $0x570] sm:$0xff] }
 0x524   :  { %v932_v12 = vadd.f32 %v930_v35, %v876_v10  ;;  %v936_v22 = vsub.f32 1.0, %v4770_v21  ;;  %v940_v28 = vmul.f32 %v4770_v21, %v5288_v32  ;;  %v1516_v10 = vld [vmem:[#allocation11 + $0x4b8] sm:$0xff]  ;;  %v1509_v35 = vld [vmem:[#allocation11 + $0x480] sm:$0xff] }
 0x525   :  { %v4312_v19 = vpack.c.bf16 %v1516_v10, %v1512_v20  ;;  %v1542_v20 = vld [vmem:[#allocation11 + $0x588] sm:$0xff]  ;;  %v1544_v10 = vld [vmem:[#allocation11 + $0x598] sm:$0xff] }
 0x526   :  { %4773 = vtanh.f32 %v932_v12  ;;  %v1513_v12 = vld [vmem:[#allocation11 + $0x4a0] sm:$0xff] }
 0x527   :  { %v4282_v21 = vpack.c.bf16 %v1513_v12, %v1509_v35  ;;  %v1548_v12 = vld [vmem:[#allocation11 + $0x5b8] sm:$0xff] }
 0x52c   :  { %v4772_v14 = vpop.eup %4771 }
 0x52d   :  { %v937_v16 = vmul.f32 %v4772_v14, %v935_v13  ;;  %v1511_v13 = vld [vmem:[#allocation11 + $0x490] sm:$0xff] }
 0x52e   :  { %v1515_v14 = vld [vmem:[#allocation11 + $0x4b0] sm:$0xff] }
 0x52f   :  { %v5440_v18 = vadd.f32 %v939_v62, %v937_v16  ;;  %v4314_v16 = vpack.c.bf16 %v1515_v14, %v1511_v13  ;;  %v1518_v62 = vld [vmem:[#allocation11 + $0x4c8] sm:$0xff]  ;;  %v4328_v13 = vpack.c.bf16 %v1548_v12, %v1544_v10 }
 0x530   :  { %v4774_v29 = vpop.eup %4773 }
 0x531   :  { %1073 = vmatmul.mubr.f32.vlgmr.msra.gmra.mrb[10].mxu1 %v5440_v18  ;;  %1150 = vmatmul.mubr.f32.vlgmr.msra.gmra.mrb[10].mxu0 %v5440_v18  ;;  %v938_v54 = vmul.f32 %v4774_v29, %v936_v22  ;;  %v1522_v22 = vld [vmem:[#allocation11 + $0x4e8] sm:$0xff]  ;;  %v1520_v29 = vld [vmem:[#allocation11 + $0x4d8] sm:$0xff] }
 0x532   :  { %1078 = vmatprep.mubr.f32.mxu1 %v5088_v25  ;;  %1155 = vmatprep.mubr.f32.mxu0 %v5088_v25 }
 0x533   :  { %v5447_v37 = vadd.f32 %v940_v28, %v938_v54  ;;  %4211 = vmatpush1.bf16.msra.mxu0 %v5299_v39  ;;  %v4284_v54 = vpack.c.bf16 %v1522_v22, %v1518_v62  ;;  %v1524_v28 = vld [vmem:[#allocation11 + $0x4f8] sm:$0xff]  ;;  %v1547_v62 = vld [vmem:[#allocation11 + $0x5b0] sm:$0xff] }
 0x534   :  { %4213 = vmatprep.subr.bf16.mxu0 %v5302_v43 }
 0x535   :  { %1079 = vmatmul.mubr.f32.gmra.mrb[12].mxu1 %v5447_v37  ;;  %1156 = vmatmul.mubr.f32.gmra.mrb[12].mxu0 %v5447_v37 }
 0x536   :  { %3605 = vmatprep.mubr.msk.f32.mxu1 %vm629_vm0, %v5293_v33  ;;  %1301 = vmatprep.mubr.f32.mxu0 %v5088_v25 }
 0x537   :  { %4215 = vmatpush1.bf16.msra.mxu0 %v5305_v45 }
 0x538   :  { %4217 = vmatprep.subr.bf16.mxu0 %v5308_v49 }
 0x53b   :  { %4219 = vmatpush1.bf16.msra.mxu0 %v5311_v51 }
 0x53c   :  { %4221 = vmatprep.subr.bf16.mxu0 %v5314_v55 }
 0x53f   :  { %4223 = vmatpush1.bf16.msra.mxu0 %v5317_v57 }
 0x540   :  { %4225 = vmatprep.subr.bf16.mxu0 %v5320_v61 }
 0x543   :  { %4227 = vmatpush1.bf16.msra.mxu0 %v5323_v63  ;;  %v1494_v63 = vld [vmem:[#allocation11 + $0x408] sm:$0xff] }
 0x544   :  { %4229 = vmatprep.subr.bf16.mxu0 %v5326_v3  ;;  %v1498_v3 = vld [vmem:[#allocation11 + $0x428] sm:$0xff] }
 0x547   :  { %4231 = vmatpush1.bf16.msra.mxu0 %v5329_v5  ;;  %v1496_v5 = vld [vmem:[#allocation11 + $0x418] sm:$0xff] }
 0x548   :  { %4233 = vmatprep.subr.bf16.mxu0 %v5332_v9  ;;  %v4272_v9 = vpack.c.bf16 %v1498_v3, %v1494_v63  ;;  %v1523_v63 = vld [vmem:[#allocation11 + $0x4f0] sm:$0xff] }
 0x54b   :  { %4235 = vmatpush1.bf16.msra.mxu0 %v5335_v11  ;;  %v1500_v11 = vld [vmem:[#allocation11 + $0x438] sm:$0xff] }
 0x54c   :  { %4237 = vmatprep.subr.bf16.mxu0 %v5338_v15  ;;  %v1493_v15 = vld [vmem:[#allocation11 + $0x400] sm:$0xff] }
 0x54f   :  { %4239 = vmatpush1.bf16.msra.mxu0 %v5341_v17  ;;  %v1497_v17 = vld [vmem:[#allocation11 + $0x420] sm:$0xff] }
 0x550   :  { %4273 = vmatprep.subr.bf16.mxu0 %v4272_v9  ;;  %v1530_v9 = vld [vmem:[#allocation11 + $0x528] sm:$0xff] }
 0x604   :  { %v1074_v31 = vpop.f32.mrb[10].mxu1  ;;  %v5469_v32 = vpop.f32.mrb[10].mxu0 }
 0x605   :  { %v5471_v33 = vpop.f32.mrb[11].mxu1  ;;  %v5473_v39 = vpop.f32.mrb[11].mxu0 }
 0x608   :  { %v1080_v43 = vpop.f32.mrb[12].mxu1  ;;  %v5475_v45 = vpop.f32.mrb[12].mxu0 }
 0x609   :  { %v4204_v49 = vpack.c.bf16 %v1080_v43, %v1074_v31  ;;  %v5477_v51 = vpop.f32.mrb[13].mxu1  ;;  %v5479_v55 = vpop.f32.mrb[13].mxu0  ;;  %v1517_v31 = vld [vmem:[#allocation11 + $0x4c0] sm:$0xff] }
 0x60a   :  { %v1521_v43 = vld [vmem:[#allocation11 + $0x4e0] sm:$0xff]  ;;  %v1394_v12 = vadd.f32 %v5479_v55, %v5428_v26 }
 0x60b   :  { %4205 = vmatprep.subr.bf16.mxu1 %v4204_v49 }
 0x60c   :  { %4207 = vmatpush3.bf16.msra.mxu1 %v4204_v49  ;;  %v4316_v49 = vpack.c.bf16 %v1524_v28, %v1520_v29  ;;  %v1550_v29 = vld [vmem:[#allocation11 + $0x5c8] sm:$0xff]  ;;  %v1552_v28 = vld [vmem:[#allocation11 + $0x5d8] sm:$0xff] }
 0x60d   :  { %4241 = vmatprep.subr.bf16.mxu1 %v5357_v30 }
 0x60f   :  { %3606 = vmatmul.mubr.msk.f32.vlgmr.msra.gmra.mrb[14].mxu1 %vm629_vm0, %v5359_v36  ;;  %v4274_v36 = vpack.c.bf16 %v1497_v17, %v1493_v15  ;;  %v1532_v17 = vld [vmem:[#allocation11 + $0x538] sm:$0xff] }
 0x610   :  { %4243 = vmatpush3.bf16.msra.mxu1 %v5357_v30  ;;  %v4304_v30 = vpack.c.bf16 %v1500_v11, %v1496_v5  ;;  %v1526_v5 = vld [vmem:[#allocation11 + $0x508] sm:$0xff]  ;;  %v1528_v11 = vld [vmem:[#allocation11 + $0x518] sm:$0xff] }
 0x611   :  { %4245 = vmatprep.subr.bf16.mxu1 %v5362_v38  ;;  %v4288_v15 = vpack.c.bf16 %v1530_v9, %v1526_v5  ;;  %v1555_v5 = vld [vmem:[#allocation11 + $0x5f0] sm:$0xff] }
 0x614   :  { %4247 = vmatpush3.bf16.msra.mxu1 %v5362_v38  ;;  %v1495_v38 = vld [vmem:[#allocation11 + $0x410] sm:$0xff] }
 0x615   :  { %4249 = vmatprep.subr.bf16.mxu1 %v5368_v42 }
 0x618   :  { %4251 = vmatpush3.bf16.msra.mxu1 %v5368_v42  ;;  %v1499_v42 = vld [vmem:[#allocation11 + $0x430] sm:$0xff] }
 0x619   :  { %4253 = vmatprep.subr.bf16.mxu1 %v5372_v47 }
 0x61c   :  { %4255 = vmatpush3.bf16.msra.mxu1 %v5372_v47  ;;  %v4306_v47 = vpack.c.bf16 %v1499_v42, %v1495_v38  ;;  %v4320_v38 = vpack.c.bf16 %v1532_v17, %v1528_v11 }
 0x61d   :  { %4257 = vmatprep.subr.bf16.mxu1 %v5376_v52 }
 0x620   :  { %4259 = vmatpush3.bf16.msra.mxu1 %v5376_v52  ;;  %v1502_v52 = vld [vmem:[#allocation11 + $0x448] sm:$0xff] }
 0x621   :  { %4261 = vmatprep.subr.bf16.mxu1 %v5380_v56 }
 0x624   :  { %4263 = vmatpush3.bf16.msra.mxu1 %v5380_v56  ;;  %v1506_v56 = vld [vmem:[#allocation11 + $0x468] sm:$0xff] }
 0x625   :  { %4265 = vmatprep.subr.bf16.mxu1 %v5384_v60 }
 0x628   :  { %4267 = vmatpush3.bf16.msra.mxu1 %v5384_v60  ;;  %v1504_v60 = vld [vmem:[#allocation11 + $0x458] sm:$0xff] }
 0x629   :  { %4269 = vmatprep.subr.bf16.mxu1 %v5388_v1  ;;  %v4308_v59 = vpack.c.bf16 %v1508_v50, %v1504_v60  ;;  %v1534_v60 = vld [vmem:[#allocation11 + $0x548] sm:$0xff]  ;;  %v1536_v50 = vld [vmem:[#allocation11 + $0x558] sm:$0xff] }
 0x62a   :  { %v4324_v4 = vpack.c.bf16 %v1540_v58, %v1536_v50  ;;  %v1393_v58 = vadd.f32 %v5475_v45, %v5408_v44 }
 0x62c   :  { %4271 = vmatpush3.bf16.msra.mxu1 %v5388_v1  ;;  %v4276_v1 = vpack.c.bf16 %v1506_v56, %v1502_v52  ;;  %v1531_v52 = vld [vmem:[#allocation11 + $0x530] sm:$0xff] }
 0x62d   :  { %4305 = vmatprep.subr.bf16.mxu1 %v4304_v30  ;;  %v1525_v30 = vld [vmem:[#allocation11 + $0x500] sm:$0xff] }
 0x6e2   :  { %v3607_v57 = vpop.f32.mrb[14].mxu1 }
 0x6e3   :  { %v1228_v61 = vpop.f32.mrb[15].mxu1 }
 0x6e4   :  { %1302 = vmatmul.mubr.f32.vlgmr.msra.gmra.mrb[14].mxu0 %v1228_v61  ;;  %3640 = vmatprep.mubr.f32.mxu1 %v1228_v61  ;;  %v1519_v61 = vld [vmem:[#allocation11 + $0x4d0] sm:$0xff] }
 0x6e5   :  { %3641 = vmatmul.mubr.f32.vlgmr.msra.gmra.mrb[16].mxu1 %v3607_v57  ;;  %1307 = vmatprep.mubr.f32.mxu0 %v5088_v25  ;;  %v4318_v3 = vpack.c.bf16 %v1523_v63, %v1519_v61 }
 0x6e6   :  { %1698 = vmatprep.mubr.f32.mxu1 %v5088_v25  ;;  %4275 = vmatpush1.bf16.msra.mxu0 %v4274_v36  ;;  %v1529_v36 = vld [vmem:[#allocation11 + $0x520] sm:$0xff] }
 0x6e7   :  { %4307 = vmatpush1.bf16.msra.mxu1 %v4306_v47  ;;  %4277 = vmatprep.subr.bf16.mxu0 %v4276_v1  ;;  %v4290_v42 = vpack.c.bf16 %v1529_v36, %v1525_v30  ;;  %v1527_v47 = vld [vmem:[#allocation11 + $0x510] sm:$0xff]  ;;  %v1538_v1 = vld [vmem:[#allocation11 + $0x568] sm:$0xff] }
 0x6e8   :  { %1308 = vmatmul.mubr.f32.gmra.mrb[16].mxu0 %v3607_v57  ;;  %4309 = vmatprep.subr.bf16.mxu1 %v4308_v59  ;;  %v4286_v57 = vpack.c.bf16 %v1521_v43, %v1517_v31  ;;  %v4322_v56 = vpack.c.bf16 %v1531_v52, %v1527_v47  ;;  %v4292_v53 = vpack.c.bf16 %v1538_v1, %v1534_v60  ;;  %v1533_v59 = vld [vmem:[#allocation11 + $0x540] sm:$0xff]  ;;  %v1556_v43 = vld [vmem:[#allocation11 + $0x5f8] sm:$0xff] }
 0x6e9   :  { %1621 = vmatprep.mubr.f32.mxu0 %v5088_v25  ;;  %v4332_v61 = vpack.c.bf16 %v1556_v43, %v1552_v28  ;;  %v1392_v1 = vadd.f32 %v5477_v51, %v5402_v40 }
 0x6ea   :  { %4279 = vmatpush1.bf16.msra.mxu0 %v4278_v2  ;;  %v1537_v2 = vld [vmem:[#allocation11 + $0x560] sm:$0xff] }
 0x6eb   :  { %4311 = vmatpush1.bf16.msra.mxu1 %v4310_v23  ;;  %4281 = vmatprep.subr.bf16.mxu0 %v4280_v27  ;;  %v4294_v6 = vpack.c.bf16 %v1537_v2, %v1533_v59  ;;  %v1535_v23 = vld [vmem:[#allocation11 + $0x550] sm:$0xff]  ;;  %v1546_v27 = vld [vmem:[#allocation11 + $0x5a8] sm:$0xff] }
 0x6ec   :  { %4313 = vmatprep.subr.bf16.mxu1 %v4312_v19  ;;  %v4326_v8 = vpack.c.bf16 %v1539_v7, %v1535_v23  ;;  %v4296_v35 = vpack.c.bf16 %v1546_v27, %v1542_v20  ;;  %v1541_v19 = vld [vmem:[#allocation11 + $0x580] sm:$0xff] }
 0x6ee   :  { %4283 = vmatpush1.bf16.msra.mxu0 %v4282_v21  ;;  %v1545_v21 = vld [vmem:[#allocation11 + $0x5a0] sm:$0xff] }
 0x6ef   :  { %4315 = vmatpush1.bf16.msra.mxu1 %v4314_v16  ;;  %4285 = vmatprep.subr.bf16.mxu0 %v4284_v54  ;;  %v4298_v14 = vpack.c.bf16 %v1545_v21, %v1541_v19  ;;  %v1543_v16 = vld [vmem:[#allocation11 + $0x590] sm:$0xff]  ;;  %v1554_v54 = vld [vmem:[#allocation11 + $0x5e8] sm:$0xff] }
 0x6f0   :  { %4317 = vmatprep.subr.bf16.mxu1 %v4316_v49  ;;  %v4330_v22 = vpack.c.bf16 %v1547_v62, %v1543_v16  ;;  %v4300_v31 = vpack.c.bf16 %v1554_v54, %v1550_v29  ;;  %v1549_v49 = vld [vmem:[#allocation11 + $0x5c0] sm:$0xff] }
 0x6f2   :  { %4287 = vmatpush1.bf16.msra.mxu0 %v4286_v57  ;;  %v1553_v57 = vld [vmem:[#allocation11 + $0x5e0] sm:$0xff] }
 0x6f3   :  { %4319 = vmatpush1.bf16.msra.mxu1 %v4318_v3  ;;  %4289 = vmatprep.subr.bf16.mxu0 %v4288_v15  ;;  %v4302_v63 = vpack.c.bf16 %v1553_v57, %v1549_v49  ;;  %v1551_v3 = vld [vmem:[#allocation11 + $0x5d0] sm:$0xff]  ;;  %v1389_v15 = vadd.f32 %v5471_v33, %v5402_v40 }
 0x6f4   :  { %4321 = vmatprep.subr.bf16.mxu1 %v4320_v38  ;;  %v4334_v9 = vpack.c.bf16 %v1555_v5, %v1551_v3  ;;  %v1390_v38 = vadd.f32 %v5469_v32, %v5408_v44  ;;  %v1440_v3 = vld [vmem:[#allocation13 + $0x180] sm:$0xff] }
 0x6f6   :  { %4291 = vmatpush1.bf16.msra.mxu0 %v4290_v42 }
 0x6f7   :  { %4323 = vmatpush1.bf16.msra.mxu1 %v4322_v56  ;;  %4293 = vmatprep.subr.bf16.mxu0 %v4292_v53 }
 0x6f8   :  { %4325 = vmatprep.subr.bf16.mxu1 %v4324_v4 }
 0x6fa   :  { %4295 = vmatpush1.bf16.msra.mxu0 %v4294_v6 }
 0x6fb   :  { %4327 = vmatpush1.bf16.msra.mxu1 %v4326_v8  ;;  %4297 = vmatprep.subr.bf16.mxu0 %v4296_v35 }
 0x6fc   :  { %4329 = vmatprep.subr.bf16.mxu1 %v4328_v13 }
 0x6fe   :  { %4299 = vmatpush1.bf16.msra.mxu0 %v4298_v14 }
 0x6ff   :  { %4331 = vmatpush1.bf16.msra.mxu1 %v4330_v22  ;;  %4301 = vmatprep.subr.bf16.mxu0 %v4300_v31 }
 0x700   :  { %4333 = vmatprep.subr.bf16.mxu1 %v4332_v61 }
 0x702   :  { %4303 = vmatpush1.bf16.msra.mxu0 %v4302_v63  ;;  %v1444_v63 = vld [vmem:[#allocation13 + $0x1a0] sm:$0xff] }
 0x703   :  { %4335 = vmatpush1.bf16.msra.mxu1 %v4334_v9  ;;  %v1443_v9 = vld [vmem:[#allocation13 + $0x198] sm:$0xff] }
 0x7b7   :  { %v1303_v11 = vpop.f32.mrb[14].mxu0 }
 0x7b8   :  { %v1304_v17 = vadd.f32 %v1303_v11, %v5405_v41  ;;  %v1305_v30 = vpop.f32.mrb[15].mxu0  ;;  %v3642_v36 = vpop.f32.mrb[16].mxu1  ;;  %v5539_v11 = vpack.c.bf16 %v1443_v9, %v1440_v3  ;;  %v1448_v9 = vld [vmem:[#allocation13 + $0x1c0] sm:$0xff] }
 0x7b9   :  { %v1306_v42 = vadd.f32 %v1305_v30, %v5411_v46  ;;  %v1380_v47 = vpop.f32.mrb[17].mxu1  ;;  %v1386_v13 = vadd.f32 %v3642_v36, %v5431_v0  ;;  %v1446_v30 = vld [vmem:[#allocation13 + $0x1b0] sm:$0xff] }
 0x7ba   :  { %v1395_v52 = vadd.f32 %v1389_v15, %v1304_v17  ;;  %v1381_v10 = vadd.f32 %v1380_v47, %v5431_v0  ;;  %v1447_v15 = vld [vmem:[#allocation13 + $0x1b8] sm:$0xff]  ;;  %v1450_v17 = vld [vmem:[#allocation13 + $0x1d0] sm:$0xff]  ;;  %v1453_v47 = vld [vmem:[#allocation13 + $0x1e8] sm:$0xff] }
 0x7bb   :  { %v1409_v56 = vadd.f32 %v1390_v38, %v1306_v42  ;;  %v1309_v60 = vpop.f32.mrb[16].mxu0  ;;  %v5542_v36 = vpack.c.bf16 %v1450_v17, %v1447_v15  ;;  %v1449_v38 = vld [vmem:[#allocation13 + $0x1c8] sm:$0xff]  ;;  %v1451_v15 = vld [vmem:[#allocation13 + $0x1d8] sm:$0xff] }
 0x7bc   :  { %v3230_v50 = vmul.f32 -1.442695, %v1395_v52  ;;  %v1310_v53 = vadd.f32 %v1309_v60, %v5405_v41  ;;  %v1311_v33 = vpop.f32.mrb[17].mxu0  ;;  %v5545_v42 = vpack.c.bf16 %v1449_v38, %v1446_v30  ;;  %v1456_v52 = vld [vmem:[#allocation13 + $0x200] sm:$0xff]  ;;  %v5600_v17 = vpack.c.bf16 %v1451_v15, %v1448_v9  ;;  %v1454_v30 = vld [vmem:[#allocation13 + $0x1f0] sm:$0xff]  ;;  %v1457_v38 = vld [vmem:[#allocation13 + $0x208] sm:$0xff] }
 0x7bd   :  { %v1312_v59 = vadd.f32 %v1311_v33, %v5411_v46  ;;  %v3232_v6 = vmul.f32 -1.442695, %v1409_v56  ;;  %v1391_v46 = vadd.f32 %v5473_v39, %v5428_v26  ;;  %v1452_v56 = vld [vmem:[#allocation13 + $0x1e0] sm:$0xff]  ;;  %v5548_v60 = vpack.c.bf16 %v1456_v52, %v1453_v47  ;;  %v1462_v33 = vld [vmem:[#allocation13 + $0x230] sm:$0xff] }
 0x7be   :  { %4775 = vpow2.f32 %v3230_v50  ;;  %v1396_v32 = vadd.f32 %v1392_v1, %v1310_v53  ;;  %v1455_v1 = vld [vmem:[#allocation13 + $0x1f8] sm:$0xff]  ;;  %v5602_v47 = vld [vmem:[#allocation5 + $0x8] sm:$0xff]  ;;  %v5608_v52 = vpack.c.bf16 %v1457_v38, %v1454_v30  ;;  %v2025_v9 = vld [vmem:[#allocation11 + $0x630] sm:$0xff] }
 0x7bf   :  { %v1410_v2 = vadd.f32 %v1393_v58, %v1312_v59  ;;  %v5551_v50 = vpack.c.bf16 %v1455_v1, %v1452_v56  ;;  %v1459_v53 = vld [vmem:[#allocation13 + $0x218] sm:$0xff]  ;;  %v1458_v58 = vld [vmem:[#allocation13 + $0x210] sm:$0xff]  ;;  %v1460_v56 = vld [vmem:[#allocation13 + $0x220] sm:$0xff] }
 0x7c0   :  { %v3231_v4 = vmul.f32 -1.442695, %v1396_v32  ;;  %v5554_v59 = vpack.c.bf16 %v1462_v33, %v1459_v53  ;;  %v1461_v32 = vld [vmem:[#allocation13 + $0x228] sm:$0xff]  ;;  %v1463_v1 = vld [vmem:[#allocation13 + $0x238] sm:$0xff]  ;;  %v1466_v33 = vld [vmem:[#allocation13 + $0x250] sm:$0xff] }
 0x7c1   :  { %v3233_v23 = vmul.f32 -1.442695, %v1410_v2  ;;  %v5557_v2 = vpack.c.bf16 %v1461_v32, %v1458_v58  ;;  %v5612_v53 = vpack.c.bf16 %v1463_v1, %v1460_v56  ;;  %v1469_v58 = vld [vmem:[#allocation13 + $0x268] sm:$0xff]  ;;  %v2030_v56 = vld [vmem:[#allocation11 + $0x658] sm:$0xff] }
 0x7c2   :  { %4777 = vpow2.f32 %v3231_v4  ;;  %v1465_v4 = vld [vmem:[#allocation13 + $0x248] sm:$0xff]  ;;  %v5616_v32 = vpack.c.bf16 %v1469_v58, %v1466_v33  ;;  %v2034_v33 = vld [vmem:[#allocation11 + $0x678] sm:$0xff]  ;;  %v2027_v58 = vld [vmem:[#allocation11 + $0x640] sm:$0xff] }
 0x7c3   :  { %4779 = vpow2.f32 %v3232_v6  ;;  %v1468_v6 = vld [vmem:[#allocation13 + $0x260] sm:$0xff]  ;;  %v2028_v30 = vld [vmem:[#allocation11 + $0x648] sm:$0xff] }
 0x7c4   :  { %4781 = vpow2.f32 %v3233_v23  ;;  %v1464_v23 = vld [vmem:[#allocation13 + $0x240] sm:$0xff]  ;;  %v2032_v38 = vld [vmem:[#allocation11 + $0x668] sm:$0xff] }
 0x7c5   :  { %v4408_v1 = vpack.c.bf16 %v2032_v38, %v2028_v30  ;;  %v2046_v30 = vld [vmem:[#allocation11 + $0x6d8] sm:$0xff] }
 0x7c8   :  { %v4776_v7 = vpop.eup %4775 }
 0x7c9   :  { %v1403_v40 = vadd.f32 1.0, %v4776_v7  ;;  %v5560_v7 = vpack.c.bf16 %v1468_v6, %v1465_v4  ;;  %v1472_v4 = vld [vmem:[#allocation13 + $0x280] sm:$0xff]  ;;  %v1475_v6 = vld [vmem:[#allocation13 + $0x298] sm:$0xff] }
 0x7cb   :  { %4783 = vrcp.f32 %v1403_v40  ;;  %v1467_v40 = vld [vmem:[#allocation13 + $0x258] sm:$0xff] }
 0x7cc   :  { %v4778_v51 = vpop.eup %4777 }
 0x7cd   :  { %v1404_v41 = vadd.f32 1.0, %v4778_v51  ;;  %v4780_v8 = vpop.eup %4779  ;;  %v5563_v51 = vpack.c.bf16 %v1467_v40, %v1464_v23  ;;  %v5620_v23 = vpack.c.bf16 %v1475_v6, %v1472_v4  ;;  %v1478_v40 = vld [vmem:[#allocation13 + $0x2b0] sm:$0xff]  ;;  %v2031_v4 = vld [vmem:[#allocation11 + $0x660] sm:$0xff]  ;;  %v4440_v6 = vpack.c.bf16 %v2034_v33, %v2030_v56  ;;  %v2050_v56 = vld [vmem:[#allocation11 + $0x6f8] sm:$0xff] }
 0x7ce   :  { %v4782_v20 = vpop.eup %4781  ;;  %v1417_v44 = vadd.f32 1.0, %v4780_v8  ;;  %v1474_v8 = vld [vmem:[#allocation13 + $0x290] sm:$0xff]  ;;  %v2047_v33 = vld [vmem:[#allocation11 + $0x6e0] sm:$0xff] }
 0x7cf   :  { %4785 = vrcp.f32 %v1404_v41  ;;  %v1418_v27 = vadd.f32 1.0, %v4782_v20  ;;  %v1471_v41 = vld [vmem:[#allocation13 + $0x278] sm:$0xff]  ;;  %v1470_v20 = vld [vmem:[#allocation13 + $0x270] sm:$0xff] }
 0x7d0   :  { %4787 = vrcp.f32 %v1417_v44  ;;  %v5566_v44 = vpack.c.bf16 %v1474_v8, %v1471_v41  ;;  %v1481_v41 = vld [vmem:[#allocation13 + $0x2c8] sm:$0xff] }
 0x7d1   :  { %4789 = vrcp.f32 %v1418_v27  ;;  %v1477_v27 = vld [vmem:[#allocation13 + $0x2a8] sm:$0xff]  ;;  %v5624_v8 = vpack.c.bf16 %v1481_v41, %v1478_v40  ;;  %v4410_v40 = vpack.c.bf16 %v2031_v4, %v2027_v58  ;;  %v2029_v41 = vld [vmem:[#allocation11 + $0x650] sm:$0xff]  ;;  %v4448_v58 = vpack.c.bf16 %v2050_v56, %v2046_v30  ;;  %v2066_v30 = vld [vmem:[#allocation11 + $0x778] sm:$0xff] }
 0x7d2   :  { %v2063_v56 = vld [vmem:[#allocation11 + $0x760] sm:$0xff] }
 0x7d5   :  { %v4784_v45 = vpop.eup %4783 }
 0x7d6   :  { %v1423_v35 = vmul.f32 %v4784_v45, %v1391_v46  ;;  %v1473_v46 = vld [vmem:[#allocation13 + $0x288] sm:$0xff] }
 0x7d7   :  { %v5569_v45 = vpack.c.bf16 %v1473_v46, %v1470_v20  ;;  %v1484_v20 = vld [vmem:[#allocation13 + $0x2e0] sm:$0xff]  ;;  %v1487_v46 = vld [vmem:[#allocation13 + $0x2f8] sm:$0xff] }
 0x7d8   :  { %v1425_v19 = vadd.f32 %v1423_v35, %v1381_v10  ;;  %v1480_v10 = vld [vmem:[#allocation13 + $0x2c0] sm:$0xff] }
 0x7d9   :  { %v4786_v21 = vpop.eup %4785  ;;  %v1476_v35 = vld [vmem:[#allocation13 + $0x2a0] sm:$0xff] }
 0x7da   :  { %4791 = vtanh.f32 %v1425_v19  ;;  %v1424_v14 = vmul.f32 %v4786_v21, %v1394_v12  ;;  %v4788_v62 = vpop.eup %4787  ;;  %v5572_v12 = vpack.c.bf16 %v1480_v10, %v1477_v27  ;;  %v1479_v19 = vld [vmem:[#allocation13 + $0x2b8] sm:$0xff]  ;;  %v5628_v27 = vpack.c.bf16 %v1487_v46, %v1484_v20  ;;  %v2033_v20 = vld [vmem:[#allocation11 + $0x670] sm:$0xff] }
 0x7db   :  { %v4790_v39 = vpop.eup %4789  ;;  %v1429_v22 = vsub.f32 1.0, %v4788_v62  ;;  %v1433_v28 = vmul.f32 %v4788_v62, %v5440_v18  ;;  %v5532_v18 = vld [vmem:[#allocation5] sm:$0xff]  ;;  %v5575_v21 = vpack.c.bf16 %v1479_v19, %v1476_v35  ;;  %v2020_v19 = vld [vmem:[#allocation11 + $0x608] sm:$0xff]  ;;  %v4442_v46 = vpack.c.bf16 %v2033_v20, %v2029_v41 }
 0x7dc   :  { %v1426_v16 = vadd.f32 %v1424_v14, %v1386_v13  ;;  %v1430_v43 = vsub.f32 1.0, %v4790_v39  ;;  %v1434_v57 = vmul.f32 %v4790_v39, %v5447_v37  ;;  %v1441_v37 = vld [vmem:[#allocation13 + $0x188] sm:$0xff]  ;;  %v1483_v13 = vld [vmem:[#allocation13 + $0x2d8] sm:$0xff]  ;;  %v1486_v14 = vld [vmem:[#allocation13 + $0x2f0] sm:$0xff] }
 0x7dd   :  { %v5537_v5 = vpack.c.bf16 %v1444_v63, %v1441_v37  ;;  %v5578_v62 = vpack.c.bf16 %v1486_v14, %v1483_v13  ;;  %v1485_v39 = vld [vmem:[#allocation13 + $0x2e8] sm:$0xff]  ;;  %v2022_v14 = vld [vmem:[#allocation11 + $0x618] sm:$0xff] }
 0x7de   :  { %4793 = vtanh.f32 %v1426_v16  ;;  %v1482_v16 = vld [vmem:[#allocation13 + $0x2d0] sm:$0xff]  ;;  %v2024_v13 = vld [vmem:[#allocation11 + $0x628] sm:$0xff] }
 0x7df   :  { %4341 = vmatprep.subr.bf16.mxu1 %v5537_v5  ;;  %v2052_v20 = vld [vmem:[#allocation11 + $0x708] sm:$0xff] }
 0x7e4   :  { %v4792_v29 = vpop.eup %4791 }
 0x7e5   :  { %v1431_v54 = vmul.f32 %v4792_v29, %v1429_v22  ;;  %v5581_v22 = vpack.c.bf16 %v1485_v39, %v1482_v16  ;;  %v4404_v16 = vpack.c.bf16 %v2024_v13, %v2020_v19  ;;  %v2026_v39 = vld [vmem:[#allocation11 + $0x638] sm:$0xff] }
 0x7e6   :  { %v2038_v19 = vld [vmem:[#allocation11 + $0x698] sm:$0xff] }
 0x7e7   :  { %v1435_v31 = vadd.f32 %v1433_v28, %v1431_v54 }
 0x7e8   :  { %v4794_v49 = vpop.eup %4793 }
 0x7e9   :  { %v5521_v26 = vmax.f32 %v1435_v31, 0.0  ;;  %v1432_v55 = vmul.f32 %v4794_v49, %v1430_v43  ;;  %v1442_v43 = vld [vmem:[#allocation13 + $0x190] sm:$0xff]  ;;  %v1445_v49 = vld [vmem:[#allocation13 + $0x1a8] sm:$0xff] }
 0x7ea   :  { %v5597_v3 = vpack.c.bf16 %v1445_v49, %v1442_v43  ;;  %v2023_v43 = vld [vmem:[#allocation11 + $0x620] sm:$0xff]  ;;  %v4436_v49 = vpack.c.bf16 %v2026_v39, %v2022_v14  ;;  %v2042_v14 = vld [vmem:[#allocation11 + $0x6b8] sm:$0xff] }
 0x7eb   :  { %1622 = vmatmul.mubr.f32.vlgmr.msra.gmra.mrb[18].mxu0 %v5521_v26  ;;  %1699 = vmatmul.mubr.f32.vlgmr.msra.gmra.mrb[18].mxu1 %v5521_v26  ;;  %v1436_v0 = vadd.f32 %v1434_v57, %v1432_v55  ;;  %v2039_v39 = vld [vmem:[#allocation11 + $0x6a0] sm:$0xff] }
 0x7ec   :  { %1627 = vmatprep.mubr.f32.mxu0 %v5088_v25  ;;  %1704 = vmatprep.mubr.f32.mxu1 %v5088_v25 }
 0x7ed   :  { %v5528_v61 = vmax.f32 %v1436_v0, 0.0  ;;  %4343 = vmatpush1.bf16.msra.mxu1 %v5539_v11 }
 0x7ee   :  { %4345 = vmatprep.subr.bf16.mxu1 %v5542_v36 }
 0x7ef   :  { %1628 = vmatmul.mubr.f32.gmra.mrb[20].mxu0 %v5528_v61  ;;  %1705 = vmatmul.mubr.f32.gmra.mrb[20].mxu1 %v5528_v61 }
 0x7f0   :  { %3647 = vmatprep.mubr.msk.f32.mxu0 %vm629_vm0, %v5532_v18  ;;  %1866 = vmatprep.mubr.f32.mxu1 %v5088_v25 }
 0x7f1   :  { %4347 = vmatpush1.bf16.msra.mxu1 %v5545_v42 }
 0x7f2   :  { %4349 = vmatprep.subr.bf16.mxu1 %v5548_v60 }
 0x7f5   :  { %4351 = vmatpush1.bf16.msra.mxu1 %v5551_v50 }
 0x7f6   :  { %4353 = vmatprep.subr.bf16.mxu1 %v5554_v59 }
 0x7f9   :  { %4355 = vmatpush1.bf16.msra.mxu1 %v5557_v2 }
 0x7fa   :  { %4357 = vmatprep.subr.bf16.mxu1 %v5560_v7 }
 0x7fd   :  { %4359 = vmatpush1.bf16.msra.mxu1 %v5563_v51 }
 0x7fe   :  { %4361 = vmatprep.subr.bf16.mxu1 %v5566_v44 }
 0x801   :  { %4363 = vmatpush1.bf16.msra.mxu1 %v5569_v45 }
 0x802   :  { %4365 = vmatprep.subr.bf16.mxu1 %v5572_v12 }
 0x805   :  { %4367 = vmatpush1.bf16.msra.mxu1 %v5575_v21 }
 0x806   :  { %4369 = vmatprep.subr.bf16.mxu1 %v5578_v62 }
 0x809   :  { %4371 = vmatpush1.bf16.msra.mxu1 %v5581_v22 }
 0x80a   :  { %4405 = vmatprep.subr.bf16.mxu1 %v4404_v16  ;;  %v2035_v16 = vld [vmem:[#allocation11 + $0x680] sm:$0xff] }
 0x8be   :  { %v1623_v29 = vpop.f32.mrb[18].mxu0  ;;  %v5585_v54 = vpop.f32.mrb[18].mxu1 }
 0x8bf   :  { %v5587_v28 = vpop.f32.mrb[19].mxu0  ;;  %v5589_v31 = vpop.f32.mrb[19].mxu1 }
 0x8c2   :  { %v1629_v55 = vpop.f32.mrb[20].mxu0  ;;  %v5591_v57 = vpop.f32.mrb[20].mxu1 }
 0x8c3   :  { %v4336_v0 = vpack.c.bf16 %v1629_v55, %v1623_v29  ;;  %v5593_v37 = vpop.f32.mrb[21].mxu0  ;;  %v5595_v63 = vpop.f32.mrb[21].mxu1  ;;  %v2019_v29 = vld [vmem:[#allocation11 + $0x600] sm:$0xff] }
 0x8c4   :  { %v4406_v55 = vpack.c.bf16 %v2023_v43, %v2019_v29  ;;  %v4444_v29 = vpack.c.bf16 %v2042_v14, %v2038_v19  ;;  %v4414_v43 = vpack.c.bf16 %v2039_v39, %v2035_v16  ;;  %v2058_v19 = vld [vmem:[#allocation11 + $0x738] sm:$0xff]  ;;  %v2055_v14 = vld [vmem:[#allocation11 + $0x720] sm:$0xff] }
 0x8c5   :  { %4337 = vmatprep.subr.bf16.mxu0 %v4336_v0 }
 0x8c6   :  { %4339 = vmatpush3.bf16.msra.mxu0 %v4336_v0  ;;  %v2021_v0 = vld [vmem:[#allocation11 + $0x610] sm:$0xff] }
 0x8c7   :  { %4373 = vmatprep.subr.bf16.mxu0 %v5597_v3  ;;  %v4438_v15 = vpack.c.bf16 %v2025_v9, %v2021_v0  ;;  %v2044_v9 = vld [vmem:[#allocation11 + $0x6c8] sm:$0xff] }
 0x8c9   :  { %3648 = vmatmul.mubr.msk.f32.vlgmr.msra.gmra.mrb[22].mxu0 %vm629_vm0, %v5602_v47 }
 0x8ca   :  { %4375 = vmatpush3.bf16.msra.mxu0 %v5597_v3 }
 0x8cb   :  { %4377 = vmatprep.subr.bf16.mxu0 %v5600_v17 }
 0x8ce   :  { %4379 = vmatpush3.bf16.msra.mxu0 %v5600_v17 }
 0x8cf   :  { %4381 = vmatprep.subr.bf16.mxu0 %v5608_v52 }
 0x8d2   :  { %4383 = vmatpush3.bf16.msra.mxu0 %v5608_v52 }
 0x8d3   :  { %4385 = vmatprep.subr.bf16.mxu0 %v5612_v53 }
 0x8d6   :  { %4387 = vmatpush3.bf16.msra.mxu0 %v5612_v53 }
 0x8d7   :  { %4389 = vmatprep.subr.bf16.mxu0 %v5616_v32 }
 0x8da   :  { %4391 = vmatpush3.bf16.msra.mxu0 %v5616_v32 }
 0x8db   :  { %4393 = vmatprep.subr.bf16.mxu0 %v5620_v23 }
 0x8de   :  { %4395 = vmatpush3.bf16.msra.mxu0 %v5620_v23 }
 0x8df   :  { %4397 = vmatprep.subr.bf16.mxu0 %v5624_v8 }
 0x8e2   :  { %4399 = vmatpush3.bf16.msra.mxu0 %v5624_v8 }
 0x8e3   :  { %4401 = vmatprep.subr.bf16.mxu0 %v5628_v27 }
 0x8e6   :  { %4403 = vmatpush3.bf16.msra.mxu0 %v5628_v27 }
 0x8e7   :  { %4437 = vmatprep.subr.bf16.mxu0 %v4436_v49  ;;  %v2037_v49 = vld [vmem:[#allocation11 + $0x690] sm:$0xff] }
 0x99c   :  { %v3649_v10 = vpop.f32.mrb[22].mxu0 }
 0x99d   :  { %v1777_v35 = vpop.f32.mrb[23].mxu0 }
 0x99e   :  { %1867 = vmatmul.mubr.f32.vlgmr.msra.gmra.mrb[22].mxu1 %v1777_v35  ;;  %3682 = vmatprep.mubr.f32.mxu0 %v1777_v35  ;;  %v2040_v35 = vld [vmem:[#allocation11 + $0x6a8] sm:$0xff] }
 0x99f   :  { %3683 = vmatmul.mubr.f32.vlgmr.msra.gmra.mrb[24].mxu0 %v3649_v10  ;;  %1872 = vmatprep.mubr.f32.mxu1 %v5088_v25 }
 0x9a0   :  { %2224 = vmatprep.mubr.f32.mxu0 %v5088_v25  ;;  %4407 = vmatpush1.bf16.msra.mxu1 %v4406_v55  ;;  %v2041_v55 = vld [vmem:[#allocation11 + $0x6b0] sm:$0xff] }
 0x9a1   :  { %4439 = vmatpush1.bf16.msra.mxu0 %v4438_v15  ;;  %4409 = vmatprep.subr.bf16.mxu1 %v4408_v1  ;;  %v4446_v0 = vpack.c.bf16 %v2041_v55, %v2037_v49  ;;  %v2048_v15 = vld [vmem:[#allocation11 + $0x6e8] sm:$0xff]  ;;  %v2043_v1 = vld [vmem:[#allocation11 + $0x6c0] sm:$0xff] }
 0x9a2   :  { %1873 = vmatmul.mubr.f32.gmra.mrb[24].mxu1 %v3649_v10  ;;  %4441 = vmatprep.subr.bf16.mxu0 %v4440_v6  ;;  %v2036_v10 = vld [vmem:[#allocation11 + $0x688] sm:$0xff]  ;;  %v4416_v38 = vpack.c.bf16 %v2048_v15, %v2044_v9  ;;  %v4418_v4 = vpack.c.bf16 %v2047_v33, %v2043_v1  ;;  %v2045_v6 = vld [vmem:[#allocation11 + $0x6d0] sm:$0xff]  ;;  %v2062_v9 = vld [vmem:[#allocation11 + $0x758] sm:$0xff] }
 0x9a3   :  { %2147 = vmatprep.mubr.f32.mxu1 %v5088_v25  ;;  %v4412_v13 = vpack.c.bf16 %v2040_v35, %v2036_v10  ;;  %v2054_v10 = vld [vmem:[#allocation11 + $0x718] sm:$0xff]  ;;  %v2060_v55 = vld [vmem:[#allocation11 + $0x748] sm:$0xff]  ;;  %v4456_v1 = vpack.c.bf16 %v2066_v30, %v2062_v9 }
 0x9a4   :  { %4411 = vmatpush1.bf16.msra.mxu1 %v4410_v40  ;;  %v2049_v40 = vld [vmem:[#allocation11 + $0x6f0] sm:$0xff]  ;;  %v4452_v16 = vpack.c.bf16 %v2058_v19, %v2054_v10  ;;  %v2067_v19 = vld [vmem:[#allocation11 + $0x780] sm:$0xff]  ;;  %v2082_v9 = vld [vmem:[#allocation11 + $0x7f8] sm:$0xff] }
 0x9a5   :  { %4443 = vmatpush1.bf16.msra.mxu0 %v4442_v46  ;;  %4413 = vmatprep.subr.bf16.mxu1 %v4412_v13  ;;  %v4450_v41 = vpack.c.bf16 %v2049_v40, %v2045_v6  ;;  %v2056_v46 = vld [vmem:[#allocation11 + $0x728] sm:$0xff]  ;;  %v2051_v13 = vld [vmem:[#allocation11 + $0x700] sm:$0xff] }
 0x9a6   :  { %4445 = vmatprep.subr.bf16.mxu0 %v4444_v29  ;;  %v4420_v35 = vpack.c.bf16 %v2056_v46, %v2052_v20  ;;  %v4422_v39 = vpack.c.bf16 %v2055_v14, %v2051_v13  ;;  %v2053_v29 = vld [vmem:[#allocation11 + $0x710] sm:$0xff]  ;;  %v2068_v6 = vld [vmem:[#allocation11 + $0x788] sm:$0xff]  ;;  %v2070_v20 = vld [vmem:[#allocation11 + $0x798] sm:$0xff] }
 0x9a7   :  { %v2074_v46 = vld [vmem:[#allocation11 + $0x7b8] sm:$0xff]  ;;  %v2071_v13 = vld [vmem:[#allocation11 + $0x7a0] sm:$0xff]  ;;  %v2069_v14 = vld [vmem:[#allocation11 + $0x790] sm:$0xff] }
 0x9a8   :  { %4415 = vmatpush1.bf16.msra.mxu1 %v4414_v43  ;;  %v2057_v43 = vld [vmem:[#allocation11 + $0x730] sm:$0xff] }
 0x9a9   :  { %4447 = vmatpush1.bf16.msra.mxu0 %v4446_v0  ;;  %4417 = vmatprep.subr.bf16.mxu1 %v4416_v38  ;;  %v4454_v49 = vpack.c.bf16 %v2057_v43, %v2053_v29  ;;  %v2064_v0 = vld [vmem:[#allocation11 + $0x768] sm:$0xff]  ;;  %v2059_v38 = vld [vmem:[#allocation11 + $0x740] sm:$0xff] }
 0x9aa   :  { %4449 = vmatprep.subr.bf16.mxu0 %v4448_v58  ;;  %v4424_v15 = vpack.c.bf16 %v2064_v0, %v2060_v55  ;;  %v4426_v33 = vpack.c.bf16 %v2063_v56, %v2059_v38  ;;  %v2061_v58 = vld [vmem:[#allocation11 + $0x750] sm:$0xff]  ;;  %v2076_v29 = vld [vmem:[#allocation11 + $0x7c8] sm:$0xff]  ;;  %v2078_v0 = vld [vmem:[#allocation11 + $0x7d8] sm:$0xff] }
 0x9ab   :  { %v2080_v43 = vld [vmem:[#allocation11 + $0x7e8] sm:$0xff]  ;;  %v4464_v30 = vpack.c.bf16 %v2082_v9, %v2078_v0  ;;  %v2079_v38 = vld [vmem:[#allocation11 + $0x7e0] sm:$0xff]  ;;  %v2077_v56 = vld [vmem:[#allocation11 + $0x7d0] sm:$0xff] }
 0x9ac   :  { %4419 = vmatpush1.bf16.msra.mxu1 %v4418_v4  ;;  %v2065_v4 = vld [vmem:[#allocation11 + $0x770] sm:$0xff]  ;;  %v4432_v55 = vpack.c.bf16 %v2080_v43, %v2076_v29 }
 0x9ad   :  { %4451 = vmatpush1.bf16.msra.mxu0 %v4450_v41  ;;  %4421 = vmatprep.subr.bf16.mxu1 %v4420_v35  ;;  %v4458_v40 = vpack.c.bf16 %v2065_v4, %v2061_v58  ;;  %v2072_v41 = vld [vmem:[#allocation11 + $0x7a8] sm:$0xff]  ;;  %v4460_v35 = vpack.c.bf16 %v2074_v46, %v2070_v20 }
 0x9ae   :  { %4453 = vmatprep.subr.bf16.mxu0 %v4452_v16  ;;  %v4428_v10 = vpack.c.bf16 %v2072_v41, %v2068_v6  ;;  %v4430_v16 = vpack.c.bf16 %v2071_v13, %v2067_v19  ;;  %v1491_v4 = vld [vmem:[#allocation16 + $0x3] sm:$0x7]  ;;  %v1489_v6 = vld [vmem:[#allocation14 + $0x3] sm:$0x7] }
 0x9af   :  { %v5641_v41 = vrot.slane %v1489_v6, %v5397_v24  ;;  %v5644_v20 = vrot.slane %v1491_v4, %v5399_v34  ;;  %v5647_v46 = vrot.slane %v1489_v6, %v5399_v34 }
 0x9b0   :  { %4423 = vmatpush1.bf16.msra.mxu1 %v4422_v39  ;;  %v2073_v39 = vld [vmem:[#allocation11 + $0x7b0] sm:$0xff] }
 0x9b1   :  { %4455 = vmatpush1.bf16.msra.mxu0 %v4454_v49  ;;  %4425 = vmatprep.subr.bf16.mxu1 %v4424_v15  ;;  %v4462_v49 = vpack.c.bf16 %v2073_v39, %v2069_v14  ;;  %v2075_v15 = vld [vmem:[#allocation11 + $0x7c0] sm:$0xff]  ;;  %v1971_v14 = vadd.f32 %v5644_v20, %v5585_v54  ;;  %v1974_v0 = vadd.f32 %v5644_v20, %v5591_v57 }
 0x9b2   :  { %4457 = vmatprep.subr.bf16.mxu0 %v4456_v1  ;;  %v2081_v1 = vld [vmem:[#allocation11 + $0x7f0] sm:$0xff]  ;;  %v5662_v57 = vrot.slane %v1491_v4, %v5425_v48 }
 0x9b3   :  { %v4466_v58 = vpack.c.bf16 %v2081_v1, %v2077_v56 }
 0x9b4   :  { %4427 = vmatpush1.bf16.msra.mxu1 %v4426_v33  ;;  %v4434_v33 = vpack.c.bf16 %v2079_v38, %v2075_v15 }
 0x9b5   :  { %4459 = vmatpush1.bf16.msra.mxu0 %v4458_v40  ;;  %4429 = vmatprep.subr.bf16.mxu1 %v4428_v10  ;;  %v5638_v40 = vrot.slane %v1491_v4, %v5397_v24 }
 0x9b6   :  { %4461 = vmatprep.subr.bf16.mxu0 %v4460_v35 }
 0x9b7   :  { %v1970_v35 = vadd.f32 %v5638_v40, %v5587_v28  ;;  %v1973_v34 = vadd.f32 %v5638_v40, %v5593_v37 }
 0x9b8   :  { %4431 = vmatpush1.bf16.msra.mxu1 %v4430_v16 }
 0x9b9   :  { %4463 = vmatpush1.bf16.msra.mxu0 %v4462_v49  ;;  %4433 = vmatprep.subr.bf16.mxu1 %v4432_v55 }
 0x9ba   :  { %4465 = vmatprep.subr.bf16.mxu0 %v4464_v30 }
 0x9bc   :  { %4435 = vmatpush1.bf16.msra.mxu1 %v4434_v33 }
 0x9bd   :  { %4467 = vmatpush1.bf16.msra.mxu0 %v4466_v58 }
 0x9be   :  { %4473 = vmatprep.subr.bf16.mxu0 %v5537_v5 }
 0xa71   :  { %v1868_v10 = vpop.f32.mrb[22].mxu1 }
 0xa72   :  { %v1869_v5 = vadd.f32 %v1868_v10, %v5641_v41  ;;  %v1870_v19 = vpop.f32.mrb[23].mxu1  ;;  %v3684_v13 = vpop.f32.mrb[24].mxu0 }
 0xa73   :  { %v1871_v24 = vadd.f32 %v1870_v19, %v5647_v46  ;;  %v1945_v16 = vpop.f32.mrb[25].mxu0  ;;  %v5665_v19 = vrot.slane %v1489_v6, %v5425_v48 }
 0xa74   :  { %v1976_v39 = vadd.f32 %v1970_v35, %v1869_v5 }
 0xa75   :  { %v1990_v29 = vadd.f32 %v1971_v14, %v1871_v24  ;;  %v1874_v43 = vpop.f32.mrb[24].mxu1  ;;  %v1972_v14 = vadd.f32 %v5662_v57, %v5589_v31 }
 0xa76   :  { %v3236_v49 = vmul.f32 -1.442695, %v1976_v39  ;;  %v1875_v55 = vadd.f32 %v1874_v43, %v5641_v41  ;;  %v1876_v28 = vpop.f32.mrb[25].mxu1 }
 0xa77   :  { %v1877_v9 = vadd.f32 %v1876_v28, %v5647_v46  ;;  %v3238_v38 = vmul.f32 -1.442695, %v1990_v29  ;;  %v1946_v29 = vadd.f32 %v1945_v16, %v5665_v19 }
 0xa78   :  { %4795 = vpow2.f32 %v3236_v49  ;;  %v1977_v54 = vadd.f32 %v1973_v34, %v1875_v55  ;;  %v1975_v34 = vadd.f32 %v5662_v57, %v5595_v63  ;;  %v1951_v55 = vadd.f32 %v3684_v13, %v5665_v19 }
 0xa79   :  { %v1991_v15 = vadd.f32 %v1974_v0, %v1877_v9 }
 0xa7a   :  { %v3237_v30 = vmul.f32 -1.442695, %v1977_v54 }
 0xa7b   :  { %v3239_v56 = vmul.f32 -1.442695, %v1991_v15 }
 0xa7c   :  { %4797 = vpow2.f32 %v3237_v30 }
 0xa7d   :  { %4799 = vpow2.f32 %v3238_v38 }
 0xa7e   :  { %4801 = vpow2.f32 %v3239_v56 }
 0xa82   :  { %v4796_v1 = vpop.eup %4795 }
 0xa83   :  { %v1984_v37 = vadd.f32 1.0, %v4796_v1  ;;  %v2527_v1 = vld [vmem:[#allocation8 + $0x160] sm:$0xff] }
 0xa85   :  { %4803 = vrcp.f32 %v1984_v37 }
 0xa86   :  { %v4798_v33 = vpop.eup %4797 }
 0xa87   :  { %v1985_v58 = vadd.f32 1.0, %v4798_v33  ;;  %v4800_v10 = vpop.eup %4799  ;;  %v2528_v33 = vld [vmem:[#allocation8 + $0x168] sm:$0xff] }
 0xa88   :  { %v4802_v35 = vpop.eup %4801  ;;  %v1998_v5 = vadd.f32 1.0, %v4800_v10  ;;  %v2529_v10 = vld [vmem:[#allocation8 + $0x170] sm:$0xff] }
 0xa89   :  { %4805 = vrcp.f32 %v1985_v58  ;;  %v1999_v39 = vadd.f32 1.0, %v4802_v35  ;;  %v4560_v58 = vpack.c.bf16 %v2528_v33, %v2527_v1  ;;  %v2530_v35 = vld [vmem:[#allocation8 + $0x178] sm:$0xff] }
 0xa8a   :  { %4807 = vrcp.f32 %v1998_v5  ;;  %v4564_v5 = vpack.c.bf16 %v2530_v35, %v2529_v10 }
 0xa8b   :  { %4809 = vrcp.f32 %v1999_v39  ;;  %v2619_v39 = vld [vmem:[#allocation8 + $0x190] sm:$0xff] }
 0xa8f   :  { %v4804_v24 = vpop.eup %4803 }
 0xa90   :  { %v2004_v43 = vmul.f32 %v4804_v24, %v1972_v14  ;;  %v2617_v14 = vld [vmem:[#allocation8 + $0x180] sm:$0xff]  ;;  %v2618_v24 = vld [vmem:[#allocation8 + $0x188] sm:$0xff] }
 0xa92   :  { %v2006_v49 = vadd.f32 %v2004_v43, %v1946_v29  ;;  %v4568_v29 = vpack.c.bf16 %v2618_v24, %v2617_v14  ;;  %v2620_v43 = vld [vmem:[#allocation8 + $0x198] sm:$0xff] }
 0xa93   :  { %v4806_v4 = vpop.eup %4805 }
 0xa94   :  { %4811 = vtanh.f32 %v2006_v49  ;;  %v2005_v48 = vmul.f32 %v4806_v4, %v1975_v34  ;;  %v4808_v28 = vpop.eup %4807  ;;  %v4572_v34 = vpack.c.bf16 %v2620_v43, %v2619_v39  ;;  %v2621_v49 = vld [vmem:[#allocation8 + $0x1a0] sm:$0xff]  ;;  %v2622_v4 = vld [vmem:[#allocation8 + $0x1a8] sm:$0xff] }
 0xa95   :  { %v4810_v31 = vpop.eup %4809  ;;  %v2010_v0 = vsub.f32 1.0, %v4808_v28  ;;  %v2014_v16 = vmul.f32 %v4808_v28, %v5521_v26 }
 0xa96   :  { %v2007_v6 = vadd.f32 %v2005_v48, %v1951_v55  ;;  %v2011_v30 = vsub.f32 1.0, %v4810_v31  ;;  %v2015_v38 = vmul.f32 %v4810_v31, %v5528_v61  ;;  %v4576_v55 = vpack.c.bf16 %v2622_v4, %v2621_v49  ;;  %v2623_v48 = vld [vmem:[#allocation8 + $0x1b0] sm:$0xff]  ;;  %v2625_v31 = vld [vmem:[#allocation8 + $0x1c0] sm:$0xff] }
 0xa98   :  { %4813 = vtanh.f32 %v2007_v6  ;;  %v2624_v6 = vld [vmem:[#allocation8 + $0x1b8] sm:$0xff] }
 0xa99   :  { %v4580_v28 = vpack.c.bf16 %v2624_v6, %v2623_v48 }
 0xa9e   :  { %v4812_v9 = vpop.eup %4811 }
 0xa9f   :  { %v2012_v54 = vmul.f32 %v4812_v9, %v2010_v0  ;;  %v2626_v0 = vld [vmem:[#allocation8 + $0x1c8] sm:$0xff] }
 0xaa0   :  { %v4584_v9 = vpack.c.bf16 %v2626_v0, %v2625_v31  ;;  %v2631_v0 = vld [vmem:[#allocation8 + $0x1f0] sm:$0xff] }
 0xaa1   :  { %v5674_v15 = vadd.f32 %v2014_v16, %v2012_v54  ;;  %v2627_v54 = vld [vmem:[#allocation8 + $0x1d0] sm:$0xff]  ;;  %v2628_v16 = vld [vmem:[#allocation8 + $0x1d8] sm:$0xff] }
 0xaa2   :  { %v4814_v63 = vpop.eup %4813 }
 0xaa3   :  { %2148 = vmatmul.mubr.f32.vlgmr.msra.gmra.mrb[26].mxu1 %v5674_v15  ;;  %2225 = vmatmul.mubr.f32.vlgmr.msra.gmra.mrb[26].mxu0 %v5674_v15  ;;  %v2013_v13 = vmul.f32 %v4814_v63, %v2011_v30  ;;  %v4588_v30 = vpack.c.bf16 %v2628_v16, %v2627_v54  ;;  %v2629_v63 = vld [vmem:[#allocation8 + $0x1e0] sm:$0xff] }
 0xaa4   :  { %2153 = vmatprep.mubr.f32.mxu1 %v5088_v25  ;;  %2230 = vmatprep.mubr.f32.mxu0 %v5088_v25  ;;  %v3246_v16 = vld [vmem:[#allocation10 + $0x2] ss:$0 sm:$0xff] }
 0xaa5   :  { %v5681_v56 = vadd.f32 %v2015_v38, %v2013_v13  ;;  %4475 = vmatpush1.bf16.msra.mxu0 %v5539_v11  ;;  %v2630_v13 = vld [vmem:[#allocation8 + $0x1e8] sm:$0xff] }
 0xaa6   :  { %4477 = vmatprep.subr.bf16.mxu0 %v5542_v36  ;;  %v4592_v38 = vpack.c.bf16 %v2630_v13, %v2629_v63 }
 0xaa7   :  { %2154 = vmatmul.mubr.f32.gmra.mrb[28].mxu1 %v5681_v56  ;;  %2231 = vmatmul.mubr.f32.gmra.mrb[28].mxu0 %v5681_v56 }
 0xaa8   :  { %3689 = vmatprep.mubr.msk.f32.mxu1 %vm629_vm0, %v5532_v18  ;;  %2376 = vmatprep.mubr.f32.mxu0 %v5088_v25 }
 0xaa9   :  { %4479 = vmatpush1.bf16.msra.mxu0 %v5545_v42 }
 0xaaa   :  { %4481 = vmatprep.subr.bf16.mxu0 %v5548_v60 }
 0xaad   :  { %4483 = vmatpush1.bf16.msra.mxu0 %v5551_v50 }
 0xaae   :  { %4485 = vmatprep.subr.bf16.mxu0 %v5554_v59 }
 0xab1   :  { %4487 = vmatpush1.bf16.msra.mxu0 %v5557_v2 }
 0xab2   :  { %4489 = vmatprep.subr.bf16.mxu0 %v5560_v7 }
 0xab5   :  { %4491 = vmatpush1.bf16.msra.mxu0 %v5563_v51  ;;  %v2515_v51 = vld [vmem:[#allocation8 + $0x100] sm:$0xff] }
 0xab6   :  { %4493 = vmatprep.subr.bf16.mxu0 %v5566_v44  ;;  %v2516_v44 = vld [vmem:[#allocation8 + $0x108] sm:$0xff] }
 0xab9   :  { %4495 = vmatpush1.bf16.msra.mxu0 %v5569_v45  ;;  %v4536_v45 = vpack.c.bf16 %v2516_v44, %v2515_v51 }
 0xaba   :  { %4497 = vmatprep.subr.bf16.mxu0 %v5572_v12  ;;  %v2517_v12 = vld [vmem:[#allocation8 + $0x110] sm:$0xff] }
 0xabd   :  { %4499 = vmatpush1.bf16.msra.mxu0 %v5575_v21  ;;  %v2518_v21 = vld [vmem:[#allocation8 + $0x118] sm:$0xff] }
 0xabe   :  { %4501 = vmatprep.subr.bf16.mxu0 %v5578_v62  ;;  %v4540_v62 = vpack.c.bf16 %v2518_v21, %v2517_v12 }
 0xac1   :  { %4503 = vmatpush1.bf16.msra.mxu0 %v5581_v22  ;;  %v2519_v22 = vld [vmem:[#allocation8 + $0x120] sm:$0xff] }
 0xac2   :  { %4537 = vmatprep.subr.bf16.mxu0 %v4536_v45 }
 0xb76   :  { %v2149_v26 = vpop.f32.mrb[26].mxu1  ;;  %v5703_v61 = vpop.f32.mrb[26].mxu0 }
 0xb77   :  { %v5705_v18 = vpop.f32.mrb[27].mxu1  ;;  %v5707_v11 = vpop.f32.mrb[27].mxu0  ;;  %v2465_v51 = vadd.f32 %v5703_v61, %v5644_v20 }
 0xb7a   :  { %v2155_v36 = vpop.f32.mrb[28].mxu1  ;;  %v5709_v42 = vpop.f32.mrb[28].mxu0 }
 0xb7b   :  { %v4468_v60 = vpack.c.bf16 %v2155_v36, %v2149_v26  ;;  %v5711_v50 = vpop.f32.mrb[29].mxu1  ;;  %v5713_v59 = vpop.f32.mrb[29].mxu0  ;;  %v2464_v36 = vadd.f32 %v5705_v18, %v5638_v40 }
 0xb7c   :  { %v2469_v10 = vadd.f32 %v5713_v59, %v5662_v57 }
 0xb7d   :  { %4469 = vmatprep.subr.bf16.mxu1 %v4468_v60 }
 0xb7e   :  { %4471 = vmatpush3.bf16.msra.mxu1 %v4468_v60 }
 0xb7f   :  { %4505 = vmatprep.subr.bf16.mxu1 %v5597_v3 }
 0xb81   :  { %3690 = vmatmul.mubr.msk.f32.vlgmr.msra.gmra.mrb[30].mxu1 %vm629_vm0, %v5602_v47  ;;  %v2521_v47 = vld [vmem:[#allocation8 + $0x130] sm:$0xff] }
 0xb82   :  { %4507 = vmatpush3.bf16.msra.mxu1 %v5597_v3  ;;  %v2520_v3 = vld [vmem:[#allocation8 + $0x128] sm:$0xff] }
 0xb83   :  { %4509 = vmatprep.subr.bf16.mxu1 %v5600_v17 }
 0xb86   :  { %4511 = vmatpush3.bf16.msra.mxu1 %v5600_v17  ;;  %v4544_v17 = vpack.c.bf16 %v2520_v3, %v2519_v22  ;;  %v2467_v22 = vadd.f32 %v5711_v50, %v5638_v40 }
 0xb87   :  { %4513 = vmatprep.subr.bf16.mxu1 %v5608_v52 }
 0xb8a   :  { %4515 = vmatpush3.bf16.msra.mxu1 %v5608_v52  ;;  %v2522_v52 = vld [vmem:[#allocation8 + $0x138] sm:$0xff] }
 0xb8b   :  { %4517 = vmatprep.subr.bf16.mxu1 %v5612_v53 }
 0xb8e   :  { %4519 = vmatpush3.bf16.msra.mxu1 %v5612_v53  ;;  %v4548_v53 = vpack.c.bf16 %v2522_v52, %v2521_v47  ;;  %v2468_v47 = vadd.f32 %v5709_v42, %v5644_v20 }
 0xb8f   :  { %4521 = vmatprep.subr.bf16.mxu1 %v5616_v32 }
 0xb92   :  { %4523 = vmatpush3.bf16.msra.mxu1 %v5616_v32  ;;  %v2524_v32 = vld [vmem:[#allocation8 + $0x148] sm:$0xff] }
 0xb93   :  { %4525 = vmatprep.subr.bf16.mxu1 %v5620_v23 }
 0xb96   :  { %4527 = vmatpush3.bf16.msra.mxu1 %v5620_v23 }
 0xb97   :  { %4529 = vmatprep.subr.bf16.mxu1 %v5624_v8 }
 0xb9a   :  { %4531 = vmatpush3.bf16.msra.mxu1 %v5624_v8  ;;  %v2525_v8 = vld [vmem:[#allocation8 + $0x150] sm:$0xff] }
 0xb9b   :  { %4533 = vmatprep.subr.bf16.mxu1 %v5628_v27 }
 0xb9e   :  { %4535 = vmatpush3.bf16.msra.mxu1 %v5628_v27  ;;  %v2526_v27 = vld [vmem:[#allocation8 + $0x158] sm:$0xff] }
 0xb9f   :  { %v4556_v37 = vpack.c.bf16 %v2526_v27, %v2525_v8  ;;  %4569 = vmatprep.subr.bf16.mxu1 %v4568_v29 }
 0xc54   :  { %v3691_v2 = vpop.f32.mrb[30].mxu1 }
 0xc55   :  { %v2303_v7 = vpop.f32.mrb[31].mxu1 }
 0xc56   :  { %2377 = vmatmul.mubr.f32.vlgmr.msra.gmra.mrb[30].mxu0 %v2303_v7  ;;  %3724 = vmatprep.mubr.f32.mxu1 %v2303_v7 }
 0xc57   :  { %3725 = vmatmul.mubr.f32.vlgmr.msra.gmra.mrb[32].mxu1 %v3691_v2  ;;  %2382 = vmatprep.mubr.f32.mxu0 %v5088_v25  ;;  %v2523_v25 = vld [vmem:[#allocation8 + $0x140] sm:$0xff] }
 0xc58   :  { %4539 = vmatpush3.bf16.msra.mxu0 %v4536_v45  ;;  %v4552_v23 = vpack.c.bf16 %v2524_v32, %v2523_v25  ;;  %4571 = vmatpush3.bf16.msra.mxu1 %v4568_v29 }
 0xc59   :  { %4541 = vmatprep.subr.bf16.mxu0 %v4540_v62  ;;  %4573 = vmatprep.subr.bf16.mxu1 %v4572_v34 }
 0xc5a   :  { %2383 = vmatmul.mubr.f32.gmra.mrb[32].mxu0 %v3691_v2 }
 0xc5c   :  { %4543 = vmatpush3.bf16.msra.mxu0 %v4540_v62  ;;  %4575 = vmatpush3.bf16.msra.mxu1 %v4572_v34 }
 0xc5d   :  { %4545 = vmatprep.subr.bf16.mxu0 %v4544_v17  ;;  %4577 = vmatprep.subr.bf16.mxu1 %v4576_v55 }
 0xc60   :  { %4547 = vmatpush3.bf16.msra.mxu0 %v4544_v17  ;;  %4579 = vmatpush3.bf16.msra.mxu1 %v4576_v55 }
 0xc61   :  { %4549 = vmatprep.subr.bf16.mxu0 %v4548_v53  ;;  %4581 = vmatprep.subr.bf16.mxu1 %v4580_v28 }
 0xc64   :  { %4551 = vmatpush3.bf16.msra.mxu0 %v4548_v53  ;;  %4583 = vmatpush3.bf16.msra.mxu1 %v4580_v28 }
 0xc65   :  { %4553 = vmatprep.subr.bf16.mxu0 %v4552_v23  ;;  %4585 = vmatprep.subr.bf16.mxu1 %v4584_v9 }
 0xc68   :  { %4555 = vmatpush3.bf16.msra.mxu0 %v4552_v23  ;;  %4587 = vmatpush3.bf16.msra.mxu1 %v4584_v9  ;;  %v2632_v9 = vld [vmem:[#allocation8 + $0x1f8] sm:$0xff] }
 0xc69   :  { %4557 = vmatprep.subr.bf16.mxu0 %v4556_v37  ;;  %4589 = vmatprep.subr.bf16.mxu1 %v4588_v30  ;;  %v4596_v54 = vpack.c.bf16 %v2632_v9, %v2631_v0  ;;  %v3009_v0 = vld [vmem:[#allocation8 + $0x368] sm:$0xff] }
 0xc6c   :  { %4559 = vmatpush3.bf16.msra.mxu0 %v4556_v37  ;;  %4591 = vmatpush3.bf16.msra.mxu1 %v4588_v30 }
 0xc6d   :  { %4561 = vmatprep.subr.bf16.mxu0 %v4560_v58  ;;  %4593 = vmatprep.subr.bf16.mxu1 %v4592_v38 }
 0xc70   :  { %4563 = vmatpush3.bf16.msra.mxu0 %v4560_v58  ;;  %4595 = vmatpush3.bf16.msra.mxu1 %v4592_v38 }
 0xc71   :  { %4565 = vmatprep.subr.bf16.mxu0 %v4564_v5  ;;  %4597 = vmatprep.subr.bf16.mxu1 %v4596_v54 }
 0xc74   :  { %4567 = vmatpush3.bf16.msra.mxu0 %v4564_v5  ;;  %4599 = vmatpush3.bf16.msra.mxu1 %v4596_v54  ;;  %v2802_v54 = vld [vmem:[#allocation8 + $0x210] sm:$0xff] }
 0xd29   :  { %v2378_v26 = vpop.f32.mrb[30].mxu0 }
 0xd2a   :  { %v2379_v60 = vadd.f32 %v2378_v26, %v5641_v41  ;;  %v2380_v2 = vpop.f32.mrb[31].mxu0  ;;  %v3726_v7 = vpop.f32.mrb[32].mxu1 }
 0xd2b   :  { %v2381_v44 = vadd.f32 %v2380_v2, %v5647_v46  ;;  %v2455_v45 = vpop.f32.mrb[33].mxu1  ;;  %v2461_v14 = vadd.f32 %v3726_v7, %v5665_v19  ;;  %v2819_v2 = vld [vmem:[#allocation8 + $0x290] sm:$0xff] }
 0xd2c   :  { %v2470_v12 = vadd.f32 %v2464_v36, %v2379_v60  ;;  %v2456_v33 = vadd.f32 %v2455_v45, %v5665_v19  ;;  %v2716_v36 = vld [vmem:[#allocation7] sm:$0xff]  ;;  %v2818_v60 = vld [vmem:[#allocation8 + $0x288] sm:$0xff]  ;;  %v2821_v45 = vld [vmem:[#allocation8 + $0x2a0] sm:$0xff] }
 0xd2d   :  { %v2484_v21 = vadd.f32 %v2465_v51, %v2381_v44  ;;  %v2384_v62 = vpop.f32.mrb[32].mxu0  ;;  %v2820_v51 = vld [vmem:[#allocation8 + $0x298] sm:$0xff] }
 0xd2e   :  { %v3242_v3 = vmul.f32 -1.442695, %v2470_v12  ;;  %v2385_v17 = vadd.f32 %v2384_v62, %v5641_v41  ;;  %v2386_v18 = vpop.f32.mrb[33].mxu0  ;;  %v4608_v44 = vpack.c.bf16 %v2820_v51, %v2819_v2  ;;  %v2822_v12 = vld [vmem:[#allocation8 + $0x2a8] sm:$0xff]  ;;  %v2823_v62 = vld [vmem:[#allocation8 + $0x2b0] sm:$0xff]  ;;  %v2808_v2 = vld [vmem:[#allocation8 + $0x240] sm:$0xff] }
 0xd2f   :  { %v2387_v52 = vadd.f32 %v2386_v18, %v5647_v46  ;;  %v3244_v32 = vmul.f32 -1.442695, %v2484_v21  ;;  %v2466_v46 = vadd.f32 %v5707_v11, %v5662_v57  ;;  %v4612_v21 = vpack.c.bf16 %v2822_v12, %v2821_v45  ;;  %v2826_v18 = vld [vmem:[#allocation8 + $0x2c8] sm:$0xff]  ;;  %v2811_v45 = vld [vmem:[#allocation8 + $0x258] sm:$0xff] }
 0xd30   :  { %4815 = vpow2.f32 %v3242_v3  ;;  %v2471_v61 = vadd.f32 %v2467_v22, %v2385_v17  ;;  %v2824_v22 = vld [vmem:[#allocation8 + $0x2b8] sm:$0xff]  ;;  %v2825_v17 = vld [vmem:[#allocation8 + $0x2c0] sm:$0xff] }
 0xd31   :  { %v2485_v53 = vadd.f32 %v2468_v47, %v2387_v52  ;;  %v4616_v3 = vpack.c.bf16 %v2824_v22, %v2823_v62  ;;  %v4620_v47 = vpack.c.bf16 %v2826_v18, %v2825_v17  ;;  %v2827_v52 = vld [vmem:[#allocation8 + $0x2d0] sm:$0xff]  ;;  %v2813_v62 = vld [vmem:[#allocation8 + $0x268] sm:$0xff]  ;;  %v2815_v17 = vld [vmem:[#allocation8 + $0x278] sm:$0xff] }
 0xd32   :  { %v3243_v25 = vmul.f32 -1.442695, %v2471_v61  ;;  %v2828_v61 = vld [vmem:[#allocation8 + $0x2d8] sm:$0xff] }
 0xd33   :  { %v3245_v23 = vmul.f32 -1.442695, %v2485_v53  ;;  %v4624_v53 = vpack.c.bf16 %v2828_v61, %v2827_v52  ;;  %v3011_v52 = vld [vmem:[#allocation8 + $0x378] sm:$0xff] }
 0xd34   :  { %4817 = vpow2.f32 %v3243_v25  ;;  %v2829_v25 = vld [vmem:[#allocation8 + $0x2e0] sm:$0xff] }
 0xd35   :  { %4819 = vpow2.f32 %v3244_v32  ;;  %v2830_v32 = vld [vmem:[#allocation8 + $0x2e8] sm:$0xff] }
 0xd36   :  { %4821 = vpow2.f32 %v3245_v23  ;;  %v4628_v23 = vpack.c.bf16 %v2830_v32, %v2829_v25  ;;  %v3099_v25 = vld [vmem:[#allocation8 + $0x388] sm:$0xff] }
 0xd3a   :  { %v4816_v8 = vpop.eup %4815 }
 0xd3b   :  { %v2478_v40 = vadd.f32 1.0, %v4816_v8  ;;  %v2831_v8 = vld [vmem:[#allocation8 + $0x2f0] sm:$0xff] }
 0xd3d   :  { %4823 = vrcp.f32 %v2478_v40  ;;  %v2832_v40 = vld [vmem:[#allocation8 + $0x2f8] sm:$0xff] }
 0xd3e   :  { %v4818_v50 = vpop.eup %4817 }
 0xd3f   :  { %v2479_v41 = vadd.f32 1.0, %v4818_v50  ;;  %v4820_v27 = vpop.eup %4819  ;;  %v4632_v50 = vpack.c.bf16 %v2832_v40, %v2831_v8 }
 0xd40   :  { %v4822_v1 = vpop.eup %4821  ;;  %v2492_v20 = vadd.f32 1.0, %v4820_v27 }
 0xd41   :  { %4825 = vrcp.f32 %v2479_v41  ;;  %v2493_v37 = vadd.f32 1.0, %v4822_v1  ;;  %v3247_v41 = vld [vmem:[#allocation10 + $0x3] ss:$0 sm:$0xff] }
 0xd42   :  { %4827 = vrcp.f32 %v2492_v20 }
 0xd43   :  { %4829 = vrcp.f32 %v2493_v37  ;;  %v2717_v37 = vld [vmem:[#allocation7 + $0x8] sm:$0xff] }
 0xd47   :  { %v4824_v42 = vpop.eup %4823 }
 0xd48   :  { %v2498_v58 = vmul.f32 %v4824_v42, %v2466_v46 }
 0xd4a   :  { %v2500_v35 = vadd.f32 %v2498_v58, %v2456_v33  ;;  %v2800_v33 = vld [vmem:[#allocation8 + $0x200] sm:$0xff]  ;;  %v2801_v58 = vld [vmem:[#allocation8 + $0x208] sm:$0xff] }
 0xd4b   :  { %v4826_v5 = vpop.eup %4825 }
 0xd4c   :  { %4831 = vtanh.f32 %v2500_v35  ;;  %v2499_v24 = vmul.f32 %v4826_v5, %v2469_v10  ;;  %v4828_v29 = vpop.eup %4827  ;;  %v4636_v10 = vpack.c.bf16 %v2801_v58, %v2800_v33  ;;  %v2996_v35 = vld [vmem:[#allocation8 + $0x300] sm:$0xff]  ;;  %v2997_v5 = vld [vmem:[#allocation8 + $0x308] sm:$0xff] }
 0xd4d   :  { %v4830_v11 = vpop.eup %4829  ;;  %v2504_v43 = vsub.f32 1.0, %v4828_v29  ;;  %v2508_v4 = vmul.f32 %v4828_v29, %v5674_v15  ;;  %v3103_v33 = vld [vmem:[#allocation8 + $0x3a8] sm:$0xff] }
 0xd4e   :  { %v2501_v39 = vadd.f32 %v2499_v24, %v2461_v14  ;;  %v2505_v48 = vsub.f32 1.0, %v4830_v11  ;;  %v2509_v28 = vmul.f32 %v4830_v11, %v5681_v56  ;;  %v2817_v56 = vld [vmem:[#allocation8 + $0x280] sm:$0xff]  ;;  %v2998_v14 = vld [vmem:[#allocation8 + $0x310] sm:$0xff]  ;;  %v4668_v24 = vpack.c.bf16 %v2997_v5, %v2996_v35  ;;  %v3105_v35 = vld [vmem:[#allocation8 + $0x3b8] sm:$0xff] }
 0xd4f   :  { %v4604_v7 = vpack.c.bf16 %v2818_v60, %v2817_v56  ;;  %v3000_v11 = vld [vmem:[#allocation8 + $0x320] sm:$0xff]  ;;  %v2807_v56 = vld [vmem:[#allocation8 + $0x238] sm:$0xff] }
 0xd50   :  { %4833 = vtanh.f32 %v2501_v39  ;;  %v2999_v39 = vld [vmem:[#allocation8 + $0x318] sm:$0xff] }
 0xd51   :  { %4605 = vmatprep.subr.bf16.mxu1 %v4604_v7  ;;  %v4672_v29 = vpack.c.bf16 %v2999_v39, %v2998_v14  ;;  %v3106_v14 = vld [vmem:[#allocation8 + $0x3c0] sm:$0xff] }
 0xd56   :  { %v4832_v34 = vpop.eup %4831 }
 0xd57   :  { %v2506_v49 = vmul.f32 %v4832_v34, %v2504_v43  ;;  %v3001_v43 = vld [vmem:[#allocation8 + $0x328] sm:$0xff] }
 0xd58   :  { %v4676_v34 = vpack.c.bf16 %v3001_v43, %v3000_v11  ;;  %v3109_v11 = vld [vmem:[#allocation8 + $0x3d8] sm:$0xff] }
 0xd59   :  { %v2510_v55 = vadd.f32 %v2508_v4, %v2506_v49  ;;  %v3002_v49 = vld [vmem:[#allocation8 + $0x330] sm:$0xff]  ;;  %v3003_v4 = vld [vmem:[#allocation8 + $0x338] sm:$0xff] }
 0xd5a   :  { %v4834_v6 = vpop.eup %4833 }
 0xd5b   :  { %v2512_v57 = vmax.f32 %v2510_v55, 0.0  ;;  %v2507_v59 = vmul.f32 %v4834_v6, %v2505_v48  ;;  %v4680_v55 = vpack.c.bf16 %v3003_v4, %v3002_v49  ;;  %v3004_v48 = vld [vmem:[#allocation8 + $0x340] sm:$0xff]  ;;  %v3005_v6 = vld [vmem:[#allocation8 + $0x348] sm:$0xff] }
 0xd5c   :  { %v3111_v49 = vld [vmem:[#allocation8 + $0x3e8] sm:$0xff] }
 0xd5d   :  { %3759 = vmatprep.mubr.f32.mxu0 %v2512_v57  ;;  %v2511_v19 = vadd.f32 %v2509_v28, %v2507_v59  ;;  %v4684_v57 = vpack.c.bf16 %v3005_v6, %v3004_v48  ;;  %v3006_v59 = vld [vmem:[#allocation8 + $0x350] sm:$0xff]  ;;  %v3007_v28 = vld [vmem:[#allocation8 + $0x358] sm:$0xff] }
 0xd5e   :  { %v3113_v48 = vld [vmem:[#allocation8 + $0x3f8] sm:$0xff] }
 0xd5f   :  { %v2513_v31 = vmax.f32 %v2511_v19, 0.0  ;;  %v4688_v19 = vpack.c.bf16 %v3007_v28, %v3006_v59 }
 0xd61   :  { %3760 = vmatmul.mubr.f32.vlgmr.msra.gmra.mrb[34].mxu0 %v2513_v31  ;;  %v3008_v31 = vld [vmem:[#allocation8 + $0x360] sm:$0xff] }
 0xd62   :  { %3801 = vmatprep.mubr.msk.f32.mxu0 %vm629_vm0, %v2716_v36  ;;  %v4692_v9 = vpack.c.bf16 %v3009_v0, %v3008_v31  ;;  %v2806_v36 = vld [vmem:[#allocation8 + $0x230] sm:$0xff] }
 0xd63   :  { %v4648_v60 = vpack.c.bf16 %v2807_v56, %v2806_v36 }
 0xe34   :  { %v3761_v30 = vpop.f32.mrb[34].mxu0 }
 0xe35   :  { %v2611_v63 = vadd.f32 %v3761_v30, %v3246_v16  ;;  %v2605_v15 = vpop.f32.mrb[35].mxu0 }
 0xe36   :  { %v2606_v13 = vadd.f32 %v3246_v16, %v2605_v15  ;;  %v2803_v16 = vld [vmem:[#allocation8 + $0x218] sm:$0xff] }
 0xe37   :  { %v2615_v26 = vmax.f32 %v2611_v63, 0.0  ;;  %v4640_v15 = vpack.c.bf16 %v2803_v16, %v2802_v54  ;;  %v3252_v54 = vld [vmem:[#allocation10 + $0x7] ss:$0 sm:$0xff] }
 0xe38   :  { %v2614_v38 = vmax.f32 %v2606_v13, 0.0  ;;  %v2804_v13 = vld [vmem:[#allocation8 + $0x220] sm:$0xff] }
 0xe3a   :  { %3794 = vmatprep.mubr.f32.mxu1 %v2614_v38  ;;  %v2805_v38 = vld [vmem:[#allocation8 + $0x228] sm:$0xff] }
 0xe3b   :  { %3795 = vmatmul.mubr.f32.vlgmr.msra.gmra.mrb[34].mxu1 %v2615_v26  ;;  %v4644_v26 = vpack.c.bf16 %v2805_v38, %v2804_v13 }
 0xe3c   :  { %4607 = vmatpush3.bf16.msra.mxu1 %v4604_v7  ;;  %v2809_v7 = vld [vmem:[#allocation8 + $0x248] sm:$0xff] }
 0xe3d   :  { %4609 = vmatprep.subr.bf16.mxu1 %v4608_v44  ;;  %v4652_v51 = vpack.c.bf16 %v2809_v7, %v2808_v2 }
 0xe40   :  { %4611 = vmatpush3.bf16.msra.mxu1 %v4608_v44  ;;  %v2810_v44 = vld [vmem:[#allocation8 + $0x250] sm:$0xff] }
 0xe41   :  { %4613 = vmatprep.subr.bf16.mxu1 %v4612_v21  ;;  %v4656_v12 = vpack.c.bf16 %v2811_v45, %v2810_v44 }
 0xe44   :  { %4615 = vmatpush3.bf16.msra.mxu1 %v4612_v21  ;;  %v2812_v21 = vld [vmem:[#allocation8 + $0x260] sm:$0xff] }
 0xe45   :  { %4617 = vmatprep.subr.bf16.mxu1 %v4616_v3  ;;  %v4660_v22 = vpack.c.bf16 %v2813_v62, %v2812_v21 }
 0xe48   :  { %4619 = vmatpush3.bf16.msra.mxu1 %v4616_v3  ;;  %v2814_v3 = vld [vmem:[#allocation8 + $0x270] sm:$0xff] }
 0xe49   :  { %4621 = vmatprep.subr.bf16.mxu1 %v4620_v47  ;;  %v4664_v18 = vpack.c.bf16 %v2815_v17, %v2814_v3 }
 0xe4c   :  { %4623 = vmatpush3.bf16.msra.mxu1 %v4620_v47  ;;  %v3010_v47 = vld [vmem:[#allocation8 + $0x370] sm:$0xff] }
 0xe4d   :  { %4625 = vmatprep.subr.bf16.mxu1 %v4624_v53  ;;  %v4696_v61 = vpack.c.bf16 %v3011_v52, %v3010_v47 }
 0xe50   :  { %4627 = vmatpush3.bf16.msra.mxu1 %v4624_v53  ;;  %v3098_v53 = vld [vmem:[#allocation8 + $0x380] sm:$0xff] }
 0xe51   :  { %4629 = vmatprep.subr.bf16.mxu1 %v4628_v23  ;;  %v4700_v32 = vpack.c.bf16 %v3099_v25, %v3098_v53 }
 0xe54   :  { %4631 = vmatpush3.bf16.msra.mxu1 %v4628_v23  ;;  %v3250_v23 = vld [vmem:[#allocation10 + $0x4] ss:$0 sm:$0xff] }
 0xe55   :  { %4633 = vmatprep.subr.bf16.mxu1 %v4632_v50 }
 0xe58   :  { %4635 = vmatpush3.bf16.msra.mxu1 %v4632_v50 }
 0xe59   :  { %4637 = vmatprep.subr.bf16.mxu1 %v4636_v10 }
 0xf0e   :  { %v3796_v27 = vpop.f32.mrb[34].mxu1 }
 0xf0f   :  { %v5755_v1 = vadd.f32 %v3796_v27, %v3247_v41  ;;  %v2707_v20 = vpop.f32.mrb[35].mxu1  ;;  %v3100_v27 = vld [vmem:[#allocation8 + $0x390] sm:$0xff] }
 0xf10   :  { %v2708_v46 = vadd.f32 %v3247_v41, %v2707_v20  ;;  %v3101_v20 = vld [vmem:[#allocation8 + $0x398] sm:$0xff] }
 0xf12   :  { %v4600_v42 = vpack.c.bf16 %v5755_v1, %v2708_v46 }
 0xf14   :  { %4601 = vmatprep.subr.bf16.mxu0 %v4600_v42 }
 0xf15   :  { %4603 = vmatpush3.bf16.msra.mxu0 %v4600_v42 }
 0xf16   :  { %4669 = vmatprep.subr.bf16.mxu0 %v4668_v24 }
 0xf18   :  { %3802 = vmatmul.mubr.msk.f32.vlgmr.msra.gmra.mrb[36].mxu0 %vm629_vm0, %v2717_v37  ;;  %v4704_v37 = vpack.c.bf16 %v3101_v20, %v3100_v27 }
 0xf19   :  { %4671 = vmatpush3.bf16.msra.mxu0 %v4668_v24  ;;  %v3107_v24 = vld [vmem:[#allocation8 + $0x3c8] sm:$0xff] }
 0xf1a   :  { %4673 = vmatprep.subr.bf16.mxu0 %v4672_v29  ;;  %v4716_v39 = vpack.c.bf16 %v3107_v24, %v3106_v14 }
 0xf1d   :  { %4675 = vmatpush3.bf16.msra.mxu0 %v4672_v29  ;;  %v3108_v29 = vld [vmem:[#allocation8 + $0x3d0] sm:$0xff] }
 0xf1e   :  { %4677 = vmatprep.subr.bf16.mxu0 %v4676_v34  ;;  %v4720_v43 = vpack.c.bf16 %v3109_v11, %v3108_v29 }
 0xf21   :  { %4679 = vmatpush3.bf16.msra.mxu0 %v4676_v34  ;;  %v3110_v34 = vld [vmem:[#allocation8 + $0x3e0] sm:$0xff] }
 0xf22   :  { %4681 = vmatprep.subr.bf16.mxu0 %v4680_v55  ;;  %v4724_v4 = vpack.c.bf16 %v3111_v49, %v3110_v34 }
 0xf25   :  { %4683 = vmatpush3.bf16.msra.mxu0 %v4680_v55  ;;  %v3112_v55 = vld [vmem:[#allocation8 + $0x3f0] sm:$0xff] }
 0xf26   :  { %4685 = vmatprep.subr.bf16.mxu0 %v4684_v57  ;;  %v4728_v6 = vpack.c.bf16 %v3113_v48, %v3112_v55 }
 0xf29   :  { %4687 = vmatpush3.bf16.msra.mxu0 %v4684_v57  ;;  %v3251_v57 = vld [vmem:[#allocation10 + $0x6] ss:$0 sm:$0xff] }
 0xf2a   :  { %4689 = vmatprep.subr.bf16.mxu0 %v4688_v19 }
 0xf2d   :  { %4691 = vmatpush3.bf16.msra.mxu0 %v4688_v19 }
 0xf2e   :  { %4693 = vmatprep.subr.bf16.mxu0 %v4692_v9 }
 0xf31   :  { %4695 = vmatpush3.bf16.msra.mxu0 %v4692_v9 }
 0xf32   :  { %4697 = vmatprep.subr.bf16.mxu0 %v4696_v61 }
 0xf35   :  { %4699 = vmatpush3.bf16.msra.mxu0 %v4696_v61 }
 0xf36   :  { %4701 = vmatprep.subr.bf16.mxu0 %v4700_v32 }
 0xfeb   :  { %v3803_v30 = vpop.f32.mrb[36].mxu0 }
 0xfec   :  { %v2790_v63 = vpop.f32.mrb[37].mxu0 }
 0xfed   :  { %3836 = vmatprep.mubr.f32.mxu1 %v2790_v63 }
 0xfee   :  { %3837 = vmatmul.mubr.f32.vlgmr.msra.gmra.mrb[36].mxu1 %v3803_v30 }
 0xfef   :  { %4639 = vmatpush3.bf16.msra.mxu1 %v4636_v10  ;;  %3871 = vmatprep.mubr.f32.mxu1 %v2708_v46  ;;  %v3104_v10 = vld [vmem:[#allocation8 + $0x3b0] sm:$0xff] }
 0xff0   :  { %4641 = vmatprep.subr.bf16.mxu1 %v4640_v15  ;;  %v4712_v5 = vpack.c.bf16 %v3105_v35, %v3104_v10 }
 0xff3   :  { %4643 = vmatpush3.bf16.msra.mxu1 %v4640_v15 }
 0xff4   :  { %4645 = vmatprep.subr.bf16.mxu1 %v4644_v26 }
 0xff7   :  { %4647 = vmatpush3.bf16.msra.mxu1 %v4644_v26 }
 0xff8   :  { %4649 = vmatprep.subr.bf16.mxu1 %v4648_v60 }
 0xffb   :  { %4651 = vmatpush3.bf16.msra.mxu1 %v4648_v60 }
 0xffc   :  { %4653 = vmatprep.subr.bf16.mxu1 %v4652_v51 }
 0xfff   :  { %4655 = vmatpush3.bf16.msra.mxu1 %v4652_v51 }
0x1000   :  { %4657 = vmatprep.subr.bf16.mxu1 %v4656_v12 }
0x1003   :  { %4659 = vmatpush3.bf16.msra.mxu1 %v4656_v12 }
0x1004   :  { %4661 = vmatprep.subr.bf16.mxu1 %v4660_v22 }
0x1007   :  { %4663 = vmatpush3.bf16.msra.mxu1 %v4660_v22 }
0x1008   :  { %4665 = vmatprep.subr.bf16.mxu1 %v4664_v18 }
0x100b   :  { %4667 = vmatpush3.bf16.msra.mxu1 %v4664_v18 }
0x100e   :  { %3872 = vmatmul.mubr.f32.vlgmr.msra.gmra.mrb[36].mxu1 %v5755_v1  ;;  %v3102_v1 = vld [vmem:[#allocation8 + $0x3a0] sm:$0xff] }
0x100f   :  { %v4708_v58 = vpack.c.bf16 %v3103_v33, %v3102_v1 }
0x10e1   :  { %v3873_v8 = vpop.f32.mrb[36].mxu1 }
0x10e2   :  { %v2992_v40 = vadd.f32 %v3873_v8, %v3250_v23  ;;  %v2974_v50 = vpop.f32.mrb[37].mxu1 }
0x10e3   :  { %v2991_v41 = vadd.f32 %v3250_v23, %v2974_v50 }
0x10e4   :  { %v2994_v42 = vmax.f32 %v2992_v40, 0.0 }
0x10e5   :  { %v2993_v46 = vmax.f32 %v2991_v41, 0.0 }
0x10e7   :  { %3906 = vmatprep.mubr.f32.mxu0 %v2993_v46 }
0x10e8   :  { %3907 = vmatmul.mubr.f32.vlgmr.msra.gmra.mrb[38].mxu0 %v2994_v42 }
0x10e9   :  { %4703 = vmatpush3.bf16.msra.mxu0 %v4700_v32 }
0x10ea   :  { %4705 = vmatprep.subr.bf16.mxu0 %v4704_v37 }
0x10ed   :  { %4707 = vmatpush3.bf16.msra.mxu0 %v4704_v37 }
0x10ee   :  { %4709 = vmatprep.subr.bf16.mxu0 %v4708_v58 }
0x10f1   :  { %4711 = vmatpush3.bf16.msra.mxu0 %v4708_v58 }
0x10f2   :  { %4713 = vmatprep.subr.bf16.mxu0 %v4712_v5 }
0x10f5   :  { %4715 = vmatpush3.bf16.msra.mxu0 %v4712_v5 }
0x10f6   :  { %4717 = vmatprep.subr.bf16.mxu0 %v4716_v39 }
0x10f9   :  { %4719 = vmatpush3.bf16.msra.mxu0 %v4716_v39 }
0x10fa   :  { %4721 = vmatprep.subr.bf16.mxu0 %v4720_v43 }
0x10fd   :  { %4723 = vmatpush3.bf16.msra.mxu0 %v4720_v43 }
0x10fe   :  { %4725 = vmatprep.subr.bf16.mxu0 %v4724_v4 }
0x1101   :  { %4727 = vmatpush3.bf16.msra.mxu0 %v4724_v4 }
0x1102   :  { %4729 = vmatprep.subr.bf16.mxu0 %v4728_v6 }
0x1105   :  { %4731 = vmatpush3.bf16.msra.mxu0 %v4728_v6 }
0x11bb   :  { %v3908_v59 = vpop.f32.mrb[38].mxu0 }
0x11bc   :  { %v3092_v28 = vadd.f32 %v3908_v59, %v3251_v57  ;;  %v3086_v19 = vpop.f32.mrb[39].mxu0 }
0x11bd   :  { %v3087_v31 = vadd.f32 %v3251_v57, %v3086_v19 }
0x11be   :  { %v3096_v9 = vmax.f32 %v3092_v28, 0.0 }
0x11bf   :  { %v3095_v0 = vmax.f32 %v3087_v31, 0.0 }
0x11c1   :  { %3941 = vmatprep.mubr.f32.mxu0 %v3095_v0 }
0x11c2   :  { %3942 = vmatmul.mubr.f32.vlgmr.msra.gmra.mrb[40].mxu0 %v3096_v9 }
0x1295   :  { %v3943_v16 = vpop.f32.mrb[40].mxu0 }
0x1296   :  { %v3194_v30 = vadd.f32 %v3943_v16, %v3252_v54  ;;  %v3188_v63 = vpop.f32.mrb[41].mxu0 }
0x1297   :  { %v3189_v15 = vadd.f32 %v3252_v54, %v3188_v63 }
0x1298   :  { %3198 = vst [vmem:[#allocation17 + $0x8] sm:$0xff] %v3194_v30 }
0x1299   :  { %3197 = vst [vmem:[#allocation17] sm:$0xff] %v3189_v15 }
0x129a   :  { %5046 = shalt.err (!%p5043_p6)
}
0x129b   :  { %s5047_s17 = scalar_lea.hbm %s5784_s9, 256 }
0x129c   :  { %p5048_p7 = scmp.ne.s32.totalorder %s5784_s9, %s5047_s17  ;;  %p5051_p8 = scmp.lt.u32.totalorder %s5047_s17, %s5784_s9 }
0x129e   :  { %p5053_p9 = pnand %p5051_p8, %p5048_p7 }
0x12a0   :  { %5056 = shalt.err (!%p5053_p9)
}
0x12a1   :  { %3210 = dma.vmem_to_hbm [thread:$0]  %s3205_s5, 256, %s5784_s9, [#allocation4], %s5071_s21, %s5071_s21, %s5072_s22  }
0x12a2   :  { %5067 = dma.done.wait [#allocation4], 256  }
0x12a3   :  { %5068 = vsyncadd [#allocation4], 4294967040 }
0x12a4   :  { %3214 = vsyncpa [#allocation3], 1 }
0x12a5   :  { %3215 = vsyncpa [#allocation6], 1 }
0x12a6   :  { %3216 = vsyncpa [#allocation9], 1 }
0x12a7   :  { %3217 = vsyncpa [#allocation12], 1 }
0x12a8   :  { %3218 = vsyncpa [#allocation15], 1 }
0x12a9   :  { %3219 = vsyncpa [#allocation4], 1 }

</bundles_post_ra>
